<compile_context>
chip_gen: v7x
topology: tpu7x:2x2x1
jax: 0.10.0
libtpu: 0.0.40
codegen_flags: <defaults>
</compile_context>

<pallas_src>
import jax
import jax.numpy as jnp
from jax.experimental import pallas as pl
from jax.experimental.pallas import tpu as pltpu

N_GMM = 2
Z_DIM = 1
IN_DIM = 118
PAD_DIM = 128        # lane-padded feature width for x / x_hat
SLAB_DIM = 256       # single lane-dense output slab: [x_hat(128) | small(128)]
AUX_DIM = 128        # packed aux input: [eps(1) | drop_mask(10) | pad]


def dagmm_kernel(x_ref, aux_ref,
                 w1, b1, w2, b2, w3, b3, wml, bml,
                 w5, b5, w6, b6, w7, b7, w8, b8, w9, b9, w10, b10,
                 out_ref):
    f32 = jnp.float32
    x = x_ref[...]                       # (T, 128); cols 118..127 are zero
    aux = aux_ref[...]                   # (T, 128)
    eps = aux[:, 0:1]                    # reparameterization noise
    mask = aux[:, 1:1 + 10]              # dropout keep-mask (0/1)

    def lin(h, w, b):
        return jnp.dot(h, w[...], preferred_element_type=f32) + b[...]

    # ----- encode -----
    h = jnp.tanh(lin(x, w1, b1))
    h = jnp.tanh(lin(h, w2, b2))
    h = jnp.tanh(lin(h, w3, b3))
    ml = lin(h, wml, bml)                # fused fc_mean | fc_logvar  -> (T, 2)
    mu = ml[:, 0:1]
    logvar = ml[:, 1:2]
    std = jnp.exp(f32(0.5) * logvar)
    z_c = mu + eps * std                 # reparameterization trick   -> (T, 1)

    # ----- decode -----
    # fc5 has K=1: do it on the VPU as a broadcast multiply-add (no MXU round-trip)
    d = jnp.tanh(z_c * w5[...] + b5[...])          # (T,1)*(1,10) -> (T,10)
    d = jnp.tanh(lin(d, w6, b6))
    d = jnp.tanh(lin(d, w7, b7))
    x_hat = lin(d, w8, b8)                         # (T,128); pad cols are zero

    # ----- reconstruction features -----
    diff = x - x_hat
    x_sq = jnp.sum(x * x, axis=1, keepdims=True)
    diff_sq = jnp.sum(diff * diff, axis=1, keepdims=True)
    xh_sq = jnp.sum(x_hat * x_hat, axis=1, keepdims=True)
    dot_xy = jnp.sum(x * x_hat, axis=1, keepdims=True)

    # relative euclidean distance: no eps clamp, matching the PyTorch reference
    rec1 = jnp.sqrt(diff_sq) * jax.lax.rsqrt(x_sq)
    eps_c = f32(1e-8)
    # cosine similarity = dot / (max(||x||,eps) * max(||x_hat||,eps)), via EUP rsqrt
    rec2 = (dot_xy
            * jax.lax.rsqrt(jnp.maximum(x_sq, eps_c * eps_c))
            * jax.lax.rsqrt(jnp.maximum(xh_sq, eps_c * eps_c)))

    # ----- estimate -----
    # fc9 has K=3: three rank-1 VPU updates instead of a concat + degenerate matmul
    h9 = jnp.tanh(z_c * w9[0:1, :] + rec1 * w9[1:2, :] + rec2 * w9[2:3, :] + b9[...])
    # F.dropout(p=0.5) defaults to training=True: mask and rescale by 1/(1-p)=2
    h9 = h9 * mask * f32(2.0)
    logits = lin(h9, w10, b10)                     # (T, 2)
    m = jnp.max(logits, axis=1, keepdims=True)
    e = jnp.exp(logits - m)
    gamma = e * pl.reciprocal(jnp.sum(e, axis=1, keepdims=True), approx=True)

    # ----- pack outputs into one lane-dense slab -----
    tile = x.shape[0]
    small = jnp.concatenate(
        [mu, logvar, z_c, rec1, rec2, gamma,
         jnp.zeros((tile, PAD_DIM - (5 + N_GMM)), f32)], axis=1)   # (T,128)
    out_ref[...] = jnp.concatenate([x_hat, small], axis=1)          # (T,256)


def init_params(key):
    """PyTorch-Linear-style uniform(-1/sqrt(fan_in), 1/sqrt(fan_in)) init,
    stored in kernel layout: W as (in, out), b as (1, out)."""
    def linear(k, fan_in, fan_out):
        kw, kb = jax.random.split(k)
        bound = 1.0 / float(fan_in) ** 0.5
        w = jax.random.uniform(kw, (fan_in, fan_out), jnp.float32, -bound, bound)
        b = jax.random.uniform(kb, (1, fan_out), jnp.float32, -bound, bound)
        return w, b

    keys = jax.random.split(key, 11)
    w1, b1 = linear(keys[0], IN_DIM, 60)
    w1 = jnp.pad(w1, ((0, PAD_DIM - IN_DIM), (0, 0)))     # zero rows for padded x lanes
    w2, b2 = linear(keys[1], 60, 30)
    w3, b3 = linear(keys[2], 30, 10)
    wm, bm = linear(keys[3], 10, Z_DIM)
    wv, bv = linear(keys[4], 10, Z_DIM)
    wml = jnp.concatenate([wm, wv], axis=1)               # fused fc_mean|fc_logvar
    bml = jnp.concatenate([bm, bv], axis=1)
    w5, b5 = linear(keys[5], Z_DIM, 10)                   # (1, 10)
    w6, b6 = linear(keys[6], 10, 30)
    w7, b7 = linear(keys[7], 30, 60)
    w8, b8 = linear(keys[8], 60, IN_DIM)
    w8 = jnp.pad(w8, ((0, 0), (0, PAD_DIM - IN_DIM)))     # lane-pad x_hat path to 128
    b8 = jnp.pad(b8, ((0, 0), (0, PAD_DIM - IN_DIM)))
    w9, b9 = linear(keys[9], Z_DIM + 2, 10)               # (3, 10)
    w10, b10 = linear(keys[10], 10, N_GMM)
    return [w1, b1, w2, b2, w3, b3, wml, bml,
            w5, b5, w6, b6, w7, b7, w8, b8, w9, b9, w10, b10]


def dagmm_forward(x, eps, drop_mask, params, *, tile_n=1024):
    n = x.shape[0]
    tile = n if n <= tile_n else tile_n            # keep tile a VMEM-safe size
    grid = (pl.cdiv(n, tile),)

    # lane-dense inputs
    x_pad = jnp.pad(x.astype(jnp.float32), ((0, 0), (0, PAD_DIM - IN_DIM)))
    aux = jnp.concatenate(
        [eps.astype(jnp.float32), drop_mask.astype(jnp.float32),
         jnp.zeros((n, AUX_DIM - 1 - 10), jnp.float32)], axis=1)

    batch_spec = lambda feat: pl.BlockSpec((tile, feat), lambda i: (i, 0))
    param_specs = [pl.BlockSpec(p.shape, lambda i: (0, 0)) for p in params]  # resident

    # advisory cost estimate
    mm = 2 * n * (118 * 60 + 60 * 30 + 30 * 10 + 10 * 2 + 1 * 10
                  + 10 * 30 + 30 * 60 + 60 * 118 + 3 * 10 + 10 * 2)
    param_bytes = sum(int(p.size) * 4 for p in params)
    cost = pl.CostEstimate(
        flops=mm,
        transcendentals=n * 230,
        bytes_accessed=n * (PAD_DIM + AUX_DIM + SLAB_DIM) * 4 + param_bytes)

    slab = pl.pallas_call(
        dagmm_kernel,
        out_shape=jax.ShapeDtypeStruct((n, SLAB_DIM), jnp.float32),
        grid=grid,
        in_specs=[batch_spec(PAD_DIM), batch_spec(AUX_DIM)] + param_specs,
        out_specs=pl.BlockSpec((tile, SLAB_DIM), lambda i: (i, 0)),
        compiler_params=pltpu.CompilerParams(
            dimension_semantics=("parallel",),          # v7x: shard batch over 2 TCs
            vmem_limit_bytes=48 * 1024 * 1024),
        cost_estimate=cost,
    )(x_pad, aux, *params)

    # un-pack the lane-dense slab
    x_hat = slab[:, :IN_DIM]
    mu = slab[:, PAD_DIM + 0:PAD_DIM + 1]
    logvar = slab[:, PAD_DIM + 1:PAD_DIM + 2]
    z_c = slab[:, PAD_DIM + 2:PAD_DIM + 3]
    z = slab[:, PAD_DIM + 2:PAD_DIM + 5]          # [z_c, rec1, rec2]
    gamma = slab[:, PAD_DIM + 5:PAD_DIM + 5 + N_GMM]
    return mu, logvar, z_c, x_hat, z, gamma


if __name__ == "__main__":
    key = jax.random.PRNGKey(0)
    kx, keps, kmask, kparams = jax.random.split(key, 4)

    n = 256                                        # small batch; tile 128 -> grid of 2
    x = jax.random.normal(kx, (n, IN_DIM), jnp.float32)
    eps = jax.random.normal(keps, (n, Z_DIM), jnp.float32)           # reparam noise
    drop_mask = jax.random.bernoulli(kmask, 0.5, (n, 10)).astype(jnp.float32)
    params = init_params(kparams)

    fwd = jax.jit(lambda a, b, c, p: dagmm_forward(a, b, c, p, tile_n=128))
    mu, logvar, z_c, x_hat, z, gamma = fwd(x, eps, drop_mask, params)
    jax.block_until_ready((mu, logvar, z_c, x_hat, z, gamma))

    assert mu.shape == (n, Z_DIM) and logvar.shape == (n, Z_DIM)
    assert z_c.shape == (n, Z_DIM) and x_hat.shape == (n, IN_DIM)
    assert z.shape == (n, Z_DIM + 2) and gamma.shape == (n, N_GMM)
    assert bool(jnp.all(jnp.isfinite(gamma)))
    # softmax rows sum to ~1 (approx reciprocal -> loose tolerance)
    assert bool(jnp.max(jnp.abs(jnp.sum(gamma, axis=1) - 1.0)) < 1e-2)
    print("KERNEL_OK")
</pallas_src>

<mosaic_0001>
module attributes {stable_mosaic.version = 11 : i64} {
  func.func @dagmm_kernel(%arg0: i32, %arg1: memref<128x128xf32, #tpu.memory_space<vmem>>, %arg2: memref<128x128xf32, #tpu.memory_space<vmem>>, %arg3: memref<128x60xf32, #tpu.memory_space<vmem>>, %arg4: memref<1x60xf32, #tpu.memory_space<vmem>>, %arg5: memref<60x30xf32, #tpu.memory_space<vmem>>, %arg6: memref<1x30xf32, #tpu.memory_space<vmem>>, %arg7: memref<30x10xf32, #tpu.memory_space<vmem>>, %arg8: memref<1x10xf32, #tpu.memory_space<vmem>>, %arg9: memref<10x2xf32, #tpu.memory_space<vmem>>, %arg10: memref<1x2xf32, #tpu.memory_space<vmem>>, %arg11: memref<1x10xf32, #tpu.memory_space<vmem>>, %arg12: memref<1x10xf32, #tpu.memory_space<vmem>>, %arg13: memref<10x30xf32, #tpu.memory_space<vmem>>, %arg14: memref<1x30xf32, #tpu.memory_space<vmem>>, %arg15: memref<30x60xf32, #tpu.memory_space<vmem>>, %arg16: memref<1x60xf32, #tpu.memory_space<vmem>>, %arg17: memref<60x128xf32, #tpu.memory_space<vmem>>, %arg18: memref<1x128xf32, #tpu.memory_space<vmem>>, %arg19: memref<3x10xf32, #tpu.memory_space<vmem>>, %arg20: memref<1x10xf32, #tpu.memory_space<vmem>>, %arg21: memref<10x2xf32, #tpu.memory_space<vmem>>, %arg22: memref<1x2xf32, #tpu.memory_space<vmem>>, %arg23: memref<128x256xf32, #tpu.memory_space<vmem>>) attributes {dimension_semantics = [#tpu.dimension_semantics<parallel>], iteration_bounds = array<i64: 2>, scalar_prefetch = 0 : i64, scratch_operands = 0 : i64, tpu.core_type = #tpu.core_type<tc>, window_params = [{transform_indices = @transform_0, window_bounds = array<i64: 128, 128>}, {transform_indices = @transform_1, window_bounds = array<i64: 128, 128>}, {pipeline_mode = #tpu.pipeline_mode<synchronous>, transform_indices = @transform_2, window_bounds = array<i64: 128, 60>}, {pipeline_mode = #tpu.pipeline_mode<synchronous>, transform_indices = @transform_3, window_bounds = array<i64: 1, 60>}, {pipeline_mode = #tpu.pipeline_mode<synchronous>, transform_indices = @transform_4, window_bounds = array<i64: 60, 30>}, {pipeline_mode = #tpu.pipeline_mode<synchronous>, transform_indices = @transform_5, window_bounds = array<i64: 1, 30>}, {pipeline_mode = #tpu.pipeline_mode<synchronous>, transform_indices = @transform_6, window_bounds = array<i64: 30, 10>}, {pipeline_mode = #tpu.pipeline_mode<synchronous>, transform_indices = @transform_7, window_bounds = array<i64: 1, 10>}, {pipeline_mode = #tpu.pipeline_mode<synchronous>, transform_indices = @transform_8, window_bounds = array<i64: 10, 2>}, {pipeline_mode = #tpu.pipeline_mode<synchronous>, transform_indices = @transform_9, window_bounds = array<i64: 1, 2>}, {pipeline_mode = #tpu.pipeline_mode<synchronous>, transform_indices = @transform_10, window_bounds = array<i64: 1, 10>}, {pipeline_mode = #tpu.pipeline_mode<synchronous>, transform_indices = @transform_11, window_bounds = array<i64: 1, 10>}, {pipeline_mode = #tpu.pipeline_mode<synchronous>, transform_indices = @transform_12, window_bounds = array<i64: 10, 30>}, {pipeline_mode = #tpu.pipeline_mode<synchronous>, transform_indices = @transform_13, window_bounds = array<i64: 1, 30>}, {pipeline_mode = #tpu.pipeline_mode<synchronous>, transform_indices = @transform_14, window_bounds = array<i64: 30, 60>}, {pipeline_mode = #tpu.pipeline_mode<synchronous>, transform_indices = @transform_15, window_bounds = array<i64: 1, 60>}, {pipeline_mode = #tpu.pipeline_mode<synchronous>, transform_indices = @transform_16, window_bounds = array<i64: 60, 128>}, {pipeline_mode = #tpu.pipeline_mode<synchronous>, transform_indices = @transform_17, window_bounds = array<i64: 1, 128>}, {pipeline_mode = #tpu.pipeline_mode<synchronous>, transform_indices = @transform_18, window_bounds = array<i64: 3, 10>}, {pipeline_mode = #tpu.pipeline_mode<synchronous>, transform_indices = @transform_19, window_bounds = array<i64: 1, 10>}, {pipeline_mode = #tpu.pipeline_mode<synchronous>, transform_indices = @transform_20, window_bounds = array<i64: 10, 2>}, {pipeline_mode = #tpu.pipeline_mode<synchronous>, transform_indices = @transform_21, window_bounds = array<i64: 1, 2>}, {transform_indices = @transform_22, window_bounds = array<i64: 128, 256>}]} {
    %c0 = arith.constant 0 : index
    %c0_0 = arith.constant 0 : index
    %0 = vector.load %arg1[%c0, %c0_0] : memref<128x128xf32, #tpu.memory_space<vmem>>, vector<128x128xf32>
    %c0_1 = arith.constant 0 : index
    %c0_2 = arith.constant 0 : index
    %1 = vector.load %arg2[%c0_1, %c0_2] : memref<128x128xf32, #tpu.memory_space<vmem>>, vector<128x128xf32>
    %2 = vector.extract_strided_slice %1 {offsets = [0, 0], sizes = [128, 1], strides = [1, 1]} : vector<128x128xf32> to vector<128x1xf32>
    %3 = vector.extract_strided_slice %1 {offsets = [0, 1], sizes = [128, 10], strides = [1, 1]} : vector<128x128xf32> to vector<128x10xf32>
    %c0_3 = arith.constant 0 : index
    %c0_4 = arith.constant 0 : index
    %4 = vector.load %arg3[%c0_3, %c0_4] : memref<128x60xf32, #tpu.memory_space<vmem>>, vector<128x60xf32>
    %cst = arith.constant dense<0.000000e+00> : vector<128x60xf32>
    %5 = tpu.matmul %0, %4, %cst {dimension_numbers = #tpu.dot_dimension_numbers<[1], [0], [0], [1], [0, 0, 1, 1], [], []>} : vector<128x128xf32>, vector<128x60xf32>, vector<128x60xf32> -> vector<128x60xf32>
    %c0_5 = arith.constant 0 : index
    %c0_6 = arith.constant 0 : index
    %6 = vector.load %arg4[%c0_5, %c0_6] : memref<1x60xf32, #tpu.memory_space<vmem>>, vector<1x60xf32>
    %7 = vector.broadcast %6 : vector<1x60xf32> to vector<128x60xf32>
    %8 = arith.addf %5, %7 : vector<128x60xf32>
    %9 = math.tanh %8 : vector<128x60xf32>
    %c0_7 = arith.constant 0 : index
    %c0_8 = arith.constant 0 : index
    %10 = vector.load %arg5[%c0_7, %c0_8] : memref<60x30xf32, #tpu.memory_space<vmem>>, vector<60x30xf32>
    %cst_9 = arith.constant dense<0.000000e+00> : vector<128x30xf32>
    %11 = tpu.matmul %9, %10, %cst_9 {dimension_numbers = #tpu.dot_dimension_numbers<[1], [0], [0], [1], [0, 0, 1, 1], [], []>} : vector<128x60xf32>, vector<60x30xf32>, vector<128x30xf32> -> vector<128x30xf32>
    %c0_10 = arith.constant 0 : index
    %c0_11 = arith.constant 0 : index
    %12 = vector.load %arg6[%c0_10, %c0_11] : memref<1x30xf32, #tpu.memory_space<vmem>>, vector<1x30xf32>
    %13 = vector.broadcast %12 : vector<1x30xf32> to vector<128x30xf32>
    %14 = arith.addf %11, %13 : vector<128x30xf32>
    %15 = math.tanh %14 : vector<128x30xf32>
    %c0_12 = arith.constant 0 : index
    %c0_13 = arith.constant 0 : index
    %16 = vector.load %arg7[%c0_12, %c0_13] : memref<30x10xf32, #tpu.memory_space<vmem>>, vector<30x10xf32>
    %cst_14 = arith.constant dense<0.000000e+00> : vector<128x10xf32>
    %17 = tpu.matmul %15, %16, %cst_14 {dimension_numbers = #tpu.dot_dimension_numbers<[1], [0], [0], [1], [0, 0, 1, 1], [], []>} : vector<128x30xf32>, vector<30x10xf32>, vector<128x10xf32> -> vector<128x10xf32>
    %c0_15 = arith.constant 0 : index
    %c0_16 = arith.constant 0 : index
    %18 = vector.load %arg8[%c0_15, %c0_16] : memref<1x10xf32, #tpu.memory_space<vmem>>, vector<1x10xf32>
    %19 = vector.broadcast %18 : vector<1x10xf32> to vector<128x10xf32>
    %20 = arith.addf %17, %19 : vector<128x10xf32>
    %21 = math.tanh %20 : vector<128x10xf32>
    %c0_17 = arith.constant 0 : index
    %c0_18 = arith.constant 0 : index
    %22 = vector.load %arg9[%c0_17, %c0_18] : memref<10x2xf32, #tpu.memory_space<vmem>>, vector<10x2xf32>
    %cst_19 = arith.constant dense<0.000000e+00> : vector<128x2xf32>
    %23 = tpu.matmul %21, %22, %cst_19 {dimension_numbers = #tpu.dot_dimension_numbers<[1], [0], [0], [1], [0, 0, 1, 1], [], []>} : vector<128x10xf32>, vector<10x2xf32>, vector<128x2xf32> -> vector<128x2xf32>
    %c0_20 = arith.constant 0 : index
    %c0_21 = arith.constant 0 : index
    %24 = vector.load %arg10[%c0_20, %c0_21] : memref<1x2xf32, #tpu.memory_space<vmem>>, vector<1x2xf32>
    %25 = vector.broadcast %24 : vector<1x2xf32> to vector<128x2xf32>
    %26 = arith.addf %23, %25 : vector<128x2xf32>
    %27 = vector.extract_strided_slice %26 {offsets = [0, 0], sizes = [128, 1], strides = [1, 1]} : vector<128x2xf32> to vector<128x1xf32>
    %28 = vector.extract_strided_slice %26 {offsets = [0, 1], sizes = [128, 1], strides = [1, 1]} : vector<128x2xf32> to vector<128x1xf32>
    %cst_22 = arith.constant 5.000000e-01 : f32
    %29 = vector.broadcast %cst_22 : f32 to vector<128x1xf32>
    %30 = arith.mulf %29, %28 : vector<128x1xf32>
    %31 = math.exp %30 : vector<128x1xf32>
    %32 = arith.mulf %2, %31 : vector<128x1xf32>
    %33 = arith.addf %27, %32 : vector<128x1xf32>
    %c0_23 = arith.constant 0 : index
    %c0_24 = arith.constant 0 : index
    %34 = vector.load %arg11[%c0_23, %c0_24] : memref<1x10xf32, #tpu.memory_space<vmem>>, vector<1x10xf32>
    %35 = vector.broadcast %33 : vector<128x1xf32> to vector<128x10xf32>
    %36 = vector.broadcast %34 : vector<1x10xf32> to vector<128x10xf32>
    %37 = arith.mulf %35, %36 : vector<128x10xf32>
    %c0_25 = arith.constant 0 : index
    %c0_26 = arith.constant 0 : index
    %38 = vector.load %arg12[%c0_25, %c0_26] : memref<1x10xf32, #tpu.memory_space<vmem>>, vector<1x10xf32>
    %39 = vector.broadcast %38 : vector<1x10xf32> to vector<128x10xf32>
    %40 = arith.addf %37, %39 : vector<128x10xf32>
    %41 = math.tanh %40 : vector<128x10xf32>
    %c0_27 = arith.constant 0 : index
    %c0_28 = arith.constant 0 : index
    %42 = vector.load %arg13[%c0_27, %c0_28] : memref<10x30xf32, #tpu.memory_space<vmem>>, vector<10x30xf32>
    %cst_29 = arith.constant dense<0.000000e+00> : vector<128x30xf32>
    %43 = tpu.matmul %41, %42, %cst_29 {dimension_numbers = #tpu.dot_dimension_numbers<[1], [0], [0], [1], [0, 0, 1, 1], [], []>} : vector<128x10xf32>, vector<10x30xf32>, vector<128x30xf32> -> vector<128x30xf32>
    %c0_30 = arith.constant 0 : index
    %c0_31 = arith.constant 0 : index
    %44 = vector.load %arg14[%c0_30, %c0_31] : memref<1x30xf32, #tpu.memory_space<vmem>>, vector<1x30xf32>
    %45 = vector.broadcast %44 : vector<1x30xf32> to vector<128x30xf32>
    %46 = arith.addf %43, %45 : vector<128x30xf32>
    %47 = math.tanh %46 : vector<128x30xf32>
    %c0_32 = arith.constant 0 : index
    %c0_33 = arith.constant 0 : index
    %48 = vector.load %arg15[%c0_32, %c0_33] : memref<30x60xf32, #tpu.memory_space<vmem>>, vector<30x60xf32>
    %cst_34 = arith.constant dense<0.000000e+00> : vector<128x60xf32>
    %49 = tpu.matmul %47, %48, %cst_34 {dimension_numbers = #tpu.dot_dimension_numbers<[1], [0], [0], [1], [0, 0, 1, 1], [], []>} : vector<128x30xf32>, vector<30x60xf32>, vector<128x60xf32> -> vector<128x60xf32>
    %c0_35 = arith.constant 0 : index
    %c0_36 = arith.constant 0 : index
    %50 = vector.load %arg16[%c0_35, %c0_36] : memref<1x60xf32, #tpu.memory_space<vmem>>, vector<1x60xf32>
    %51 = vector.broadcast %50 : vector<1x60xf32> to vector<128x60xf32>
    %52 = arith.addf %49, %51 : vector<128x60xf32>
    %53 = math.tanh %52 : vector<128x60xf32>
    %c0_37 = arith.constant 0 : index
    %c0_38 = arith.constant 0 : index
    %54 = vector.load %arg17[%c0_37, %c0_38] : memref<60x128xf32, #tpu.memory_space<vmem>>, vector<60x128xf32>
    %cst_39 = arith.constant dense<0.000000e+00> : vector<128x128xf32>
    %55 = tpu.matmul %53, %54, %cst_39 {dimension_numbers = #tpu.dot_dimension_numbers<[1], [0], [0], [1], [0, 0, 1, 1], [], []>} : vector<128x60xf32>, vector<60x128xf32>, vector<128x128xf32> -> vector<128x128xf32>
    %c0_40 = arith.constant 0 : index
    %c0_41 = arith.constant 0 : index
    %56 = vector.load %arg18[%c0_40, %c0_41] : memref<1x128xf32, #tpu.memory_space<vmem>>, vector<1x128xf32>
    %57 = vector.broadcast %56 : vector<1x128xf32> to vector<128x128xf32>
    %58 = arith.addf %55, %57 : vector<128x128xf32>
    %59 = arith.subf %0, %58 : vector<128x128xf32>
    %60 = arith.mulf %0, %0 : vector<128x128xf32>
    %cst_42 = arith.constant dense<0.000000e+00> : vector<128xf32>
    %61 = vector.multi_reduction <add>, %60, %cst_42 [1] : vector<128x128xf32> to vector<128xf32>
    %62 = vector.shape_cast %61 : vector<128xf32> to vector<128x1xf32>
    %63 = arith.mulf %59, %59 : vector<128x128xf32>
    %cst_43 = arith.constant dense<0.000000e+00> : vector<128xf32>
    %64 = vector.multi_reduction <add>, %63, %cst_43 [1] : vector<128x128xf32> to vector<128xf32>
    %65 = vector.shape_cast %64 : vector<128xf32> to vector<128x1xf32>
    %66 = arith.mulf %58, %58 : vector<128x128xf32>
    %cst_44 = arith.constant dense<0.000000e+00> : vector<128xf32>
    %67 = vector.multi_reduction <add>, %66, %cst_44 [1] : vector<128x128xf32> to vector<128xf32>
    %68 = vector.shape_cast %67 : vector<128xf32> to vector<128x1xf32>
    %69 = arith.mulf %0, %58 : vector<128x128xf32>
    %cst_45 = arith.constant dense<0.000000e+00> : vector<128xf32>
    %70 = vector.multi_reduction <add>, %69, %cst_45 [1] : vector<128x128xf32> to vector<128xf32>
    %71 = vector.shape_cast %70 : vector<128xf32> to vector<128x1xf32>
    %72 = math.sqrt %65 : vector<128x1xf32>
    %73 = math.rsqrt %62 : vector<128x1xf32>
    %74 = arith.mulf %72, %73 : vector<128x1xf32>
    %cst_46 = arith.constant 9.99999993E-9 : f32
    %cst_47 = arith.constant 9.99999993E-9 : f32
    %75 = arith.mulf %cst_46, %cst_47 : f32
    %76 = vector.broadcast %75 : f32 to vector<128x1xf32>
    %77 = arith.maximumf %62, %76 : vector<128x1xf32>
    %78 = math.rsqrt %77 : vector<128x1xf32>
    %79 = arith.mulf %71, %78 : vector<128x1xf32>
    %cst_48 = arith.constant 9.99999993E-9 : f32
    %cst_49 = arith.constant 9.99999993E-9 : f32
    %80 = arith.mulf %cst_48, %cst_49 : f32
    %81 = vector.broadcast %80 : f32 to vector<128x1xf32>
    %82 = arith.maximumf %68, %81 : vector<128x1xf32>
    %83 = math.rsqrt %82 : vector<128x1xf32>
    %84 = arith.mulf %79, %83 : vector<128x1xf32>
    %c0_50 = arith.constant 0 : index
    %c0_51 = arith.constant 0 : index
    %85 = vector.load %arg19[%c0_50, %c0_51] : memref<3x10xf32, #tpu.memory_space<vmem>>, vector<1x10xf32>
    %86 = vector.broadcast %33 : vector<128x1xf32> to vector<128x10xf32>
    %87 = vector.broadcast %85 : vector<1x10xf32> to vector<128x10xf32>
    %88 = arith.mulf %86, %87 : vector<128x10xf32>
    %c1 = arith.constant 1 : index
    %c0_52 = arith.constant 0 : index
    %89 = vector.load %arg19[%c1, %c0_52] : memref<3x10xf32, #tpu.memory_space<vmem>>, vector<1x10xf32>
    %90 = vector.broadcast %74 : vector<128x1xf32> to vector<128x10xf32>
    %91 = vector.broadcast %89 : vector<1x10xf32> to vector<128x10xf32>
    %92 = arith.mulf %90, %91 : vector<128x10xf32>
    %93 = arith.addf %88, %92 : vector<128x10xf32>
    %c2 = arith.constant 2 : index
    %c0_53 = arith.constant 0 : index
    %94 = vector.load %arg19[%c2, %c0_53] : memref<3x10xf32, #tpu.memory_space<vmem>>, vector<1x10xf32>
    %95 = vector.broadcast %84 : vector<128x1xf32> to vector<128x10xf32>
    %96 = vector.broadcast %94 : vector<1x10xf32> to vector<128x10xf32>
    %97 = arith.mulf %95, %96 : vector<128x10xf32>
    %98 = arith.addf %93, %97 : vector<128x10xf32>
    %c0_54 = arith.constant 0 : index
    %c0_55 = arith.constant 0 : index
    %99 = vector.load %arg20[%c0_54, %c0_55] : memref<1x10xf32, #tpu.memory_space<vmem>>, vector<1x10xf32>
    %100 = vector.broadcast %99 : vector<1x10xf32> to vector<128x10xf32>
    %101 = arith.addf %98, %100 : vector<128x10xf32>
    %102 = math.tanh %101 : vector<128x10xf32>
    %103 = arith.mulf %102, %3 : vector<128x10xf32>
    %cst_56 = arith.constant 2.000000e+00 : f32
    %104 = vector.broadcast %cst_56 : f32 to vector<128x10xf32>
    %105 = arith.mulf %103, %104 : vector<128x10xf32>
    %c0_57 = arith.constant 0 : index
    %c0_58 = arith.constant 0 : index
    %106 = vector.load %arg21[%c0_57, %c0_58] : memref<10x2xf32, #tpu.memory_space<vmem>>, vector<10x2xf32>
    %cst_59 = arith.constant dense<0.000000e+00> : vector<128x2xf32>
    %107 = tpu.matmul %105, %106, %cst_59 {dimension_numbers = #tpu.dot_dimension_numbers<[1], [0], [0], [1], [0, 0, 1, 1], [], []>} : vector<128x10xf32>, vector<10x2xf32>, vector<128x2xf32> -> vector<128x2xf32>
    %c0_60 = arith.constant 0 : index
    %c0_61 = arith.constant 0 : index
    %108 = vector.load %arg22[%c0_60, %c0_61] : memref<1x2xf32, #tpu.memory_space<vmem>>, vector<1x2xf32>
    %109 = vector.broadcast %108 : vector<1x2xf32> to vector<128x2xf32>
    %110 = arith.addf %107, %109 : vector<128x2xf32>
    %cst_62 = arith.constant dense<0xFF800000> : vector<128xf32>
    %111 = vector.multi_reduction <maximumf>, %110, %cst_62 [1] : vector<128x2xf32> to vector<128xf32>
    %112 = vector.shape_cast %111 : vector<128xf32> to vector<128x1xf32>
    %113 = vector.broadcast %112 : vector<128x1xf32> to vector<128x2xf32>
    %114 = arith.subf %110, %113 : vector<128x2xf32>
    %115 = math.exp %114 : vector<128x2xf32>
    %cst_63 = arith.constant dense<0.000000e+00> : vector<128xf32>
    %116 = vector.multi_reduction <add>, %115, %cst_63 [1] : vector<128x2xf32> to vector<128xf32>
    %117 = vector.shape_cast %116 : vector<128xf32> to vector<128x1xf32>
    %118 = tpu.reciprocal %117 {approx = true} : vector<128x1xf32> -> vector<128x1xf32>
    %119 = vector.broadcast %118 : vector<128x1xf32> to vector<128x2xf32>
    %120 = arith.mulf %115, %119 : vector<128x2xf32>
    %cst_64 = arith.constant 0.000000e+00 : f32
    %121 = vector.broadcast %cst_64 : f32 to vector<128x121xf32>
    %122 = tpu.concatenate %27, %28, %33, %74, %84, %120, %121 in 1 : vector<128x1xf32>, vector<128x1xf32>, vector<128x1xf32>, vector<128x1xf32>, vector<128x1xf32>, vector<128x2xf32>, vector<128x121xf32> -> vector<128x128xf32>
    %123 = tpu.concatenate %58, %122 in 1 : vector<128x128xf32>, vector<128x128xf32> -> vector<128x256xf32>
    %c0_65 = arith.constant 0 : index
    %c0_66 = arith.constant 0 : index
    %124 = vector.load %arg23[%c0_65, %c0_66] : memref<128x256xf32, #tpu.memory_space<vmem>>, vector<128x256xf32>
    tpu.vector_store %arg23[%c0_65, %c0_66], %123 {strides = array<i32>} : memref<128x256xf32, #tpu.memory_space<vmem>>, vector<128x256xf32>,
    return
  }
  func.func @transform_0(%arg0: i32) -> (i32, i32) {
    %c0_i32 = arith.constant 0 : i32
    %c0_i32_0 = arith.constant 0 : i32
    return %arg0, %c0_i32 : i32, i32
  }
  func.func @transform_1(%arg0: i32) -> (i32, i32) {
    %c0_i32 = arith.constant 0 : i32
    %c0_i32_0 = arith.constant 0 : i32
    return %arg0, %c0_i32 : i32, i32
  }
  func.func @transform_2(%arg0: i32) -> (i32, i32) {
    %c0_i32 = arith.constant 0 : i32
    %c0_i32_0 = arith.constant 0 : i32
    %c0_i32_1 = arith.constant 0 : i32
    return %c0_i32, %c0_i32_0 : i32, i32
  }
  func.func @transform_3(%arg0: i32) -> (i32, i32) {
    %c0_i32 = arith.constant 0 : i32
    %c0_i32_0 = arith.constant 0 : i32
    %c0_i32_1 = arith.constant 0 : i32
    return %c0_i32, %c0_i32_0 : i32, i32
  }
  func.func @transform_4(%arg0: i32) -> (i32, i32) {
    %c0_i32 = arith.constant 0 : i32
    %c0_i32_0 = arith.constant 0 : i32
    %c0_i32_1 = arith.constant 0 : i32
    return %c0_i32, %c0_i32_0 : i32, i32
  }
  func.func @transform_5(%arg0: i32) -> (i32, i32) {
    %c0_i32 = arith.constant 0 : i32
    %c0_i32_0 = arith.constant 0 : i32
    %c0_i32_1 = arith.constant 0 : i32
    return %c0_i32, %c0_i32_0 : i32, i32
  }
  func.func @transform_6(%arg0: i32) -> (i32, i32) {
    %c0_i32 = arith.constant 0 : i32
    %c0_i32_0 = arith.constant 0 : i32
    %c0_i32_1 = arith.constant 0 : i32
    return %c0_i32, %c0_i32_0 : i32, i32
  }
  func.func @transform_7(%arg0: i32) -> (i32, i32) {
    %c0_i32 = arith.constant 0 : i32
    %c0_i32_0 = arith.constant 0 : i32
    %c0_i32_1 = arith.constant 0 : i32
    return %c0_i32, %c0_i32_0 : i32, i32
  }
  func.func @transform_8(%arg0: i32) -> (i32, i32) {
    %c0_i32 = arith.constant 0 : i32
    %c0_i32_0 = arith.constant 0 : i32
    %c0_i32_1 = arith.constant 0 : i32
    return %c0_i32, %c0_i32_0 : i32, i32
  }
  func.func @transform_9(%arg0: i32) -> (i32, i32) {
    %c0_i32 = arith.constant 0 : i32
    %c0_i32_0 = arith.constant 0 : i32
    %c0_i32_1 = arith.constant 0 : i32
    return %c0_i32, %c0_i32_0 : i32, i32
  }
  func.func @transform_10(%arg0: i32) -> (i32, i32) {
    %c0_i32 = arith.constant 0 : i32
    %c0_i32_0 = arith.constant 0 : i32
    %c0_i32_1 = arith.constant 0 : i32
    return %c0_i32, %c0_i32_0 : i32, i32
  }
  func.func @transform_11(%arg0: i32) -> (i32, i32) {
    %c0_i32 = arith.constant 0 : i32
    %c0_i32_0 = arith.constant 0 : i32
    %c0_i32_1 = arith.constant 0 : i32
    return %c0_i32, %c0_i32_0 : i32, i32
  }
  func.func @transform_12(%arg0: i32) -> (i32, i32) {
    %c0_i32 = arith.constant 0 : i32
    %c0_i32_0 = arith.constant 0 : i32
    %c0_i32_1 = arith.constant 0 : i32
    return %c0_i32, %c0_i32_0 : i32, i32
  }
  func.func @transform_13(%arg0: i32) -> (i32, i32) {
    %c0_i32 = arith.constant 0 : i32
    %c0_i32_0 = arith.constant 0 : i32
    %c0_i32_1 = arith.constant 0 : i32
    return %c0_i32, %c0_i32_0 : i32, i32
  }
  func.func @transform_14(%arg0: i32) -> (i32, i32) {
    %c0_i32 = arith.constant 0 : i32
    %c0_i32_0 = arith.constant 0 : i32
    %c0_i32_1 = arith.constant 0 : i32
    return %c0_i32, %c0_i32_0 : i32, i32
  }
  func.func @transform_15(%arg0: i32) -> (i32, i32) {
    %c0_i32 = arith.constant 0 : i32
    %c0_i32_0 = arith.constant 0 : i32
    %c0_i32_1 = arith.constant 0 : i32
    return %c0_i32, %c0_i32_0 : i32, i32
  }
  func.func @transform_16(%arg0: i32) -> (i32, i32) {
    %c0_i32 = arith.constant 0 : i32
    %c0_i32_0 = arith.constant 0 : i32
    %c0_i32_1 = arith.constant 0 : i32
    return %c0_i32, %c0_i32_0 : i32, i32
  }
  func.func @transform_17(%arg0: i32) -> (i32, i32) {
    %c0_i32 = arith.constant 0 : i32
    %c0_i32_0 = arith.constant 0 : i32
    %c0_i32_1 = arith.constant 0 : i32
    return %c0_i32, %c0_i32_0 : i32, i32
  }
  func.func @transform_18(%arg0: i32) -> (i32, i32) {
    %c0_i32 = arith.constant 0 : i32
    %c0_i32_0 = arith.constant 0 : i32
    %c0_i32_1 = arith.constant 0 : i32
    return %c0_i32, %c0_i32_0 : i32, i32
  }
  func.func @transform_19(%arg0: i32) -> (i32, i32) {
    %c0_i32 = arith.constant 0 : i32
    %c0_i32_0 = arith.constant 0 : i32
    %c0_i32_1 = arith.constant 0 : i32
    return %c0_i32, %c0_i32_0 : i32, i32
  }
  func.func @transform_20(%arg0: i32) -> (i32, i32) {
    %c0_i32 = arith.constant 0 : i32
    %c0_i32_0 = arith.constant 0 : i32
    %c0_i32_1 = arith.constant 0 : i32
    return %c0_i32, %c0_i32_0 : i32, i32
  }
  func.func @transform_21(%arg0: i32) -> (i32, i32) {
    %c0_i32 = arith.constant 0 : i32
    %c0_i32_0 = arith.constant 0 : i32
    %c0_i32_1 = arith.constant 0 : i32
    return %c0_i32, %c0_i32_0 : i32, i32
  }
  func.func @transform_22(%arg0: i32) -> (i32, i32) {
    %c0_i32 = arith.constant 0 : i32
    %c0_i32_0 = arith.constant 0 : i32
    return %arg0, %c0_i32 : i32, i32
  }
}

</mosaic_0001>

<bundles_post_ra>
// kernel: _lambda_.1
= control target key start
LH: loop header
LB: loop body
LE: loop exit
PB: predicated region body
PF: predicated region fallthrough
CT: control target
= control target key end

     0   :  { %s7081_s0 = inlined_call_operand.vmem [shape: f32[256,128], index: 0, kind: input, shape index: {}]   ;;  %s7082_s1 = inlined_call_operand.vmem [shape: f32[256,128], index: 1, kind: input, shape index: {}]   ;;  %s7083_s2 = inlined_call_operand.vmem [shape: f32[128,60], index: 2, kind: input, shape index: {}]   ;;  %s7084_s3 = inlined_call_operand.vmem [shape: f32[1,60], index: 3, kind: input, shape index: {}]   ;;  %s7085_s4 = inlined_call_operand.vmem [shape: f32[60,30], index: 4, kind: input, shape index: {}]   ;;  %s7086_s5 = inlined_call_operand.vmem [shape: f32[1,30], index: 5, kind: input, shape index: {}]   ;;  %s7087_s6 = inlined_call_operand.vmem [shape: f32[30,10], index: 6, kind: input, shape index: {}]   ;;  %s7088_s7 = inlined_call_operand.vmem [shape: f32[1,10], index: 7, kind: input, shape index: {}]   ;;  %s7089_s8 = inlined_call_operand.vmem [shape: f32[10,2], index: 8, kind: input, shape index: {}]   ;;  %s7090_s9 = inlined_call_operand.vmem [shape: f32[1,2], index: 9, kind: input, shape index: {}]   ;;  %s7091_s10 = inlined_call_operand.vmem [shape: f32[1,10], index: 10, kind: input, shape index: {}]   ;;  %s7092_s11 = inlined_call_operand.vmem [shape: f32[1,10], index: 11, kind: input, shape index: {}]   ;;  %s7093_s12 = inlined_call_operand.vmem [shape: f32[10,30], index: 12, kind: input, shape index: {}]   ;;  %s7094_s13 = inlined_call_operand.vmem [shape: f32[1,30], index: 13, kind: input, shape index: {}]   ;;  %s7095_s14 = inlined_call_operand.vmem [shape: f32[30,60], index: 14, kind: input, shape index: {}]   ;;  %s7096_s15 = inlined_call_operand.vmem [shape: f32[1,60], index: 15, kind: input, shape index: {}]   ;;  %s7097_s16 = inlined_call_operand.vmem [shape: f32[60,128], index: 16, kind: input, shape index: {}]   ;;  %s7098_s17 = inlined_call_operand.vmem [shape: f32[1,128], index: 17, kind: input, shape index: {}]   ;;  %s7099_s18 = inlined_call_operand.vmem [shape: f32[3,10], index: 18, kind: input, shape index: {}]   ;;  %s7100_s19 = inlined_call_operand.vmem [shape: f32[1,10], index: 19, kind: input, shape index: {}]   ;;  %s7101_s20 = inlined_call_operand.vmem [shape: f32[10,2], index: 20, kind: input, shape index: {}]   ;;  %s7102_s21 = inlined_call_operand.vmem [shape: f32[1,2], index: 21, kind: input, shape index: {}]   ;;  %s7103_s22 = inlined_call_operand.vmem [shape: f32[256,256], index: 22, kind: output, shape index: {}]  }
   0x1   :  { %7149 = sst [smem:[#allocation40_spill]] %s7081_s0 }
   0x2   :  { %7150 = sst [smem:[#allocation41_spill]] %s7082_s1 }
   0x3   :  { %7151 = sst [smem:[#allocation42_spill]] %s7083_s2 }
   0x4   :  { %7152 = sst [smem:[#allocation43_spill]] %s7084_s3  ;;  %s5219_s3 = smov 0  }
   0x5   :  { %7153 = sst [smem:[#allocation44_spill]] %s7085_s4 }
   0x6   :  { %7154 = sst [smem:[#allocation45_spill]] %s7086_s5 }
   0x7   :  { %7155 = sst [smem:[#allocation46_spill]] %s7087_s6 }
   0x8 LB: > { %s3887_s28 = sadd.s32 4294967295, %s5097_s3   ;;  %p3891_p0 = scmp.ge.s32.totalorder %s5097_s3, 1  ;;  %s5097_s3 = sphi %s5219_s3, %s32_s3  }
   0x9   : > { %p624_p1 = scmp.lt.s32.totalorder %s5097_s3, 3 }
   0xb   : > { %p625_p2 = pnand %p3891_p0, %p624_p1 }
   0xd   : > { %628 = sbr.rel (%p625_p2) target bundleno = 2830 (0xb0e), region = 108 }
  0x14   : > { %s7156_s4 = sld [smem:[#allocation42_spill]]  ;;  %s3892_s24 = sshll.u32 %s3887_s28, 4  ;;  %vm991_vm0 = vcmask 1043456   ;;  %vm5099_vm1 = vmmov 1   ;;  %vm942_vm3 = vcmask 490496   ;;  %vm1216_vm4 = vcmask 1045504  }
  0x15   : > { %p693_p3 = scmp.lt.s32.totalorder %s3892_s24, 31  ;;  %s7157_s25 = sld [smem:[#allocation40_spill]]  ;;  %vm5326_vm2 = vmpackc.low %vm991_vm0, %vm5099_vm1  ;;  %vm1439_vm6 = vcmask 1041408   ;;  %vm1167_vm8 = vcmask 244736   ;;  %vm1390_vm9 = vcmask 80896  }
  0x16   : > { %s7158_s6 = sld [smem:[#allocation44_spill]]  ;;  %s7161_s1 = sld [smem:[#allocation46_spill]]  ;;  %vm5361_vm5 = vmpackc.low %vm1216_vm4, %vm5099_vm1 }
  0x17   : > { %s7247_s24 = smov (!%p693_p3, %s3892_s24), 31  ;;  %s7162_s29 = sld [smem:[#allocation43_spill]]  ;;  %vm5393_vm7 = vmpackc.low %vm1439_vm6, %vm5099_vm1 }
  0x18   : > { %s3893_s28 = sshll.u32 %s7247_s24, 3  ;;  %s7167_s23 = sld [smem:[#allocation45_spill]] }
  0x19   : > { %s7203_s0 = smov 127   ;;  %s5102_s30 = smov 2  }
  0x1a   : > { %v743_v0 = vld [vmem:[%s7156_s4] sm:$0xff]  ;;  %v744_v1 = vld [vmem:[%s7156_s4 + $0x8] sm:$0xff]  ;;  %v745_v2 = vld [vmem:[%s7156_s4 + $0x10] sm:$0xff] }
  0x1b   : > { %v4493_v3 = vpack.c.bf16 %v744_v1, %v743_v0  ;;  %v746_v4 = vld [vmem:[%s7156_s4 + $0x18] sm:$0xff]  ;;  %v747_v6 = vld [vmem:[%s7156_s4 + $0x20] sm:$0xff]  ;;  %v748_v7 = vld [vmem:[%s7156_s4 + $0x28] sm:$0xff]  ;;  %s5259_s26 = scalar_lea.vmem %s7157_s25, %s3893_s28 }
  0x1c   : > { %v4497_v5 = vpack.c.bf16 %v746_v4, %v745_v2  ;;  %v4501_v8 = vpack.c.bf16 %v748_v7, %v747_v6  ;;  %v749_v9 = vld [vmem:[%s7156_s4 + $0x30] sm:$0xff]  ;;  %v750_v10 = vld [vmem:[%s7156_s4 + $0x38] sm:$0xff]  ;;  %v711_v11 = vld [vmem:[%s5259_s26] sm:$0xff] }
  0x1d   : > { %4494 = vmatprep.subr.bf16.mxu0 %v4493_v3  ;;  %4241 = vmatprep.mubr.f32.mxu0 %v711_v11  ;;  %v4505_v12 = vpack.c.bf16 %v750_v10, %v749_v9  ;;  %v751_v13 = vld [vmem:[%s7156_s4 + $0x40] sm:$0xff]  ;;  %v752_v14 = vld [vmem:[%s7156_s4 + $0x48] sm:$0xff]  ;;  %v753_v16 = vld [vmem:[%s7156_s4 + $0x50] sm:$0xff] }
  0x1e   : > { %4496 = vmatpush3.bf16.msra.mxu0 %v4493_v3  ;;  %v4509_v15 = vpack.c.bf16 %v752_v14, %v751_v13  ;;  %v754_v17 = vld [vmem:[%s7156_s4 + $0x58] sm:$0xff]  ;;  %v755_v19 = vld [vmem:[%s7156_s4 + $0x60] sm:$0xff]  ;;  %v756_v20 = vld [vmem:[%s7156_s4 + $0x68] sm:$0xff] }
  0x1f   : > { %4498 = vmatprep.subr.bf16.mxu0 %v4497_v5  ;;  %v4513_v18 = vpack.c.bf16 %v754_v17, %v753_v16  ;;  %v4517_v21 = vpack.c.bf16 %v756_v20, %v755_v19  ;;  %v757_v22 = vld [vmem:[%s7156_s4 + $0x70] sm:$0xff]  ;;  %v758_v23 = vld [vmem:[%s7156_s4 + $0x78] sm:$0xff]  ;;  %v712_v25 = vld [vmem:[%s5259_s26 + $0x8] sm:$0xff] }
  0x20   : > { %v4521_v24 = vpack.c.bf16 %v758_v23, %v757_v22  ;;  %v713_v26 = vld [vmem:[%s5259_s26 + $0x10] sm:$0xff]  ;;  %v714_v27 = vld [vmem:[%s5259_s26 + $0x18] sm:$0xff]  ;;  %v715_v28 = vld [vmem:[%s5259_s26 + $0x20] sm:$0xff] }
  0x21   : > { %v716_v29 = vld [vmem:[%s5259_s26 + $0x28] sm:$0xff]  ;;  %v717_v30 = vld [vmem:[%s5259_s26 + $0x30] sm:$0xff]  ;;  %v718_v31 = vld [vmem:[%s5259_s26 + $0x38] sm:$0xff] }
  0x22   : > { %4500 = vmatpush3.bf16.msra.mxu0 %v4497_v5  ;;  %v719_v32 = vld [vmem:[%s5259_s26 + $0x40] sm:$0xff]  ;;  %v720_v33 = vld [vmem:[%s5259_s26 + $0x48] sm:$0xff]  ;;  %v721_v34 = vld [vmem:[%s5259_s26 + $0x50] sm:$0xff] }
  0x23   : > { %4502 = vmatprep.subr.bf16.mxu0 %v4501_v8  ;;  %v722_v35 = vld [vmem:[%s5259_s26 + $0x58] sm:$0xff]  ;;  %v723_v36 = vld [vmem:[%s5259_s26 + $0x60] sm:$0xff]  ;;  %v724_v37 = vld [vmem:[%s5259_s26 + $0x68] sm:$0xff] }
  0x24   : > { %v725_v38 = vld [vmem:[%s5259_s26 + $0x70] sm:$0xff]  ;;  %v726_v39 = vld [vmem:[%s5259_s26 + $0x78] sm:$0xff]  ;;  %v927_v40 = vld [vmem:[%s7158_s6] sm:$0xff] }
  0x25   : > { %v928_v41 = vld [vmem:[%s7158_s6 + $0x8] sm:$0xff]  ;;  %v929_v43 = vld [vmem:[%s7158_s6 + $0x10] sm:$0xff]  ;;  %v930_v44 = vld [vmem:[%s7158_s6 + $0x18] sm:$0xff] }
  0x26   : > { %4504 = vmatpush3.bf16.msra.mxu0 %v4501_v8  ;;  %v4525_v42 = vpack.c.bf16 %v928_v41, %v927_v40  ;;  %v4529_v45 = vpack.c.bf16 %v930_v44, %v929_v43  ;;  %v931_v46 = vld [vmem:[%s7158_s6 + $0x20] sm:$0xff]  ;;  %v932_v47 = vld [vmem:[%s7158_s6 + $0x28] sm:$0xff]  ;;  %v933_v49 = vld [vmem:[%s7158_s6 + $0x30] sm:$0xff] }
  0x27   : > { %4506 = vmatprep.subr.bf16.mxu0 %v4505_v12  ;;  %v4533_v48 = vpack.c.bf16 %v932_v47, %v931_v46  ;;  %v934_v50 = vld [vmem:[%s7158_s6 + $0x38] sm:$0xf]  ;;  %v1156_v53 = vld [vmem:[%s7161_s1] sm:$0xff]  ;;  %v1157_v54 = vld [vmem:[%s7161_s1 + $0x8] sm:$0xff] }
  0x28   : > { %4526 = vmatprep.subr.bf16.mxu1 %v4525_v42  ;;  %v4537_v51 = vpack.c.bf16 %v934_v50, %v933_v49  ;;  %v4543_v55 = vpack.c.bf16 %v1157_v54, %v1156_v53  ;;  %v5343_v56 = vld [vmem:[%s7162_s29] ss:$0 sm:$0xff]  ;;  %v1158_v5 = vld [vmem:[%s7161_s1 + $0x10] sm:$0xff]  ;;  %v1159_v6 = vld [vmem:[%s7161_s1 + $0x18] sm:$0x3f]  ;;  %s7107_s29 = smov 127  }
  0x29   : > { %4528 = vmatpush3.bf16.msra.mxu1 %v4525_v42  ;;  %v1381_v46 = vld [vmem:[%s7089_s8] sm:$0xff]  ;;  %v1382_v47 = vld [vmem:[%s7089_s8 + $0x8] sm:$0x3] }
  0x2a   : > { %4508 = vmatpush3.bf16.msra.mxu0 %v4505_v12  ;;  %4530 = vmatprep.subr.bf16.mxu1 %v4529_v45  ;;  %v4547_v12 = vpack.c.bf16 %v1159_v6, %v1158_v5  ;;  %v5412_v49 = vld [vmem:[%s7167_s23] ss:$0 sm:$0xff]  ;;  %s7184_s23 = sld [smem:[#allocation41_spill]] }
  0x2b   : > { %4510 = vmatprep.subr.bf16.mxu0 %v4509_v15  ;;  %v2322_v14 = vld [vmem:[%s7097_s16 + $0x20] sm:$0xff] }
  0x2d   : > { %4532 = vmatpush3.bf16.msra.mxu1 %v4529_v45 }
  0x2e   : > { %4512 = vmatpush3.bf16.msra.mxu0 %v4509_v15  ;;  %4534 = vmatprep.subr.bf16.mxu1 %v4533_v48 }
  0x2f   : > { %4514 = vmatprep.subr.bf16.mxu0 %v4513_v18 }
  0x30   : > { %s5575_s5 = scalar_lea.vmem %s7184_s23, %s3893_s28  ;;  %s4034_s28 = sshll.u32 %s7247_s24, 4 }
  0x31   : > { %4536 = vmatpush3.bf16.msra.mxu1 %v4533_v48  ;;  %v4553_v48 = vpack.c.bf16 %v1382_v47, %v1381_v46  ;;  %s6005_s1 = scalar_lea.vmem %s7103_s22, %s4034_s28 }
  0x32   : > { %4516 = vmatpush3.bf16.msra.mxu0 %v4513_v18  ;;  %4539 = vmatprep.subr.msk.bf16.mxu1 %vm5326_vm2, %v4537_v51 }
  0x33   : > { %4518 = vmatprep.subr.bf16.mxu0 %v4517_v21 }
  0x35   : > { %4542 = vmatpush3.bf16.msk.msra.mxu1 %vm5326_vm2, %v4537_v51 }
  0x36   : > { %4520 = vmatpush3.bf16.msra.mxu0 %v4517_v21  ;;  %4544 = vmatprep.subr.bf16.mxu1 %v4543_v55 }
  0x37   : > { %4522 = vmatprep.subr.bf16.mxu0 %v4521_v24 }
  0x3a   : > { %4524 = vmatpush3.bf16.msra.mxu0 %v4521_v24 }
  0x3b   : > { %4555 = vmatprep.subr.msk.bf16.mxu0 %vm5393_vm7, %v4553_v48 }
  0x3d   : > { %4242 = vmatmul.mubr.f32.vlgmr.msra.gmra.mrb[0].mxu0 %v712_v25 }
  0x3e   : > { %4244 = vmatprep.mubr.f32.mxu0 %v713_v26  ;;  %4558 = vmatpush3.bf16.msk.msra.mxu0 %vm5393_vm7, %v4553_v48 }
  0x41   : > { %4245 = vmatmul.mubr.f32.gmra.mrb[2].mxu0 %v714_v27 }
  0x42   : > { %4247 = vmatprep.mubr.f32.mxu0 %v715_v28 }
  0x45   : > { %4248 = vmatmul.mubr.f32.gmra.mrb[4].mxu0 %v716_v29 }
  0x46   : > { %4250 = vmatprep.mubr.f32.mxu0 %v717_v30 }
  0x49   : > { %4251 = vmatmul.mubr.f32.gmra.mrb[6].mxu0 %v718_v31 }
  0x4a   : > { %4253 = vmatprep.mubr.f32.mxu0 %v719_v32 }
  0x4d   : > { %4254 = vmatmul.mubr.f32.gmra.mrb[8].mxu0 %v720_v33 }
  0x4e   : > { %4256 = vmatprep.mubr.f32.mxu0 %v721_v34 }
  0x51   : > { %4257 = vmatmul.mubr.f32.gmra.mrb[10].mxu0 %v722_v35 }
  0x52   : > { %4259 = vmatprep.mubr.f32.mxu0 %v723_v36 }
  0x55   : > { %4260 = vmatmul.mubr.f32.gmra.mrb[12].mxu0 %v724_v37 }
  0x56   : > { %4262 = vmatprep.mubr.f32.mxu0 %v725_v38 }
  0x59   : > { %4263 = vmatmul.mubr.f32.gmra.mrb[14].mxu0 %v726_v39 }
 0x110   : > { %v4243_v57 = vpop.f32.mrb[0].mxu0 }
 0x111   : > { %v838_v58 = vadd.f32 %v4243_v57, %v5343_v56  ;;  %v832_v59 = vpop.f32.mrb[1].mxu0 }
 0x112   : > { %v833_v60 = vadd.f32 %v5343_v56, %v832_v59 }
 0x114   : > { %4616 = vtanh.f32 %v833_v60  ;;  %v4246_v61 = vpop.f32.mrb[2].mxu0 }
 0x115   : > { %4618 = vtanh.f32 %v838_v58  ;;  %v848_v62 = vadd.f32 %v4246_v61, %v5343_v56  ;;  %v842_v63 = vpop.f32.mrb[3].mxu0 }
 0x116   : > { %v843_v0 = vadd.f32 %v5343_v56, %v842_v63 }
 0x117   : > { %4620 = vtanh.f32 %v848_v62 }
 0x118   : > { %4622 = vtanh.f32 %v843_v0  ;;  %v4249_v1 = vpop.f32.mrb[4].mxu0 }
 0x119   : > { %v858_v2 = vadd.f32 %v4249_v1, %v5343_v56  ;;  %v852_v3 = vpop.f32.mrb[5].mxu0 }
 0x11a   : > { %v853_v4 = vadd.f32 %v5343_v56, %v852_v3 }
 0x11b   : > { %4624 = vtanh.f32 %v858_v2 }
 0x11c   : > { %4626 = vtanh.f32 %v853_v4  ;;  %v4252_v7 = vpop.f32.mrb[6].mxu0 }
 0x11d   : > { %v868_v8 = vadd.f32 %v4252_v7, %v5343_v56  ;;  %v862_v9 = vpop.f32.mrb[7].mxu0 }
 0x11e   : > { %v4617_v10 = vpop.eup %4616  ;;  %v863_v11 = vadd.f32 %v5343_v56, %v862_v9 }
 0x11f   : > { %v4619_v13 = vpop.eup %4618  ;;  %4628 = vtanh.f32 %v868_v8  ;;  %4281 = vmatprep.mubr.msk.f32.mxu1 %vm942_vm3, %v4617_v10 }
 0x120   : > { %4630 = vtanh.f32 %v863_v11  ;;  %v4255_v15 = vpop.f32.mrb[8].mxu0  ;;  %4282 = vmatmul.mubr.msk.f32.vlgmr.msra.gmra.mrb[0].mxu1 %vm942_vm3, %v4619_v13 }
 0x121   : > { %v4621_v16 = vpop.eup %4620  ;;  %v878_v17 = vadd.f32 %v4255_v15, %v5343_v56  ;;  %v872_v18 = vpop.f32.mrb[9].mxu0  ;;  %4546 = vmatpush3.bf16.msra.mxu1 %v4543_v55 }
 0x122   : > { %v4623_v19 = vpop.eup %4622  ;;  %v873_v20 = vadd.f32 %v5343_v56, %v872_v18  ;;  %4549 = vmatprep.subr.msk.bf16.mxu1 %vm5361_vm5, %v4547_v12 }
 0x123   : > { %4632 = vtanh.f32 %v878_v17  ;;  %4284 = vmatprep.mubr.msk.f32.mxu1 %vm942_vm3, %v4623_v19 }
 0x124   : > { %4634 = vtanh.f32 %v873_v20  ;;  %v4258_v21 = vpop.f32.mrb[10].mxu0  ;;  %4285 = vmatmul.mubr.msk.f32.gmra.mrb[2].mxu1 %vm942_vm3, %v4621_v16 }
 0x125   : > { %v4625_v22 = vpop.eup %4624  ;;  %v888_v23 = vadd.f32 %v4258_v21, %v5343_v56  ;;  %v882_v24 = vpop.f32.mrb[11].mxu0  ;;  %4552 = vmatpush3.bf16.msk.msra.mxu1 %vm5361_vm5, %v4547_v12 }
 0x126   : > { %v4627_v25 = vpop.eup %4626  ;;  %v883_v26 = vadd.f32 %v5343_v56, %v882_v24  ;;  %4599 = vmatprep.subr.msk.bf16.mxu1 %vm5393_vm7, %v4553_v48 }
 0x127   : > { %4636 = vtanh.f32 %v888_v23  ;;  %4287 = vmatprep.mubr.msk.f32.mxu1 %vm942_vm3, %v4627_v25 }
 0x128   : > { %4638 = vtanh.f32 %v883_v26  ;;  %v4261_v27 = vpop.f32.mrb[12].mxu0  ;;  %4288 = vmatmul.mubr.msk.f32.gmra.mrb[4].mxu1 %vm942_vm3, %v4625_v22 }
 0x129   : > { %v4629_v28 = vpop.eup %4628  ;;  %v898_v29 = vadd.f32 %v4261_v27, %v5343_v56  ;;  %v892_v30 = vpop.f32.mrb[13].mxu0 }
 0x12a   : > { %v4631_v31 = vpop.eup %4630  ;;  %v893_v32 = vadd.f32 %v5343_v56, %v892_v30 }
 0x12b   : > { %4640 = vtanh.f32 %v898_v29  ;;  %4290 = vmatprep.mubr.msk.f32.mxu1 %vm942_vm3, %v4631_v31 }
 0x12c   : > { %4642 = vtanh.f32 %v893_v32  ;;  %v4264_v33 = vpop.f32.mrb[14].mxu0  ;;  %4291 = vmatmul.mubr.msk.f32.gmra.mrb[6].mxu1 %vm942_vm3, %v4629_v28 }
 0x12d   : > { %v4633_v34 = vpop.eup %4632  ;;  %v908_v35 = vadd.f32 %v4264_v33, %v5343_v56  ;;  %v902_v36 = vpop.f32.mrb[15].mxu0 }
 0x12e   : > { %v4635_v37 = vpop.eup %4634  ;;  %v903_v38 = vadd.f32 %v5343_v56, %v902_v36  ;;  %v5451_v36 = vld [vmem:[%s7088_s7] ss:$0 sm:$0xff] }
 0x12f   : > { %4644 = vtanh.f32 %v908_v35  ;;  %4293 = vmatprep.mubr.msk.f32.mxu1 %vm942_vm3, %v4635_v37 }
 0x130   : > { %4646 = vtanh.f32 %v903_v38  ;;  %4294 = vmatmul.mubr.msk.f32.gmra.mrb[8].mxu1 %vm942_vm3, %v4633_v34 }
 0x131   : > { %v4637_v39 = vpop.eup %4636 }
 0x132   : > { %v4639_v40 = vpop.eup %4638 }
 0x133   : > { %4296 = vmatprep.mubr.msk.f32.mxu1 %vm942_vm3, %v4639_v40 }
 0x134   : > { %4297 = vmatmul.mubr.msk.f32.gmra.mrb[10].mxu1 %vm942_vm3, %v4637_v39 }
 0x135   : > { %v4641_v41 = vpop.eup %4640 }
 0x136   : > { %v4643_v42 = vpop.eup %4642 }
 0x137   : > { %4299 = vmatprep.mubr.msk.f32.mxu1 %vm942_vm3, %v4643_v42 }
 0x138   : > { %4300 = vmatmul.mubr.msk.f32.gmra.mrb[12].mxu1 %vm942_vm3, %v4641_v41 }
 0x139   : > { %v4645_v43 = vpop.eup %4644 }
 0x13a   : > { %v4647_v44 = vpop.eup %4646 }
 0x13b   : > { %4302 = vmatprep.mubr.msk.f32.mxu1 %vm942_vm3, %v4647_v44 }
 0x13c   : > { %4303 = vmatmul.mubr.msk.f32.gmra.mrb[14].mxu1 %vm942_vm3, %v4645_v43 }
 0x1f3   : > { %v4283_v50 = vpop.f32.mrb[0].mxu1 }
 0x1f4   : > { %v1067_v51 = vadd.f32 %v4283_v50, %v5412_v49  ;;  %v1061_v53 = vpop.f32.mrb[1].mxu1 }
 0x1f5   : > { %v1062_v54 = vadd.f32 %v5412_v49, %v1061_v53 }
 0x1f7   : > { %4648 = vtanh.f32 %v1062_v54  ;;  %v4286_v55 = vpop.f32.mrb[2].mxu1 }
 0x1f8   : > { %4650 = vtanh.f32 %v1067_v51  ;;  %v1077_v56 = vadd.f32 %v4286_v55, %v5412_v49  ;;  %v1071_v57 = vpop.f32.mrb[3].mxu1 }
 0x1f9   : > { %v1072_v58 = vadd.f32 %v5412_v49, %v1071_v57 }
 0x1fa   : > { %4652 = vtanh.f32 %v1077_v56 }
 0x1fb   : > { %4654 = vtanh.f32 %v1072_v58  ;;  %v4289_v59 = vpop.f32.mrb[4].mxu1 }
 0x1fc   : > { %v1087_v60 = vadd.f32 %v4289_v59, %v5412_v49  ;;  %v1081_v61 = vpop.f32.mrb[5].mxu1 }
 0x1fd   : > { %v1082_v62 = vadd.f32 %v5412_v49, %v1081_v61 }
 0x1fe   : > { %4656 = vtanh.f32 %v1087_v60 }
 0x1ff   : > { %4658 = vtanh.f32 %v1082_v62  ;;  %v4292_v63 = vpop.f32.mrb[6].mxu1 }
 0x200   : > { %v1097_v0 = vadd.f32 %v4292_v63, %v5412_v49  ;;  %v1091_v1 = vpop.f32.mrb[7].mxu1 }
 0x201   : > { %v4649_v2 = vpop.eup %4648  ;;  %v1092_v3 = vadd.f32 %v5412_v49, %v1091_v1 }
 0x202   : > { %v4651_v4 = vpop.eup %4650  ;;  %4660 = vtanh.f32 %v1097_v0  ;;  %4313 = vmatprep.mubr.msk.f32.mxu1 %vm1167_vm8, %v4649_v2 }
 0x203   : > { %4662 = vtanh.f32 %v1092_v3  ;;  %v4295_v5 = vpop.f32.mrb[8].mxu1  ;;  %4314 = vmatmul.mubr.msk.f32.vlgmr.msra.gmra.mrb[16].mxu1 %vm1167_vm8, %v4651_v4 }
 0x204   : > { %v4653_v6 = vpop.eup %4652  ;;  %v1107_v7 = vadd.f32 %v4295_v5, %v5412_v49  ;;  %v1101_v8 = vpop.f32.mrb[9].mxu1  ;;  %4600 = vmatpush3.bf16.msk.msra.mxu1 %vm5393_vm7, %v4553_v48 }
 0x205   : > { %v4655_v9 = vpop.eup %4654  ;;  %v1102_v10 = vadd.f32 %v5412_v49, %v1101_v8 }
 0x206   : > { %4664 = vtanh.f32 %v1107_v7  ;;  %4316 = vmatprep.mubr.msk.f32.mxu1 %vm1167_vm8, %v4655_v9 }
 0x207   : > { %4666 = vtanh.f32 %v1102_v10  ;;  %v4298_v11 = vpop.f32.mrb[10].mxu1  ;;  %4317 = vmatmul.mubr.msk.f32.gmra.mrb[18].mxu1 %vm1167_vm8, %v4653_v6 }
 0x208   : > { %v4657_v12 = vpop.eup %4656  ;;  %v1117_v13 = vadd.f32 %v4298_v11, %v5412_v49  ;;  %v1111_v15 = vpop.f32.mrb[11].mxu1 }
 0x209   : > { %v4659_v16 = vpop.eup %4658  ;;  %v1112_v17 = vadd.f32 %v5412_v49, %v1111_v15 }
 0x20a   : > { %4668 = vtanh.f32 %v1117_v13  ;;  %4319 = vmatprep.mubr.msk.f32.mxu1 %vm1167_vm8, %v4659_v16 }
 0x20b   : > { %4670 = vtanh.f32 %v1112_v17  ;;  %v4301_v18 = vpop.f32.mrb[12].mxu1  ;;  %4320 = vmatmul.mubr.msk.f32.gmra.mrb[20].mxu1 %vm1167_vm8, %v4657_v12 }
 0x20c   : > { %v4661_v19 = vpop.eup %4660  ;;  %v1127_v20 = vadd.f32 %v4301_v18, %v5412_v49  ;;  %v1121_v21 = vpop.f32.mrb[13].mxu1 }
 0x20d   : > { %v4663_v22 = vpop.eup %4662  ;;  %v1122_v23 = vadd.f32 %v5412_v49, %v1121_v21 }
 0x20e   : > { %4672 = vtanh.f32 %v1127_v20  ;;  %4322 = vmatprep.mubr.msk.f32.mxu1 %vm1167_vm8, %v4663_v22 }
 0x20f   : > { %4674 = vtanh.f32 %v1122_v23  ;;  %v4304_v24 = vpop.f32.mrb[14].mxu1  ;;  %4323 = vmatmul.mubr.msk.f32.gmra.mrb[22].mxu1 %vm1167_vm8, %v4661_v19 }
 0x210   : > { %v4665_v25 = vpop.eup %4664  ;;  %v1137_v26 = vadd.f32 %v4304_v24, %v5412_v49  ;;  %v1131_v27 = vpop.f32.mrb[15].mxu1  ;;  %v5488_v24 = vld [vmem:[%s7090_s9] ss:$0 sm:$0xff] }
 0x211   : > { %v4667_v28 = vpop.eup %4666  ;;  %v1132_v29 = vadd.f32 %v5412_v49, %v1131_v27 }
 0x212   : > { %4676 = vtanh.f32 %v1137_v26  ;;  %4325 = vmatprep.mubr.msk.f32.mxu1 %vm1167_vm8, %v4667_v28 }
 0x213   : > { %4678 = vtanh.f32 %v1132_v29  ;;  %4326 = vmatmul.mubr.msk.f32.gmra.mrb[24].mxu1 %vm1167_vm8, %v4665_v25 }
 0x214   : > { %v4669_v30 = vpop.eup %4668 }
 0x215   : > { %v4671_v31 = vpop.eup %4670 }
 0x216   : > { %4328 = vmatprep.mubr.msk.f32.mxu1 %vm1167_vm8, %v4671_v31 }
 0x217   : > { %4329 = vmatmul.mubr.msk.f32.gmra.mrb[26].mxu1 %vm1167_vm8, %v4669_v30 }
 0x218   : > { %v4673_v32 = vpop.eup %4672 }
 0x219   : > { %v4675_v33 = vpop.eup %4674 }
 0x21a   : > { %4331 = vmatprep.mubr.msk.f32.mxu1 %vm1167_vm8, %v4675_v33 }
 0x21b   : > { %4332 = vmatmul.mubr.msk.f32.gmra.mrb[28].mxu1 %vm1167_vm8, %v4673_v32 }
 0x21c   : > { %v4677_v34 = vpop.eup %4676 }
 0x21d   : > { %v4679_v35 = vpop.eup %4678 }
 0x21e   : > { %4334 = vmatprep.mubr.msk.f32.mxu1 %vm1167_vm8, %v4679_v35 }
 0x21f   : > { %4335 = vmatmul.mubr.msk.f32.gmra.mrb[30].mxu1 %vm1167_vm8, %v4677_v34 }
 0x2d6   : > { %v4315_v37 = vpop.f32.mrb[16].mxu1 }
 0x2d7   : > { %v1292_v38 = vadd.f32 %v4315_v37, %v5451_v36  ;;  %v1286_v39 = vpop.f32.mrb[17].mxu1 }
 0x2d8   : > { %v1287_v40 = vadd.f32 %v5451_v36, %v1286_v39 }
 0x2da   : > { %4680 = vtanh.f32 %v1287_v40  ;;  %v4318_v41 = vpop.f32.mrb[18].mxu1 }
 0x2db   : > { %4682 = vtanh.f32 %v1292_v38  ;;  %v1302_v42 = vadd.f32 %v4318_v41, %v5451_v36  ;;  %v1296_v43 = vpop.f32.mrb[19].mxu1 }
 0x2dc   : > { %v1297_v44 = vadd.f32 %v5451_v36, %v1296_v43 }
 0x2de   : > { %4684 = vtanh.f32 %v1297_v44  ;;  %v4321_v46 = vpop.f32.mrb[20].mxu1 }
 0x2df   : > { %4686 = vtanh.f32 %v1302_v42  ;;  %v1312_v47 = vadd.f32 %v4321_v46, %v5451_v36  ;;  %v1306_v48 = vpop.f32.mrb[21].mxu1  ;;  %v5100_v42 = vmov 0  }
 0x2e0   : > { %v1307_v49 = vadd.f32 %v5451_v36, %v1306_v48  ;;  %4614 = vset.pattern.permute.xlu0 %v5100_v42  ;;  %4615 = vset.pattern.permute.xlu1 %v5100_v42 }
 0x2e1   : > { %4688 = vtanh.f32 %v1312_v47 }
 0x2e2   : > { %4690 = vtanh.f32 %v1307_v49  ;;  %v4324_v50 = vpop.f32.mrb[22].mxu1 }
 0x2e3   : > { %v1322_v51 = vadd.f32 %v4324_v50, %v5451_v36  ;;  %v1316_v53 = vpop.f32.mrb[23].mxu1 }
 0x2e4   : > { %v4681_v54 = vpop.eup %4680  ;;  %v1317_v55 = vadd.f32 %v5451_v36, %v1316_v53 }
 0x2e5   : > { %v4683_v56 = vpop.eup %4682  ;;  %4692 = vtanh.f32 %v1322_v51  ;;  %4341 = vmatprep.mubr.msk.f32.mxu0 %vm1390_vm9, %v4681_v54 }
 0x2e6   : > { %4694 = vtanh.f32 %v1317_v55  ;;  %v4327_v57 = vpop.f32.mrb[24].mxu1  ;;  %4342 = vmatmul.mubr.msk.f32.vlgmr.msra.gmra.mrb[16].mxu0 %vm1390_vm9, %v4683_v56 }
 0x2e7   : > { %v1332_v58 = vadd.f32 %v4327_v57, %v5451_v36  ;;  %v1326_v59 = vpop.f32.mrb[25].mxu1 }
 0x2e8   : > { %v4685_v60 = vpop.eup %4684  ;;  %v1327_v61 = vadd.f32 %v5451_v36, %v1326_v59 }
 0x2e9   : > { %v4687_v62 = vpop.eup %4686  ;;  %4696 = vtanh.f32 %v1332_v58  ;;  %4344 = vmatprep.mubr.msk.f32.mxu0 %vm1390_vm9, %v4685_v60 }
 0x2ea   : > { %4698 = vtanh.f32 %v1327_v61  ;;  %v4330_v63 = vpop.f32.mrb[26].mxu1  ;;  %4345 = vmatmul.mubr.msk.f32.gmra.mrb[18].mxu0 %vm1390_vm9, %v4687_v62 }
 0x2eb   : > { %v4689_v0 = vpop.eup %4688  ;;  %v1342_v1 = vadd.f32 %v4330_v63, %v5451_v36  ;;  %v1336_v2 = vpop.f32.mrb[27].mxu1 }
 0x2ec   : > { %v4691_v3 = vpop.eup %4690  ;;  %v1337_v4 = vadd.f32 %v5451_v36, %v1336_v2 }
 0x2ed   : > { %4700 = vtanh.f32 %v1342_v1  ;;  %4347 = vmatprep.mubr.msk.f32.mxu0 %vm1390_vm9, %v4691_v3 }
 0x2ee   : > { %4702 = vtanh.f32 %v1337_v4  ;;  %v4333_v5 = vpop.f32.mrb[28].mxu1  ;;  %4348 = vmatmul.mubr.msk.f32.gmra.mrb[20].mxu0 %vm1390_vm9, %v4689_v0 }
 0x2ef   : > { %v4693_v6 = vpop.eup %4692  ;;  %v1352_v7 = vadd.f32 %v4333_v5, %v5451_v36  ;;  %v1346_v8 = vpop.f32.mrb[29].mxu1 }
 0x2f0   : > { %v4695_v9 = vpop.eup %4694  ;;  %v1347_v10 = vadd.f32 %v5451_v36, %v1346_v8 }
 0x2f1   : > { %4704 = vtanh.f32 %v1352_v7  ;;  %4350 = vmatprep.mubr.msk.f32.mxu0 %vm1390_vm9, %v4695_v9 }
 0x2f2   : > { %4706 = vtanh.f32 %v1347_v10  ;;  %v4336_v11 = vpop.f32.mrb[30].mxu1  ;;  %4351 = vmatmul.mubr.msk.f32.gmra.mrb[22].mxu0 %vm1390_vm9, %v4693_v6 }
 0x2f3   : > { %v4697_v12 = vpop.eup %4696  ;;  %v1362_v13 = vadd.f32 %v4336_v11, %v5451_v36  ;;  %v1356_v15 = vpop.f32.mrb[31].mxu1 }
 0x2f4   : > { %v4699_v16 = vpop.eup %4698  ;;  %v1357_v17 = vadd.f32 %v5451_v36, %v1356_v15 }
 0x2f5   : > { %4708 = vtanh.f32 %v1362_v13  ;;  %4353 = vmatprep.mubr.msk.f32.mxu0 %vm1390_vm9, %v4699_v16 }
 0x2f6   : > { %4710 = vtanh.f32 %v1357_v17  ;;  %4354 = vmatmul.mubr.msk.f32.gmra.mrb[24].mxu0 %vm1390_vm9, %v4697_v12 }
 0x2f7   : > { %v4701_v18 = vpop.eup %4700 }
 0x2f8   : > { %v4703_v19 = vpop.eup %4702 }
 0x2f9   : > { %4356 = vmatprep.mubr.msk.f32.mxu0 %vm1390_vm9, %v4703_v19 }
 0x2fa   : > { %4357 = vmatmul.mubr.msk.f32.gmra.mrb[26].mxu0 %vm1390_vm9, %v4701_v18 }
 0x2fb   : > { %v4705_v20 = vpop.eup %4704 }
 0x2fc   : > { %v4707_v21 = vpop.eup %4706 }
 0x2fd   : > { %4359 = vmatprep.mubr.msk.f32.mxu1 %vm1390_vm9, %v4707_v21 }
 0x2fe   : > { %4360 = vmatmul.mubr.msk.f32.vlgmr.msra.gmra.mrb[32].mxu1 %vm1390_vm9, %v4705_v20 }
 0x2ff   : > { %v4709_v22 = vpop.eup %4708 }
 0x300   : > { %v4711_v23 = vpop.eup %4710 }
 0x301   : > { %4362 = vmatprep.mubr.msk.f32.mxu1 %vm1390_vm9, %v4711_v23 }
 0x302   : > { %4363 = vmatmul.mubr.msk.f32.gmra.mrb[34].mxu1 %vm1390_vm9, %v4709_v22 }
 0x3b9   : > { %v4343_v25 = vpop.f32.mrb[16].mxu0 }
 0x3ba   : > { %v5491_v26 = vadd.f32 %v4343_v25, %v5488_v24  ;;  %v1509_v27 = vpop.f32.mrb[17].mxu0 }
 0x3bb   : > { %v5494_v28 = vadd.f32 %v5488_v24, %v1509_v27 }
 0x3bc   : > { %7168 = vst [vmem:[#allocation2_spill] sm:$0xff] %v5491_v26  ;;  %v1589_v29 = vmul.f32 0.5, %v5491_v26 }
 0x3bd   : > { %7169 = vst [vmem:[#allocation3_spill] sm:$0xff] %v5494_v28  ;;  %v1588_v30 = vmul.f32 0.5, %v5494_v28  ;;  %v4346_v31 = vpop.f32.mrb[18].mxu0 }
 0x3be   : > { %v5499_v32 = vadd.f32 %v4346_v31, %v5488_v24  ;;  %v1519_v33 = vpop.f32.mrb[19].mxu0  ;;  %v1606_v36 = vmul.f32 1.442695, %v1589_v29 }
 0x3bf   : > { %v1604_v34 = vmul.f32 1.442695, %v1588_v30  ;;  %v5502_v35 = vadd.f32 %v5488_v24, %v1519_v33 }
 0x3c0   : > { %7170 = vst [vmem:[#allocation4_spill] sm:$0xff] %v5499_v32  ;;  %v1591_v37 = vmul.f32 0.5, %v5499_v32 }
 0x3c1   : > { %7171 = vst [vmem:[#allocation5_spill] sm:$0xff] %v5502_v35  ;;  %4712 = vpow2.f32 %v1604_v34  ;;  %v1590_v38 = vmul.f32 0.5, %v5502_v35  ;;  %v4349_v39 = vpop.f32.mrb[20].mxu0 }
 0x3c2   : > { %v5507_v40 = vadd.f32 %v4349_v39, %v5488_v24  ;;  %v1529_v41 = vpop.f32.mrb[21].mxu0  ;;  %4714 = vpow2.f32 %v1606_v36  ;;  %v1610_v46 = vmul.f32 1.442695, %v1591_v37 }
 0x3c3   : > { %v1608_v43 = vmul.f32 1.442695, %v1590_v38  ;;  %v5510_v44 = vadd.f32 %v5488_v24, %v1529_v41 }
 0x3c4   : > { %7172 = vst [vmem:[#allocation6_spill] sm:$0xff] %v5507_v40  ;;  %v1593_v47 = vmul.f32 0.5, %v5507_v40 }
 0x3c5   : > { %7173 = vst [vmem:[#allocation7_spill] sm:$0xff] %v5510_v44  ;;  %4716 = vpow2.f32 %v1608_v43  ;;  %v1592_v48 = vmul.f32 0.5, %v5510_v44  ;;  %v4352_v49 = vpop.f32.mrb[22].mxu0 }
 0x3c6   : > { %v5515_v50 = vadd.f32 %v4352_v49, %v5488_v24  ;;  %v1539_v51 = vpop.f32.mrb[23].mxu0  ;;  %v1614_v53 = vmul.f32 1.442695, %v1593_v47  ;;  %4718 = vpow2.f32 %v1610_v46 }
 0x3c7   : > { %v1612_v54 = vmul.f32 1.442695, %v1592_v48  ;;  %v5518_v55 = vadd.f32 %v5488_v24, %v1539_v51 }
 0x3c8   : > { %7174 = vst [vmem:[#allocation8_spill] sm:$0xff] %v5515_v50  ;;  %v1595_v56 = vmul.f32 0.5, %v5515_v50 }
 0x3c9   : > { %7175 = vst [vmem:[#allocation9_spill] sm:$0xff] %v5518_v55  ;;  %4720 = vpow2.f32 %v1612_v54  ;;  %v1594_v57 = vmul.f32 0.5, %v5518_v55  ;;  %v4355_v58 = vpop.f32.mrb[24].mxu0  ;;  %v5578_v54 = vld [vmem:[%s5575_s5] sm:$0xff] }
 0x3ca   : > { %v5523_v59 = vadd.f32 %v4355_v58, %v5488_v24  ;;  %v1549_v60 = vpop.f32.mrb[25].mxu0  ;;  %4722 = vpow2.f32 %v1614_v53  ;;  %v1618_v62 = vmul.f32 1.442695, %v1595_v56  ;;  %v5582_v58 = vld [vmem:[%s5575_s5 + $0x8] sm:$0xff] }
 0x3cb   : > { %v4713_v61 = vpop.eup %4712  ;;  %v1616_v63 = vmul.f32 1.442695, %v1594_v57  ;;  %v5526_v0 = vadd.f32 %v5488_v24, %v1549_v60 }
 0x3cc   : > { %7176 = vst [vmem:[#allocation10_spill] sm:$0xff] %v5523_v59  ;;  %v1597_v1 = vmul.f32 0.5, %v5523_v59  ;;  %1652 = vrot.lane.b32.xlu0 %v4713_v61, %s7107_s29  ;;  %v4715_v4 = vpop.eup %4714  ;;  %v5588_v61 = vld [vmem:[%s5575_s5 + $0x10] sm:$0xff] }
 0x3cd   : > { %7177 = vst [vmem:[#allocation11_spill] sm:$0xff] %v5526_v0  ;;  %4724 = vpow2.f32 %v1616_v63  ;;  %v1596_v2 = vmul.f32 0.5, %v5526_v0  ;;  %v4358_v3 = vpop.f32.mrb[26].mxu0 }
 0x3ce   : > { %v5532_v5 = vadd.f32 %v4358_v3, %v5488_v24  ;;  %v1559_v6 = vpop.f32.mrb[27].mxu0  ;;  %4726 = vpow2.f32 %v1618_v62  ;;  %v1622_v8 = vmul.f32 1.442695, %v1597_v1 }
 0x3cf   : > { %v4717_v7 = vpop.eup %4716  ;;  %v1620_v9 = vmul.f32 1.442695, %v1596_v2  ;;  %v5535_v10 = vadd.f32 %v5488_v24, %v1559_v6  ;;  %v5593_v2 = vld [vmem:[%s5575_s5 + $0x18] sm:$0xff] }
 0x3d0   : > { %7178 = vst [vmem:[#allocation12_spill] sm:$0xff] %v5532_v5  ;;  %v1599_v11 = vmul.f32 0.5, %v5532_v5  ;;  %1656 = vrot.lane.b32.xlu1 %v4717_v7, %s7107_s29  ;;  %1654 = vrot.lane.b32.xlu0 %v4715_v4, %s7107_s29  ;;  %v4719_v15 = vpop.eup %4718  ;;  %v5600_v7 = vld [vmem:[%s5575_s5 + $0x20] sm:$0xff] }
 0x3d1   : > { %7179 = vst [vmem:[#allocation13_spill] sm:$0xff] %v5535_v10  ;;  %4728 = vpow2.f32 %v1620_v9  ;;  %v1598_v12 = vmul.f32 0.5, %v5535_v10  ;;  %v4361_v13 = vpop.f32.mrb[32].mxu1 }
 0x3d2   : > { %v5542_v16 = vadd.f32 %v4361_v13, %v5488_v24  ;;  %v1569_v17 = vpop.f32.mrb[33].mxu1  ;;  %4730 = vpow2.f32 %v1622_v8  ;;  %v1626_v19 = vmul.f32 1.442695, %v1599_v11  ;;  %v732_v11 = vld [vmem:[%s5575_s5 + $0x28] sm:$0xff] }
 0x3d3   : > { %v4721_v18 = vpop.eup %4720  ;;  %v1624_v20 = vmul.f32 1.442695, %v1598_v12  ;;  %v5545_v21 = vadd.f32 %v5488_v24, %v1569_v17 }
 0x3d4   : > { %7180 = vst [vmem:[#allocation14_spill] sm:$0xff] %v5542_v16  ;;  %v1601_v22 = vmul.f32 0.5, %v5542_v16  ;;  %1658 = vrot.lane.b32.xlu1 %v4719_v15, %s7107_s29  ;;  %1660 = vrot.lane.b32.xlu0 %v4721_v18, %s7107_s29  ;;  %v4723_v23 = vpop.eup %4722  ;;  %v733_v18 = vld [vmem:[%s5575_s5 + $0x30] sm:$0xff] }
 0x3d5   : > { %7181 = vst [vmem:[#allocation15_spill] sm:$0xff] %v5545_v21  ;;  %4732 = vpow2.f32 %v1624_v20  ;;  %v1600_v25 = vmul.f32 0.5, %v5545_v21  ;;  %v4364_v27 = vpop.f32.mrb[34].mxu1 }
 0x3d6   : > { %v5552_v29 = vadd.f32 %v4364_v27, %v5488_v24  ;;  %v1579_v30 = vpop.f32.mrb[35].mxu1  ;;  %4734 = vpow2.f32 %v1626_v19  ;;  %v1630_v33 = vmul.f32 1.442695, %v1601_v22  ;;  %v734_v22 = vld [vmem:[%s5575_s5 + $0x38] sm:$0xff] }
 0x3d7   : > { %v4725_v31 = vpop.eup %4724  ;;  %v1628_v34 = vmul.f32 1.442695, %v1600_v25  ;;  %v5555_v36 = vadd.f32 %v5488_v24, %v1579_v30 }
 0x3d8   : > { %7182 = vst [vmem:[#allocation16_spill] sm:$0xff] %v5552_v29  ;;  %v1603_v37 = vmul.f32 0.5, %v5552_v29  ;;  %1662 = vrot.lane.b32.xlu1 %v4723_v23, %s7107_s29  ;;  %1664 = vrot.lane.b32.xlu0 %v4725_v31, %s7107_s29  ;;  %v4727_v38 = vpop.eup %4726  ;;  %v735_v31 = vld [vmem:[%s5575_s5 + $0x40] sm:$0xff] }
 0x3d9   : > { %7183 = vst [vmem:[#allocation17_spill] sm:$0xff] %v5555_v36  ;;  %4736 = vpow2.f32 %v1628_v34  ;;  %v1602_v39 = vmul.f32 0.5, %v5555_v36 }
 0x3da   : > { %4738 = vpow2.f32 %v1630_v33  ;;  %v1634_v42 = vmul.f32 1.442695, %v1603_v37  ;;  %v736_v37 = vld [vmem:[%s5575_s5 + $0x48] sm:$0xff] }
 0x3db   : > { %v4729_v41 = vpop.eup %4728  ;;  %v1632_v43 = vmul.f32 1.442695, %v1602_v39  ;;  %v1875_v39 = vld [vmem:[%s7093_s12 + $0x8] sm:$0x3] }
 0x3dc   : > { %1666 = vrot.lane.b32.xlu1 %v4727_v38, %s7107_s29  ;;  %1668 = vrot.lane.b32.xlu0 %v4729_v41, %s7107_s29  ;;  %v4731_v24 = vpop.eup %4730  ;;  %v1874_v38 = vld [vmem:[%s7093_s12] sm:$0xff] }
 0x3dd   : > { %4740 = vpow2.f32 %v1632_v43 }
 0x3de   : > { %4742 = vpow2.f32 %v1634_v42 }
 0x3df   : > { %v4733_v46 = vpop.eup %4732 }
 0x3e0   : > { %1670 = vrot.lane.b32.xlu1 %v4731_v24, %s7107_s29  ;;  %1672 = vrot.lane.b32.xlu0 %v4733_v46, %s7107_s29  ;;  %v4735_v47 = vpop.eup %4734  ;;  %v4559_v24 = vpack.c.bf16 %v1875_v39, %v1874_v38  ;;  %v2095_v38 = vld [vmem:[%s7095_s14] sm:$0xff]  ;;  %v2096_v39 = vld [vmem:[%s7095_s14 + $0x8] sm:$0xff] }
 0x3e2   : > { %4561 = vmatprep.subr.msk.bf16.mxu1 %vm5393_vm7, %v4559_v24 }
 0x3e3   : > { %v4737_v48 = vpop.eup %4736  ;;  %4564 = vmatpush3.bf16.msk.msra.mxu1 %vm5393_vm7, %v4559_v24  ;;  %v5691_v24 = vld [vmem:[%s7091_s10] ss:$0 sm:$0xff] }
 0x3e4   : > { %1674 = vrot.lane.b32.xlu1 %v4735_v47, %s7107_s29  ;;  %1676 = vrot.lane.b32.xlu0 %v4737_v48, %s7107_s29  ;;  %v4739_v49 = vpop.eup %4738  ;;  %v737_v47 = vld [vmem:[%s5575_s5 + $0x50] sm:$0xff] }
 0x3e7   : > { %v4741_v51 = vpop.eup %4740 }
 0x3e8   : > { %1678 = vrot.lane.b32.xlu1 %v4739_v49, %s7107_s29  ;;  %1680 = vrot.lane.b32.xlu0 %v4741_v51, %s7107_s29  ;;  %v4743_v53 = vpop.eup %4742  ;;  %v738_v51 = vld [vmem:[%s5575_s5 + $0x58] sm:$0xff] }
 0x3ec   : > { %1682 = vrot.lane.b32.xlu1 %v4743_v53, %s7107_s29 }
 0x43e   : > { %v1653_v56 = vpop.permute.xlu0 %1652 }
 0x43f   : > { %v1700_v57 = vmul.f32 %v1653_v56, %v5578_v54 }
 0x441   : > { %v5585_v60 = vadd.f32 %v1700_v57, %v5494_v28 }
 0x442   : > { %v1657_v62 = vpop.permute.xlu1 %1656  ;;  %v1655_v63 = vpop.permute.xlu0 %1654 }
 0x443   : > { %7185 = vst [vmem:[#allocation18_spill] sm:$0xff] %v5585_v60  ;;  %v1701_v1 = vmul.f32 %v1655_v63, %v5582_v58  ;;  %1735 = vperm.xlu0 %4614, %v5585_v60   ;;  %v1702_v3 = vmul.f32 %v1657_v62, %v5588_v61  ;;  %v739_v63 = vld [vmem:[%s5575_s5 + $0x60] sm:$0xff] }
 0x445   : > { %v5597_v4 = vadd.f32 %v1701_v1, %v5491_v26  ;;  %v5606_v12 = vadd.f32 %v1702_v3, %v5502_v35 }
 0x446   : > { %v1659_v6 = vpop.permute.xlu1 %1658  ;;  %v1661_v8 = vpop.permute.xlu0 %1660 }
 0x447   : > { %7186 = vst [vmem:[#allocation19_spill] sm:$0xff] %v5597_v4  ;;  %v1703_v9 = vmul.f32 %v1659_v6, %v5593_v2  ;;  %1740 = vperm.xlu1 %4615, %v5597_v4   ;;  %7187 = vst [vmem:[#allocation20_spill] sm:$0xff] %v5606_v12  ;;  %v1704_v15 = vmul.f32 %v1661_v8, %v5600_v7  ;;  %v740_v6 = vld [vmem:[%s5575_s5 + $0x68] sm:$0xff] }
 0x449   : > { %v5609_v13 = vadd.f32 %v1703_v9, %v5499_v32  ;;  %v5617_v23 = vadd.f32 %v1704_v15, %v5510_v44  ;;  %v5945_v44 = vld [vmem:[%s5259_s26 + $0x70] sm:$0xff] }
 0x44a   : > { %v1663_v17 = vpop.permute.xlu1 %1662  ;;  %v1665_v19 = vpop.permute.xlu0 %1664 }
 0x44b   : > { %7188 = vst [vmem:[#allocation21_spill] sm:$0xff] %v5609_v13  ;;  %v1705_v20 = vmul.f32 %v1663_v17, %v732_v11  ;;  %1750 = vperm.xlu0 %4614, %v5609_v13   ;;  %1745 = vperm.xlu1 %4615, %v5606_v12   ;;  %7189 = vst [vmem:[#allocation22_spill] sm:$0xff] %v5617_v23  ;;  %v1706_v27 = vmul.f32 %v1665_v19, %v733_v18  ;;  %v741_v17 = vld [vmem:[%s5575_s5 + $0x70] sm:$0xff] }
 0x44d   : > { %v5620_v25 = vadd.f32 %v1705_v20, %v5507_v40  ;;  %v5633_v41 = vadd.f32 %v1706_v27, %v5518_v55  ;;  %v742_v20 = vld [vmem:[%s5575_s5 + $0x78] sm:$0xff] }
 0x44e   : > { %v1667_v30 = vpop.permute.xlu1 %1666  ;;  %v1669_v33 = vpop.permute.xlu0 %1668 }
 0x44f   : > { %7190 = vst [vmem:[#allocation23_spill] sm:$0xff] %v5620_v25  ;;  %v1707_v34 = vmul.f32 %v1667_v30, %v734_v22  ;;  %1760 = vperm.xlu0 %4614, %v5620_v25   ;;  %1755 = vperm.xlu1 %4615, %v5617_v23   ;;  %7191 = vst [vmem:[#allocation24_spill] sm:$0xff] %v5633_v41  ;;  %v1708_v43 = vmul.f32 %v1669_v33, %v735_v31 }
 0x451   : > { %v5636_v42 = vadd.f32 %v1707_v34, %v5515_v50  ;;  %v5645_v53 = vadd.f32 %v1708_v43, %v5526_v0  ;;  %v4565_v43 = vpack.c.bf16 %v2096_v39, %v2095_v38  ;;  %v5940_v50 = vld [vmem:[%s5259_s26 + $0x78] sm:$0xff] }
 0x452   : > { %v1671_v46 = vpop.permute.xlu1 %1670  ;;  %v1673_v48 = vpop.permute.xlu0 %1672 }
 0x453   : > { %7192 = vst [vmem:[#allocation25_spill] sm:$0xff] %v5636_v42  ;;  %v1709_v49 = vmul.f32 %v1671_v46, %v736_v37  ;;  %1770 = vperm.xlu0 %4614, %v5636_v42   ;;  %1765 = vperm.xlu1 %4615, %v5633_v41   ;;  %7193 = vst [vmem:[#allocation26_spill] sm:$0xff] %v5645_v53  ;;  %v1710_v57 = vmul.f32 %v1673_v48, %v737_v47  ;;  %v5696_v46 = vld [vmem:[%s7092_s11] ss:$0 sm:$0xff] }
 0x454   : > { %4566 = vmatprep.subr.bf16.mxu0 %v4565_v43 }
 0x455   : > { %v5648_v56 = vadd.f32 %v1709_v49, %v5523_v59  ;;  %v5657_v8 = vadd.f32 %v1710_v57, %v5535_v10  ;;  %4568 = vmatpush3.bf16.msra.mxu0 %v4565_v43 }
 0x456   : > { %v1675_v62 = vpop.permute.xlu1 %1674  ;;  %v1677_v1 = vpop.permute.xlu0 %1676 }
 0x457   : > { %7194 = vst [vmem:[#allocation27_spill] sm:$0xff] %v5648_v56  ;;  %v1711_v3 = vmul.f32 %v1675_v62, %v738_v51  ;;  %1780 = vperm.xlu0 %4614, %v5648_v56   ;;  %1775 = vperm.xlu1 %4615, %v5645_v53   ;;  %7195 = vst [vmem:[#allocation28_spill] sm:$0xff] %v5657_v8  ;;  %v1712_v11 = vmul.f32 %v1677_v1, %v739_v63 }
 0x459   : > { %v5660_v9 = vadd.f32 %v1711_v3, %v5532_v5  ;;  %v5667_v22 = vadd.f32 %v1712_v11, %v5545_v21  ;;  %v5925_v5 = vld [vmem:[%s5259_s26 + $0x50] sm:$0xff] }
 0x45a   : > { %v1679_v15 = vpop.permute.xlu1 %1678  ;;  %v1681_v18 = vpop.permute.xlu0 %1680  ;;  %v2555_v0 = vmul.f32 %v5925_v5, %v5925_v5 }
 0x45b   : > { %7196 = vst [vmem:[#allocation29_spill] sm:$0xff] %v5660_v9  ;;  %v1713_v19 = vmul.f32 %v1679_v15, %v740_v6  ;;  %1790 = vperm.xlu0 %4614, %v5660_v9   ;;  %1785 = vperm.xlu1 %4615, %v5657_v8   ;;  %7197 = vst [vmem:[#allocation30_spill] sm:$0xff] %v5667_v22  ;;  %v1714_v30 = vmul.f32 %v1681_v18, %v741_v17 }
 0x45d   : > { %v5670_v27 = vadd.f32 %v1713_v19, %v5542_v16  ;;  %v5675_v34 = vadd.f32 %v1714_v30, %v5555_v36 }
 0x45e   : > { %v1683_v31 = vpop.permute.xlu1 %1682 }
 0x45f   : > { %7198 = vst [vmem:[#allocation31_spill] sm:$0xff] %v5670_v27  ;;  %v1715_v33 = vmul.f32 %v1683_v31, %v742_v20  ;;  %1800 = vperm.xlu0 %4614, %v5670_v27   ;;  %1795 = vperm.xlu1 %4615, %v5667_v22   ;;  %7199 = vst [vmem:[#allocation32_spill] sm:$0xff] %v5675_v34 }
 0x461   : > { %v5678_v37 = vadd.f32 %v1715_v33, %v5552_v29 }
 0x463   : > { %7200 = vst [vmem:[#allocation33_spill] sm:$0xff] %v5678_v37  ;;  %1810 = vperm.xlu0 %4614, %v5678_v37   ;;  %1805 = vperm.xlu1 %4615, %v5675_v34  }
 0x4c2   : > { %v5698_v47 = vpop.permute.xlu0 %1735 }
 0x4c3   : > { %v1819_v48 = vmul.f32 %v5691_v24, %v5698_v47 }
 0x4c5   : > { %v1842_v49 = vadd.f32 %v5696_v46, %v1819_v48 }
 0x4c6   : > { %v5703_v51 = vpop.permute.xlu1 %1740 }
 0x4c7   : > { %4744 = vtanh.f32 %v1842_v49  ;;  %v1820_v57 = vmul.f32 %v5691_v24, %v5703_v51 }
 0x4c9   : > { %v1843_v62 = vadd.f32 %v5696_v46, %v1820_v57 }
 0x4ca   : > { %v5708_v63 = vpop.permute.xlu1 %1745  ;;  %v5710_v1 = vpop.permute.xlu0 %1750 }
 0x4cb   : > { %4746 = vtanh.f32 %v1843_v62  ;;  %v1821_v3 = vmul.f32 %v5691_v24, %v5708_v63  ;;  %v1822_v6 = vmul.f32 %v5691_v24, %v5710_v1 }
 0x4cd   : > { %v1844_v11 = vadd.f32 %v5696_v46, %v1821_v3  ;;  %v1845_v15 = vadd.f32 %v5696_v46, %v1822_v6 }
 0x4ce   : > { %v5718_v17 = vpop.permute.xlu1 %1755  ;;  %v5720_v18 = vpop.permute.xlu0 %1760 }
 0x4cf   : > { %4748 = vtanh.f32 %v1844_v11  ;;  %v1823_v19 = vmul.f32 %v5691_v24, %v5718_v17  ;;  %v1824_v20 = vmul.f32 %v5691_v24, %v5720_v18 }
 0x4d0   : > { %4750 = vtanh.f32 %v1845_v15 }
 0x4d1   : > { %v4745_v30 = vpop.eup %4744  ;;  %v1846_v31 = vadd.f32 %v5696_v46, %v1823_v19  ;;  %v1847_v33 = vadd.f32 %v5696_v46, %v1824_v20 }
 0x4d2   : > { %v5728_v38 = vpop.permute.xlu1 %1765  ;;  %4369 = vmatprep.mubr.msk.f32.mxu1 %vm1390_vm9, %v4745_v30  ;;  %v5731_v39 = vpop.permute.xlu0 %1770 }
 0x4d3   : > { %4752 = vtanh.f32 %v1846_v31  ;;  %v1825_v43 = vmul.f32 %v5691_v24, %v5728_v38  ;;  %v1826_v48 = vmul.f32 %v5691_v24, %v5731_v39 }
 0x4d4   : > { %4754 = vtanh.f32 %v1847_v33 }
 0x4d5   : > { %v4747_v49 = vpop.eup %4746  ;;  %v1848_v57 = vadd.f32 %v5696_v46, %v1825_v43  ;;  %v1849_v62 = vadd.f32 %v5696_v46, %v1826_v48 }
 0x4d6   : > { %v5739_v3 = vpop.permute.xlu1 %1775  ;;  %4370 = vmatmul.mubr.msk.f32.vlgmr.msra.gmra.mrb[36].mxu1 %vm1390_vm9, %v4747_v49  ;;  %v5742_v6 = vpop.permute.xlu0 %1780 }
 0x4d7   : > { %4756 = vtanh.f32 %v1848_v57  ;;  %v1827_v11 = vmul.f32 %v5691_v24, %v5739_v3  ;;  %v1828_v15 = vmul.f32 %v5691_v24, %v5742_v6 }
 0x4d8   : > { %4758 = vtanh.f32 %v1849_v62 }
 0x4d9   : > { %v4749_v19 = vpop.eup %4748  ;;  %v1850_v20 = vadd.f32 %v5696_v46, %v1827_v11  ;;  %v1851_v30 = vadd.f32 %v5696_v46, %v1828_v15 }
 0x4da   : > { %v4751_v31 = vpop.eup %4750  ;;  %v5750_v33 = vpop.permute.xlu1 %1785  ;;  %4372 = vmatprep.mubr.msk.f32.mxu1 %vm1390_vm9, %v4749_v19 }
 0x4db   : > { %v5753_v43 = vpop.permute.xlu0 %1790  ;;  %4760 = vtanh.f32 %v1850_v20  ;;  %v1829_v48 = vmul.f32 %v5691_v24, %v5750_v33  ;;  %4373 = vmatmul.mubr.msk.f32.gmra.mrb[38].mxu1 %vm1390_vm9, %v4751_v31 }
 0x4dc   : > { %v1830_v49 = vmul.f32 %v5691_v24, %v5753_v43  ;;  %4762 = vtanh.f32 %v1851_v30 }
 0x4dd   : > { %v4753_v57 = vpop.eup %4752  ;;  %v1852_v62 = vadd.f32 %v5696_v46, %v1829_v48 }
 0x4de   : > { %v1853_v11 = vadd.f32 %v5696_v46, %v1830_v49  ;;  %v4755_v15 = vpop.eup %4754  ;;  %v5762_v36 = vpop.permute.xlu1 %1795  ;;  %4375 = vmatprep.mubr.msk.f32.mxu1 %vm1390_vm9, %v4753_v57 }
 0x4df   : > { %v5765_v19 = vpop.permute.xlu0 %1800  ;;  %4764 = vtanh.f32 %v1852_v62  ;;  %v1831_v20 = vmul.f32 %v5691_v24, %v5762_v36  ;;  %4376 = vmatmul.mubr.msk.f32.gmra.mrb[40].mxu1 %vm1390_vm9, %v4755_v15 }
 0x4e0   : > { %v1832_v31 = vmul.f32 %v5691_v24, %v5765_v19  ;;  %4766 = vtanh.f32 %v1853_v11 }
 0x4e1   : > { %v4757_v30 = vpop.eup %4756  ;;  %v1854_v48 = vadd.f32 %v5696_v46, %v1831_v20 }
 0x4e2   : > { %v1855_v49 = vadd.f32 %v5696_v46, %v1832_v31  ;;  %v4759_v29 = vpop.eup %4758  ;;  %v5774_v21 = vpop.permute.xlu1 %1805  ;;  %4378 = vmatprep.mubr.msk.f32.mxu1 %vm1390_vm9, %v4757_v30 }
 0x4e3   : > { %7201 = vst [vmem:[#allocation34_spill] sm:$0xff] %v5774_v21  ;;  %v5777_v57 = vpop.permute.xlu0 %1810  ;;  %4768 = vtanh.f32 %v1854_v48  ;;  %v1833_v62 = vmul.f32 %v5691_v24, %v5774_v21  ;;  %4379 = vmatmul.mubr.msk.f32.gmra.mrb[42].mxu1 %vm1390_vm9, %v4759_v29 }
 0x4e4   : > { %7202 = vst [vmem:[#allocation35_spill] sm:$0xff] %v5777_v57  ;;  %v1834_v15 = vmul.f32 %v5691_v24, %v5777_v57  ;;  %4770 = vtanh.f32 %v1855_v49 }
 0x4e5   : > { %v4761_v11 = vpop.eup %4760  ;;  %v1856_v20 = vadd.f32 %v5696_v46, %v1833_v62  ;;  %v2098_v62 = vld [vmem:[%s7095_s14 + $0x18] sm:$0x3f] }
 0x4e6   : > { %v1857_v31 = vadd.f32 %v5696_v46, %v1834_v15  ;;  %v4763_v16 = vpop.eup %4762  ;;  %4381 = vmatprep.mubr.msk.f32.mxu1 %vm1390_vm9, %v4761_v11  ;;  %v2318_v11 = vld [vmem:[%s7097_s16] sm:$0xff] }
 0x4e7   : > { %4772 = vtanh.f32 %v1856_v20  ;;  %4382 = vmatmul.mubr.msk.f32.gmra.mrb[44].mxu1 %vm1390_vm9, %v4763_v16  ;;  %v2097_v16 = vld [vmem:[%s7095_s14 + $0x10] sm:$0xff]  ;;  %v2319_v20 = vld [vmem:[%s7097_s16 + $0x8] sm:$0xff] }
 0x4e8   : > { %4774 = vtanh.f32 %v1857_v31  ;;  %v4569_v15 = vpack.c.bf16 %v2098_v62, %v2097_v16  ;;  %v2320_v31 = vld [vmem:[%s7097_s16 + $0x10] sm:$0xff] }
 0x4e9   : > { %v4765_v30 = vpop.eup %4764 }
 0x4ea   : > { %v4767_v48 = vpop.eup %4766  ;;  %4384 = vmatprep.mubr.msk.f32.mxu1 %vm1390_vm9, %v4765_v30  ;;  %4571 = vmatprep.subr.msk.bf16.mxu0 %vm5361_vm5, %v4569_v15  ;;  %v4575_v30 = vpack.c.bf16 %v2319_v20, %v2318_v11 }
 0x4eb   : > { %4385 = vmatmul.mubr.msk.f32.gmra.mrb[46].mxu1 %vm1390_vm9, %v4767_v48  ;;  %4574 = vmatpush3.bf16.msk.msra.mxu0 %vm5361_vm5, %v4569_v15  ;;  %v2321_v48 = vld [vmem:[%s7097_s16 + $0x18] sm:$0xff] }
 0x4ec   : > { %4576 = vmatprep.subr.bf16.mxu1 %v4575_v30 }
 0x4ed   : > { %v4769_v29 = vpop.eup %4768  ;;  %4578 = vmatpush3.bf16.msra.mxu1 %v4575_v30 }
 0x4ee   : > { %v4771_v24 = vpop.eup %4770  ;;  %4387 = vmatprep.mubr.msk.f32.mxu1 %vm1390_vm9, %v4769_v29  ;;  %v4579_v29 = vpack.c.bf16 %v2321_v48, %v2320_v31 }
 0x4ef   : > { %4388 = vmatmul.mubr.msk.f32.gmra.mrb[48].mxu1 %vm1390_vm9, %v4771_v24  ;;  %v2323_v24 = vld [vmem:[%s7097_s16 + $0x28] sm:$0xff] }
 0x4f0   : > { %4580 = vmatprep.subr.bf16.mxu1 %v4579_v29 }
 0x4f1   : > { %v4773_v46 = vpop.eup %4772  ;;  %4582 = vmatpush3.bf16.msra.mxu1 %v4579_v29 }
 0x4f2   : > { %v4775_v49 = vpop.eup %4774  ;;  %4390 = vmatprep.mubr.msk.f32.mxu1 %vm1390_vm9, %v4773_v46  ;;  %v4583_v46 = vpack.c.bf16 %v2323_v24, %v2322_v14 }
 0x4f3   : > { %4391 = vmatmul.mubr.msk.f32.gmra.mrb[50].mxu1 %vm1390_vm9, %v4775_v49  ;;  %v5825_v49 = vld [vmem:[%s7094_s13] ss:$0 sm:$0xff] }
 0x4f4   : > { %4584 = vmatprep.subr.bf16.mxu1 %v4583_v46 }
 0x4f5   : > { %4586 = vmatpush3.bf16.msra.mxu1 %v4583_v46 }
 0x5a9   : > { %v4371_v16 = vpop.f32.mrb[36].mxu1 }
 0x5aa   : > { %v2006_v62 = vadd.f32 %v4371_v16, %v5825_v49  ;;  %v2000_v15 = vpop.f32.mrb[37].mxu1 }
 0x5ab   : > { %v2001_v11 = vadd.f32 %v5825_v49, %v2000_v15 }
 0x5ad   : > { %4776 = vtanh.f32 %v2001_v11 }
 0x5ae   : > { %4778 = vtanh.f32 %v2006_v62  ;;  %v4374_v20 = vpop.f32.mrb[38].mxu1 }
 0x5af   : > { %v2016_v31 = vadd.f32 %v4374_v20, %v5825_v49  ;;  %v2010_v30 = vpop.f32.mrb[39].mxu1 }
 0x5b0   : > { %v2011_v48 = vadd.f32 %v5825_v49, %v2010_v30 }
 0x5b2   : > { %4780 = vtanh.f32 %v2011_v48  ;;  %v4377_v29 = vpop.f32.mrb[40].mxu1 }
 0x5b3   : > { %4782 = vtanh.f32 %v2016_v31  ;;  %v2026_v14 = vadd.f32 %v4377_v29, %v5825_v49  ;;  %v2020_v24 = vpop.f32.mrb[41].mxu1 }
 0x5b4   : > { %v2021_v46 = vadd.f32 %v5825_v49, %v2020_v24 }
 0x5b6   : > { %4784 = vtanh.f32 %v2021_v46  ;;  %v4380_v16 = vpop.f32.mrb[42].mxu1 }
 0x5b7   : > { %v4777_v10 = vpop.eup %4776  ;;  %4786 = vtanh.f32 %v2026_v14  ;;  %v2036_v62 = vadd.f32 %v4380_v16, %v5825_v49  ;;  %v2030_v15 = vpop.f32.mrb[43].mxu1 }
 0x5b8   : > { %v4779_v11 = vpop.eup %4778  ;;  %v2031_v20 = vadd.f32 %v5825_v49, %v2030_v15  ;;  %4401 = vmatprep.mubr.msk.f32.mxu0 %vm1167_vm8, %v4777_v10 }
 0x5b9   : > { %4402 = vmatmul.mubr.msk.f32.vlgmr.msra.gmra.mrb[28].mxu0 %vm1167_vm8, %v4779_v11 }
 0x5ba   : > { %4788 = vtanh.f32 %v2031_v20  ;;  %v4383_v31 = vpop.f32.mrb[44].mxu1 }
 0x5bb   : > { %4790 = vtanh.f32 %v2036_v62  ;;  %v2046_v30 = vadd.f32 %v4383_v31, %v5825_v49  ;;  %v2040_v48 = vpop.f32.mrb[45].mxu1 }
 0x5bc   : > { %v4781_v29 = vpop.eup %4780  ;;  %v2041_v24 = vadd.f32 %v5825_v49, %v2040_v48 }
 0x5bd   : > { %v4783_v14 = vpop.eup %4782  ;;  %4404 = vmatprep.mubr.msk.f32.mxu0 %vm1167_vm8, %v4781_v29 }
 0x5be   : > { %4792 = vtanh.f32 %v2041_v24  ;;  %v4386_v46 = vpop.f32.mrb[46].mxu1  ;;  %4405 = vmatmul.mubr.msk.f32.gmra.mrb[30].mxu0 %vm1167_vm8, %v4783_v14 }
 0x5bf   : > { %4794 = vtanh.f32 %v2046_v30  ;;  %v2056_v10 = vadd.f32 %v4386_v46, %v5825_v49  ;;  %v2050_v16 = vpop.f32.mrb[47].mxu1 }
 0x5c0   : > { %v4785_v15 = vpop.eup %4784  ;;  %v2051_v62 = vadd.f32 %v5825_v49, %v2050_v16 }
 0x5c1   : > { %v4787_v11 = vpop.eup %4786  ;;  %4407 = vmatprep.mubr.msk.f32.mxu0 %vm1167_vm8, %v4785_v15 }
 0x5c2   : > { %4796 = vtanh.f32 %v2051_v62  ;;  %v4389_v20 = vpop.f32.mrb[48].mxu1  ;;  %4408 = vmatmul.mubr.msk.f32.gmra.mrb[32].mxu0 %vm1167_vm8, %v4787_v11 }
 0x5c3   : > { %4798 = vtanh.f32 %v2056_v10  ;;  %v2066_v31 = vadd.f32 %v4389_v20, %v5825_v49  ;;  %v2060_v48 = vpop.f32.mrb[49].mxu1 }
 0x5c4   : > { %v4789_v29 = vpop.eup %4788  ;;  %v2061_v30 = vadd.f32 %v5825_v49, %v2060_v48 }
 0x5c5   : > { %v4791_v24 = vpop.eup %4790  ;;  %4410 = vmatprep.mubr.msk.f32.mxu0 %vm1167_vm8, %v4789_v29 }
 0x5c6   : > { %4800 = vtanh.f32 %v2061_v30  ;;  %v4392_v14 = vpop.f32.mrb[50].mxu1  ;;  %4411 = vmatmul.mubr.msk.f32.gmra.mrb[34].mxu0 %vm1167_vm8, %v4791_v24  ;;  %v2324_v30 = vld [vmem:[%s7097_s16 + $0x30] sm:$0xff]  ;;  %v2325_v24 = vld [vmem:[%s7097_s16 + $0x38] sm:$0xf] }
 0x5c7   : > { %4802 = vtanh.f32 %v2066_v31  ;;  %v2076_v46 = vadd.f32 %v4392_v14, %v5825_v49  ;;  %v2070_v16 = vpop.f32.mrb[51].mxu1  ;;  %v4587_v14 = vpack.c.bf16 %v2325_v24, %v2324_v30  ;;  %v5900_v30 = vld [vmem:[%s5259_s26 + $0x38] sm:$0xff] }
 0x5c8   : > { %v4793_v15 = vpop.eup %4792  ;;  %v2071_v10 = vadd.f32 %v5825_v49, %v2070_v16  ;;  %v2552_v24 = vmul.f32 %v5900_v30, %v5900_v30 }
 0x5c9   : > { %v4795_v62 = vpop.eup %4794  ;;  %4413 = vmatprep.mubr.msk.f32.mxu0 %vm1167_vm8, %v4793_v15  ;;  %4589 = vmatprep.subr.msk.bf16.mxu1 %vm5326_vm2, %v4587_v14  ;;  %v5875_v15 = vld [vmem:[%s5259_s26] sm:$0xff] }
 0x5ca   : > { %4804 = vtanh.f32 %v2071_v10  ;;  %4414 = vmatmul.mubr.msk.f32.gmra.mrb[36].mxu0 %vm1167_vm8, %v4795_v62  ;;  %4592 = vmatpush3.bf16.msk.msra.mxu1 %vm5326_vm2, %v4587_v14  ;;  %v2545_v10 = vmul.f32 %v5875_v15, %v5875_v15  ;;  %v5880_v62 = vld [vmem:[%s5259_s26 + $0x18] sm:$0xff]  ;;  %v5905_v14 = vld [vmem:[%s5259_s26 + $0x30] sm:$0xff] }
 0x5cb   : > { %4806 = vtanh.f32 %v2076_v46  ;;  %v5870_v46 = vld [vmem:[%s5259_s26 + $0x8] sm:$0xff]  ;;  %v2548_v52 = vmul.f32 %v5880_v62, %v5880_v62 }
 0x5cc   : > { %v4797_v11 = vpop.eup %4796  ;;  %v2546_v16 = vmul.f32 %v5870_v46, %v5870_v46  ;;  %2561 = vadd.xlane.f32.xlu0 %v2545_v10  ;;  %v5910_v10 = vld [vmem:[%s5259_s26 + $0x48] sm:$0xff] }
 0x5cd   : > { %v4799_v20 = vpop.eup %4798  ;;  %4416 = vmatprep.mubr.msk.f32.mxu0 %vm1167_vm8, %v4797_v11  ;;  %v5885_v11 = vld [vmem:[%s5259_s26 + $0x10] sm:$0xff] }
 0x5ce   : > { %4417 = vmatmul.mubr.msk.f32.gmra.mrb[38].mxu0 %vm1167_vm8, %v4799_v20  ;;  %2563 = vadd.xlane.f32.xlu1 %v2546_v16  ;;  %v2547_v20 = vmul.f32 %v5885_v11, %v5885_v11  ;;  %v2551_v16 = vmul.f32 %v5905_v14, %v5905_v14 }
 0x5d0   : > { %v4801_v31 = vpop.eup %4800  ;;  %2565 = vadd.xlane.f32.xlu0 %v2547_v20  ;;  %v5915_v20 = vld [vmem:[%s5259_s26 + $0x40] sm:$0xff] }
 0x5d1   : > { %v4803_v48 = vpop.eup %4802  ;;  %4419 = vmatprep.mubr.msk.f32.mxu0 %vm1167_vm8, %v4801_v31  ;;  %v5890_v31 = vld [vmem:[%s5259_s26 + $0x28] sm:$0xff] }
 0x5d2   : > { %4420 = vmatmul.mubr.msk.f32.gmra.mrb[40].mxu0 %vm1167_vm8, %v4803_v48  ;;  %2567 = vadd.xlane.f32.xlu1 %v2548_v52  ;;  %v2550_v48 = vmul.f32 %v5890_v31, %v5890_v31  ;;  %v2554_v52 = vmul.f32 %v5910_v10, %v5910_v10 }
 0x5d4   : > { %v4805_v49 = vpop.eup %4804 }
 0x5d5   : > { %v4807_v29 = vpop.eup %4806  ;;  %4422 = vmatprep.mubr.msk.f32.mxu0 %vm1167_vm8, %v4805_v49  ;;  %v5895_v49 = vld [vmem:[%s5259_s26 + $0x20] sm:$0xff] }
 0x5d6   : > { %4423 = vmatmul.mubr.msk.f32.gmra.mrb[42].mxu0 %vm1167_vm8, %v4807_v29  ;;  %v2549_v29 = vmul.f32 %v5895_v49, %v5895_v49  ;;  %2571 = vadd.xlane.f32.xlu1 %v2550_v48  ;;  %v2553_v48 = vmul.f32 %v5915_v20, %v5915_v20 }
 0x5d8   : > { %2569 = vadd.xlane.f32.xlu0 %v2549_v29  ;;  %v5920_v29 = vld [vmem:[%s5259_s26 + $0x58] sm:$0xff] }
 0x5da   : > { %2575 = vadd.xlane.f32.xlu1 %v2552_v24  ;;  %v2556_v24 = vmul.f32 %v5920_v29, %v5920_v29 }
 0x5dc   : > { %2573 = vadd.xlane.f32.xlu0 %v2551_v16  ;;  %v5930_v16 = vld [vmem:[%s5259_s26 + $0x68] sm:$0xff] }
 0x5dd   : > { %v2558_v59 = vmul.f32 %v5930_v16, %v5930_v16 }
 0x5de   : > { %2579 = vadd.xlane.f32.xlu1 %v2554_v52  ;;  %v5935_v52 = vld [vmem:[%s5259_s26 + $0x60] sm:$0xff]  ;;  %s5103_s26 = smov 5  }
 0x5df   : > { %v2557_v55 = vmul.f32 %v5935_v52, %v5935_v52 }
 0x5e0   : > { %2577 = vadd.xlane.f32.xlu0 %v2553_v48  ;;  %v2560_v48 = vmul.f32 %v5940_v50, %v5940_v50 }
 0x5e2   : > { %2583 = vadd.xlane.f32.xlu1 %v2556_v24  ;;  %v2559_v24 = vmul.f32 %v5945_v44, %v5945_v44 }
 0x5e4   : > { %2581 = vadd.xlane.f32.xlu0 %v2555_v0 }
 0x5e6   : > { %2587 = vadd.xlane.f32.xlu1 %v2558_v59 }
 0x5e8   : > { %2585 = vadd.xlane.f32.xlu0 %v2557_v55  ;;  %v5962_v55 = vld [vmem:[%s7096_s15] ss:$0 sm:$0xff] }
 0x5ea   : > { %2591 = vadd.xlane.f32.xlu1 %v2560_v48 }
 0x5ec   : > { %2589 = vadd.xlane.f32.xlu0 %v2559_v24 }
 0x5fb   : > { %3129 = vrot.lane.b32.xlu1 %v5582_v58, %s7203_s0 }
 0x5ff   : > { %3131 = vrot.lane.b32.xlu1 %v5588_v61, %s7203_s0 }
 0x602   : > { %3127 = vrot.lane.b32.xlu0 %v5578_v54, %s7203_s0 }
 0x603   : > { %3135 = vrot.lane.b32.xlu1 %v5600_v7, %s7203_s0 }
 0x606   : > { %3133 = vrot.lane.b32.xlu0 %v5593_v2, %s7203_s0 }
 0x68c   : > { %v4403_v59 = vpop.f32.mrb[28].mxu0 }
 0x68d   : > { %v2229_v0 = vadd.f32 %v4403_v59, %v5962_v55  ;;  %v2223_v58 = vpop.f32.mrb[29].mxu0 }
 0x68e   : > { %v2224_v61 = vadd.f32 %v5962_v55, %v2223_v58 }
 0x690   : > { %4808 = vtanh.f32 %v2224_v61 }
 0x691   : > { %4810 = vtanh.f32 %v2229_v0  ;;  %v4406_v54 = vpop.f32.mrb[30].mxu0 }
 0x692   : > { %v2239_v48 = vadd.f32 %v4406_v54, %v5962_v55  ;;  %v2233_v7 = vpop.f32.mrb[31].mxu0 }
 0x693   : > { %v2234_v24 = vadd.f32 %v5962_v55, %v2233_v7 }
 0x695   : > { %4812 = vtanh.f32 %v2234_v24  ;;  %v4409_v2 = vpop.f32.mrb[32].mxu0 }
 0x696   : > { %4814 = vtanh.f32 %v2239_v48  ;;  %v2249_v40 = vadd.f32 %v4409_v2, %v5962_v55  ;;  %v2243_v35 = vpop.f32.mrb[33].mxu0 }
 0x697   : > { %v2244_v32 = vadd.f32 %v5962_v55, %v2243_v35 }
 0x699   : > { %4816 = vtanh.f32 %v2244_v32  ;;  %v4412_v59 = vpop.f32.mrb[34].mxu0 }
 0x69a   : > { %v4809_v28 = vpop.eup %4808  ;;  %4818 = vtanh.f32 %v2249_v40  ;;  %v2259_v0 = vadd.f32 %v4412_v59, %v5962_v55  ;;  %v2253_v58 = vpop.f32.mrb[35].mxu0 }
 0x69b   : > { %v4811_v61 = vpop.eup %4810  ;;  %v2254_v54 = vadd.f32 %v5962_v55, %v2253_v58  ;;  %4441 = vmatprep.mubr.msk.f32.mxu1 %vm942_vm3, %v4809_v28 }
 0x69c   : > { %4442 = vmatmul.mubr.msk.f32.vlgmr.msra.gmra.mrb[52].mxu1 %vm942_vm3, %v4811_v61 }
 0x69d   : > { %4820 = vtanh.f32 %v2254_v54  ;;  %v4415_v48 = vpop.f32.mrb[36].mxu0 }
 0x69e   : > { %4822 = vtanh.f32 %v2259_v0  ;;  %v2269_v7 = vadd.f32 %v4415_v48, %v5962_v55  ;;  %v2263_v35 = vpop.f32.mrb[37].mxu0 }
 0x69f   : > { %v4813_v32 = vpop.eup %4812  ;;  %v2264_v24 = vadd.f32 %v5962_v55, %v2263_v35 }
 0x6a0   : > { %v4815_v40 = vpop.eup %4814  ;;  %4444 = vmatprep.mubr.msk.f32.mxu1 %vm942_vm3, %v4813_v32 }
 0x6a1   : > { %4824 = vtanh.f32 %v2264_v24  ;;  %v4418_v2 = vpop.f32.mrb[38].mxu0  ;;  %4445 = vmatmul.mubr.msk.f32.gmra.mrb[54].mxu1 %vm942_vm3, %v4815_v40 }
 0x6a2   : > { %4826 = vtanh.f32 %v2269_v7  ;;  %v2279_v28 = vadd.f32 %v4418_v2, %v5962_v55  ;;  %v2273_v59 = vpop.f32.mrb[39].mxu0 }
 0x6a3   : > { %v4817_v58 = vpop.eup %4816  ;;  %v2274_v0 = vadd.f32 %v5962_v55, %v2273_v59 }
 0x6a4   : > { %v4819_v61 = vpop.eup %4818  ;;  %4447 = vmatprep.mubr.msk.f32.mxu1 %vm942_vm3, %v4817_v58 }
 0x6a5   : > { %4828 = vtanh.f32 %v2274_v0  ;;  %v4421_v54 = vpop.f32.mrb[40].mxu0  ;;  %4448 = vmatmul.mubr.msk.f32.gmra.mrb[56].mxu1 %vm942_vm3, %v4819_v61 }
 0x6a6   : > { %4830 = vtanh.f32 %v2279_v28  ;;  %v2289_v48 = vadd.f32 %v4421_v54, %v5962_v55  ;;  %v2283_v35 = vpop.f32.mrb[41].mxu0 }
 0x6a7   : > { %v4821_v32 = vpop.eup %4820  ;;  %v2284_v7 = vadd.f32 %v5962_v55, %v2283_v35 }
 0x6a8   : > { %v4823_v24 = vpop.eup %4822  ;;  %4450 = vmatprep.mubr.msk.f32.mxu1 %vm942_vm3, %v4821_v32 }
 0x6a9   : > { %4832 = vtanh.f32 %v2284_v7  ;;  %v4424_v40 = vpop.f32.mrb[42].mxu0  ;;  %4451 = vmatmul.mubr.msk.f32.gmra.mrb[58].mxu1 %vm942_vm3, %v4823_v24  ;;  %v6000_v7 = vld [vmem:[%s7098_s17] ss:$0 sm:$0xff] }
 0x6aa   : > { %4834 = vtanh.f32 %v2289_v48  ;;  %v2299_v2 = vadd.f32 %v4424_v40, %v5962_v55  ;;  %v2293_v59 = vpop.f32.mrb[43].mxu0 }
 0x6ab   : > { %v4825_v58 = vpop.eup %4824  ;;  %v2294_v28 = vadd.f32 %v5962_v55, %v2293_v59 }
 0x6ac   : > { %v4827_v0 = vpop.eup %4826  ;;  %4453 = vmatprep.mubr.msk.f32.mxu1 %vm942_vm3, %v4825_v58 }
 0x6ad   : > { %4836 = vtanh.f32 %v2294_v28  ;;  %4454 = vmatmul.mubr.msk.f32.gmra.mrb[60].mxu1 %vm942_vm3, %v4827_v0 }
 0x6ae   : > { %4838 = vtanh.f32 %v2299_v2 }
 0x6af   : > { %v4829_v61 = vpop.eup %4828 }
 0x6b0   : > { %v4831_v54 = vpop.eup %4830  ;;  %4456 = vmatprep.mubr.msk.f32.mxu1 %vm942_vm3, %v4829_v61 }
 0x6b1   : > { %4457 = vmatmul.mubr.msk.f32.gmra.mrb[62].mxu1 %vm942_vm3, %v4831_v54 }
 0x6b3   : > { %v4833_v48 = vpop.eup %4832 }
 0x6b4   : > { %v4835_v35 = vpop.eup %4834  ;;  %4459 = vmatprep.mubr.msk.f32.mxu1 %vm942_vm3, %v4833_v48 }
 0x6b5   : > { %4460 = vmatmul.mubr.msk.f32.gmra.mrb[64].mxu1 %vm942_vm3, %v4835_v35 }
 0x6b7   : > { %v4837_v55 = vpop.eup %4836 }
 0x6b8   : > { %v4839_v32 = vpop.eup %4838  ;;  %4462 = vmatprep.mubr.msk.f32.mxu1 %vm942_vm3, %v4837_v55 }
 0x6b9   : > { %4463 = vmatmul.mubr.msk.f32.gmra.mrb[66].mxu1 %vm942_vm3, %v4839_v32 }
 0x76f   : > { %v4443_v24 = vpop.f32.mrb[52].mxu1 }
 0x770   : > { %v2456_v40 = vadd.f32 %v4443_v24, %v6000_v7  ;;  %v2450_v2 = vpop.f32.mrb[53].mxu1 }
 0x771   : > { %v2451_v59 = vadd.f32 %v6000_v7, %v2450_v2 }
 0x772   : > { %3787 = vst [vmem:[%s6005_s1 + $0x10] sm:$0xff] %v2456_v40  ;;  %v2642_v58 = vmul.f32 %v2456_v40, %v2456_v40  ;;  %v2530_v0 = vsub.f32 %v5870_v46, %v2456_v40  ;;  %v2690_v55 = vmul.f32 %v5870_v46, %v2456_v40 }
 0x773   : > { %3785 = vst [vmem:[%s6005_s1] sm:$0xff] %v2451_v59  ;;  %v2689_v28 = vmul.f32 %v5875_v15, %v2451_v59 }
 0x774   : > { %2659 = vadd.xlane.f32.xlu1 %v2642_v58  ;;  %v4446_v61 = vpop.f32.mrb[54].mxu1  ;;  %v2594_v32 = vmul.f32 %v2530_v0, %v2530_v0 }
 0x775   : > { %v2466_v54 = vadd.f32 %v4446_v61, %v6000_v7  ;;  %v2460_v48 = vpop.f32.mrb[55].mxu1  ;;  %2705 = vadd.xlane.f32.xlu0 %v2689_v28  ;;  %v2641_v28 = vmul.f32 %v2451_v59, %v2451_v59 }
 0x776   : > { %v2461_v35 = vadd.f32 %v6000_v7, %v2460_v48  ;;  %v2529_v48 = vsub.f32 %v5875_v15, %v2451_v59 }
 0x777   : > { %3791 = vst [vmem:[%s6005_s1 + $0x30] sm:$0xff] %v2466_v54  ;;  %v2532_v40 = vsub.f32 %v5880_v62, %v2466_v54 }
 0x778   : > { %3789 = vst [vmem:[%s6005_s1 + $0x20] sm:$0xff] %v2461_v35  ;;  %2707 = vadd.xlane.f32.xlu1 %v2690_v55  ;;  %v4449_v24 = vpop.f32.mrb[56].mxu1  ;;  %v2691_v46 = vmul.f32 %v5885_v11, %v2461_v35  ;;  %v2593_v15 = vmul.f32 %v2529_v48, %v2529_v48 }
 0x779   : > { %v6019_v2 = vadd.f32 %v4449_v24, %v6000_v7  ;;  %v2470_v58 = vpop.f32.mrb[57].mxu1  ;;  %2611 = vadd.xlane.f32.xlu0 %v2594_v32  ;;  %v2596_v59 = vmul.f32 %v2532_v40, %v2532_v40 }
 0x77a   : > { %v6022_v61 = vadd.f32 %v6000_v7, %v2470_v58  ;;  %v2531_v58 = vsub.f32 %v5885_v11, %v2461_v35 }
 0x77b   : > { %3795 = vst [vmem:[%s6005_s1 + $0x50] sm:$0xff] %v6019_v2 }
 0x77c   : > { %3793 = vst [vmem:[%s6005_s1 + $0x40] sm:$0xff] %v6022_v61  ;;  %v4452_v0 = vpop.f32.mrb[58].mxu1  ;;  %2657 = vadd.xlane.f32.xlu1 %v2641_v28  ;;  %v2595_v48 = vmul.f32 %v2531_v58, %v2531_v58  ;;  %v2693_v58 = vmul.f32 %v5895_v49, %v6022_v61  ;;  %v2533_v37 = vsub.f32 %v5895_v49, %v6022_v61 }
 0x77d   : > { %v6032_v55 = vadd.f32 %v4452_v0, %v6000_v7  ;;  %v2480_v32 = vpop.f32.mrb[59].mxu1  ;;  %2709 = vadd.xlane.f32.xlu0 %v2691_v46  ;;  %v2694_v49 = vmul.f32 %v5890_v31, %v6019_v2 }
 0x77e   : > { %v2481_v24 = vadd.f32 %v6000_v7, %v2480_v32  ;;  %v2644_v32 = vmul.f32 %v2466_v54, %v2466_v54 }
 0x77f   : > { %3799 = vst [vmem:[%s6005_s1 + $0x70] sm:$0xff] %v6032_v55 }
 0x780   : > { %3797 = vst [vmem:[%s6005_s1 + $0x60] sm:$0xff] %v2481_v24  ;;  %v4455_v26 = vpop.f32.mrb[60].mxu1  ;;  %2609 = vadd.xlane.f32.xlu1 %v2593_v15 }
 0x781   : > { %v6040_v28 = vadd.f32 %v4455_v26, %v6000_v7  ;;  %v2490_v0 = vpop.f32.mrb[61].mxu1  ;;  %2615 = vadd.xlane.f32.xlu0 %v2596_v59  ;;  %v2692_v59 = vmul.f32 %v5880_v62, %v2466_v54  ;;  %v2643_v54 = vmul.f32 %v2461_v35, %v2461_v35  ;;  %v2646_v35 = vmul.f32 %v6019_v2, %v6019_v2 }
 0x782   : > { %v6043_v46 = vadd.f32 %v6000_v7, %v2490_v0  ;;  %v2534_v0 = vsub.f32 %v5890_v31, %v6019_v2  ;;  %v2696_v31 = vmul.f32 %v5900_v30, %v6032_v55 }
 0x783   : > { %3803 = vst [vmem:[%s6005_s1 + $0x90] sm:$0xff] %v6040_v28 }
 0x784   : > { %3801 = vst [vmem:[%s6005_s1 + $0x80] sm:$0xff] %v6043_v46  ;;  %v4458_v11 = vpop.f32.mrb[62].mxu1  ;;  %2663 = vadd.xlane.f32.xlu1 %v2644_v32 }
 0x785   : > { %v6050_v40 = vadd.f32 %v4458_v11, %v6000_v7  ;;  %v2500_v26 = vpop.f32.mrb[63].mxu1  ;;  %2613 = vadd.xlane.f32.xlu0 %v2595_v48 }
 0x786   : > { %v6053_v15 = vadd.f32 %v6000_v7, %v2500_v26  ;;  %v2598_v26 = vmul.f32 %v2534_v0, %v2534_v0  ;;  %v2597_v0 = vmul.f32 %v2533_v37, %v2533_v37  ;;  %v2648_v37 = vmul.f32 %v6032_v55, %v6032_v55 }
 0x787   : > { %3807 = vst [vmem:[%s6005_s1 + $0xb0] sm:$0xff] %v6050_v40 }
 0x788   : > { %3805 = vst [vmem:[%s6005_s1 + $0xa0] sm:$0xff] %v6053_v15  ;;  %v4461_v32 = vpop.f32.mrb[64].mxu1  ;;  %2711 = vadd.xlane.f32.xlu1 %v2692_v59 }
 0x789   : > { %v6065_v48 = vadd.f32 %v4461_v32, %v6000_v7  ;;  %v2510_v11 = vpop.f32.mrb[65].mxu1  ;;  %2713 = vadd.xlane.f32.xlu0 %v2693_v58 }
 0x78a   : > { %v6068_v62 = vadd.f32 %v6000_v7, %v2510_v11  ;;  %v2647_v11 = vmul.f32 %v2481_v24, %v2481_v24 }
 0x78b   : > { %3811 = vst [vmem:[%s6005_s1 + $0xd0] sm:$0xff] %v6065_v48 }
 0x78c   : > { %3809 = vst [vmem:[%s6005_s1 + $0xc0] sm:$0xff] %v6068_v62  ;;  %2661 = vadd.xlane.f32.xlu1 %v2643_v54  ;;  %v4464_v59 = vpop.f32.mrb[66].mxu1  ;;  %v2695_v54 = vmul.f32 %v5905_v14, %v2481_v24 }
 0x78d   : > { %v6077_v32 = vadd.f32 %v4464_v59, %v6000_v7  ;;  %2619 = vadd.xlane.f32.xlu0 %v2598_v26  ;;  %v2520_v58 = vpop.f32.mrb[67].mxu1  ;;  %v2536_v26 = vsub.f32 %v5900_v30, %v6032_v55  ;;  %v2652_v30 = vmul.f32 %v6050_v40, %v6050_v40  ;;  %v2697_v55 = vmul.f32 %v5915_v20, %v6043_v46 }
 0x78e   : > { %v6080_v27 = vadd.f32 %v6000_v7, %v2520_v58  ;;  %v2645_v7 = vmul.f32 %v6022_v61, %v6022_v61  ;;  %v2535_v58 = vsub.f32 %v5905_v14, %v2481_v24  ;;  %v2650_v61 = vmul.f32 %v6040_v28, %v6040_v28 }
 0x78f   : > { %3815 = vst [vmem:[%s6005_s1 + $0xf0] sm:$0xff] %v6077_v32  ;;  %v2600_v59 = vmul.f32 %v2536_v26, %v2536_v26  ;;  %v2649_v24 = vmul.f32 %v6043_v46, %v6043_v46  ;;  %v2656_v45 = vmul.f32 %v6077_v32, %v6077_v32 }
 0x790   : > { %3813 = vst [vmem:[%s6005_s1 + $0xe0] sm:$0xff] %v6080_v27  ;;  %2667 = vadd.xlane.f32.xlu1 %v2646_v35  ;;  %v2599_v2 = vmul.f32 %v2535_v58, %v2535_v58  ;;  %v2537_v35 = vsub.f32 %v5915_v20, %v6043_v46  ;;  %v3207_v20 = vld [vmem:[%s7101_s20] sm:$0xff]  ;;  %v2654_v46 = vmul.f32 %v6065_v48, %v6065_v48 }
 0x791   : > { %2617 = vadd.xlane.f32.xlu0 %v2597_v0  ;;  %v2698_v0 = vmul.f32 %v5910_v10, %v6040_v28  ;;  %v2540_v58 = vsub.f32 %v5920_v29, %v6050_v40 }
 0x792   : > { %v2601_v14 = vmul.f32 %v2537_v35, %v2537_v35 }
 0x794   : > { %2715 = vadd.xlane.f32.xlu1 %v2694_v49  ;;  %v2538_v49 = vsub.f32 %v5910_v10, %v6040_v28  ;;  %v3208_v10 = vld [vmem:[%s7101_s20 + $0x8] sm:$0x3] }
 0x795   : > { %2669 = vadd.xlane.f32.xlu0 %v2647_v11  ;;  %v2700_v11 = vmul.f32 %v5920_v29, %v6050_v40  ;;  %v4593_v28 = vpack.c.bf16 %v3208_v10, %v3207_v20  ;;  %v6142_v29 = vpop.xlane.xlu1 %2563  ;;  %v2701_v40 = vmul.f32 %v5935_v52, %v6068_v62  ;;  %v5081_v10 = vld [vmem:[%s5575_s5 + $0x40] sm:$0xff] }
 0x796   : > { %4840 = vrsqrt.f32 %v6142_v29 }
 0x797   : > { %4595 = vmatprep.subr.msk.bf16.mxu0 %vm5393_vm7, %v4593_v28 }
 0x798   : > { %2665 = vadd.xlane.f32.xlu1 %v2645_v7  ;;  %v2539_v7 = vsub.f32 %v5925_v5, %v6053_v15  ;;  %4598 = vmatpush3.bf16.msk.msra.mxu0 %vm5393_vm7, %v4593_v28 }
 0x799   : > { %2717 = vadd.xlane.f32.xlu0 %v2695_v54  ;;  %v2602_v54 = vmul.f32 %v2538_v49, %v2538_v49 }
 0x79a   : > { %v2603_v26 = vmul.f32 %v2539_v7, %v2539_v7 }
 0x79c   : > { %2671 = vadd.xlane.f32.xlu1 %v2648_v37  ;;  %v2651_v37 = vmul.f32 %v6053_v15, %v6053_v15 }
 0x79d   : > { %2623 = vadd.xlane.f32.xlu0 %v2600_v59  ;;  %v2699_v59 = vmul.f32 %v5925_v5, %v6053_v15  ;;  %v2653_v5 = vmul.f32 %v6068_v62, %v6068_v62  ;;  %v2542_v15 = vsub.f32 %v5930_v16, %v6065_v48 }
 0x7a0   : > { %2719 = vadd.xlane.f32.xlu1 %v2696_v31  ;;  %v2702_v31 = vmul.f32 %v5930_v16, %v6065_v48  ;;  %v2703_v16 = vmul.f32 %v5945_v44, %v6080_v27  ;;  %v2544_v48 = vsub.f32 %v5940_v50, %v6077_v32 }
 0x7a1   : > { %2621 = vadd.xlane.f32.xlu0 %v2599_v2  ;;  %v2541_v2 = vsub.f32 %v5935_v52, %v6068_v62  ;;  %v2543_v52 = vsub.f32 %v5945_v44, %v6080_v27 }
 0x7a2   : > { %v2608_v7 = vmul.f32 %v2544_v48, %v2544_v48 }
 0x7a3   : > { %v2605_v35 = vmul.f32 %v2541_v2, %v2541_v2 }
 0x7a4   : > { %2675 = vadd.xlane.f32.xlu1 %v2650_v61  ;;  %v2604_v61 = vmul.f32 %v2540_v58, %v2540_v58 }
 0x7a5   : > { %2723 = vadd.xlane.f32.xlu0 %v2698_v0  ;;  %v2704_v0 = vmul.f32 %v5940_v50, %v6077_v32 }
 0x7a8   : > { %2625 = vadd.xlane.f32.xlu1 %v2601_v14  ;;  %v6152_v14 = vpop.xlane.xlu1 %2567 }
 0x7a9   : > { %2673 = vadd.xlane.f32.xlu0 %v2649_v24  ;;  %v2606_v24 = vmul.f32 %v2542_v15, %v2542_v15  ;;  %v5088_v15 = vld [vmem:[%s5575_s5 + $0x58] sm:$0xff] }
 0x7ac   : > { %2679 = vadd.xlane.f32.xlu1 %v2652_v30  ;;  %v6154_v30 = vpop.xlane.xlu0 %2561  ;;  %v2572_v62 = vpop.xlane.xlu1 %2571 }
 0x7ad   : > { %2721 = vadd.xlane.f32.xlu0 %v2697_v55  ;;  %v2655_v55 = vmul.f32 %v6080_v27, %v6080_v27 }
 0x7b0   : > { %2727 = vadd.xlane.f32.xlu1 %v2700_v11  ;;  %v6164_v49 = vpop.xlane.xlu0 %2565  ;;  %v2607_v11 = vmul.f32 %v2543_v52, %v2543_v52  ;;  %v5090_v52 = vld [vmem:[%s5575_s5 + $0x78] sm:$0xff] }
 0x7b1   : > { %2627 = vadd.xlane.f32.xlu0 %v2602_v54  ;;  %v6166_v54 = vpop.xlane.xlu1 %2575 }
 0x7b4   : > { %2629 = vadd.xlane.f32.xlu1 %v2603_v26  ;;  %v6168_v26 = vpop.xlane.xlu0 %2569 }
 0x7b5   : > { %2677 = vadd.xlane.f32.xlu0 %v2651_v37  ;;  %v6170_v44 = vpop.xlane.xlu1 %2579  ;;  %v5080_v37 = vld [vmem:[%s5575_s5 + $0x30] sm:$0xff] }
 0x7b6   : > { %v2890_v56 = vmax.f32 %v6170_v44, 1e-16 }
 0x7b8   : > { %2683 = vadd.xlane.f32.xlu1 %v2654_v46  ;;  %v6172_v50 = vpop.xlane.xlu0 %2573  ;;  %v5082_v46 = vld [vmem:[%s5575_s5 + $0x28] sm:$0xff] }
 0x7b9   : > { %2725 = vadd.xlane.f32.xlu0 %v2699_v59  ;;  %v6174_v27 = vpop.xlane.xlu1 %2583  ;;  %v5083_v59 = vld [vmem:[%s5575_s5 + $0x50] sm:$0xff] }
 0x7bc   : > { %2731 = vadd.xlane.f32.xlu1 %v2702_v31  ;;  %v6176_v32 = vpop.xlane.xlu0 %2577  ;;  %v5084_v31 = vld [vmem:[%s5575_s5 + $0x38] sm:$0xff] }
 0x7bd   : > { %2631 = vadd.xlane.f32.xlu0 %v2604_v61  ;;  %v6180_v20 = vpop.xlane.xlu1 %2587  ;;  %v5085_v61 = vld [vmem:[%s5575_s5 + $0x60] sm:$0xff] }
 0x7c0   : > { %2633 = vadd.xlane.f32.xlu1 %v2605_v35  ;;  %v6184_v28 = vpop.xlane.xlu0 %2581  ;;  %v5086_v35 = vld [vmem:[%s5575_s5 + $0x48] sm:$0xff] }
 0x7c1   : > { %2681 = vadd.xlane.f32.xlu0 %v2653_v5  ;;  %v6190_v58 = vpop.xlane.xlu1 %2591 }
 0x7c4   : > { %2687 = vadd.xlane.f32.xlu1 %v2656_v45  ;;  %v6194_v2 = vpop.xlane.xlu0 %2585  ;;  %v5087_v45 = vld [vmem:[%s5575_s5 + $0x70] sm:$0xff] }
 0x7c5   : > { %2729 = vadd.xlane.f32.xlu0 %v2701_v40  ;;  %v6200_v5 = vpop.permute.xlu1 %3129 }
 0x7c8   : > { %2735 = vadd.xlane.f32.xlu1 %v2704_v0  ;;  %v6204_v40 = vpop.xlane.xlu0 %2589 }
 0x7c9   : > { %2635 = vadd.xlane.f32.xlu0 %v2606_v24  ;;  %v6208_v0 = vpop.permute.xlu1 %3131  ;;  %v5089_v24 = vld [vmem:[%s5575_s5 + $0x68] sm:$0xff] }
 0x7cc   : > { %2685 = vadd.xlane.f32.xlu1 %v2655_v55  ;;  %v6212_v55 = vpop.permute.xlu0 %3127 }
 0x7cd   : > { %2733 = vadd.xlane.f32.xlu0 %v2703_v16  ;;  %v6216_v16 = vpop.permute.xlu1 %3135 }
 0x7d0   : > { %2637 = vadd.xlane.f32.xlu1 %v2607_v11  ;;  %v6218_v48 = vpop.permute.xlu0 %3133  ;;  %v2882_v11 = vmax.f32 %v6142_v29, 1e-16 }
 0x7d1   : > { %2639 = vadd.xlane.f32.xlu0 %v2608_v7 }
 0x7d2   : > { %4842 = vrsqrt.f32 %v2882_v11 }
 0x7d3   : > { %4844 = vrsqrt.f32 %v6152_v14 }
 0x7e1   : > { %3139 = vrot.lane.b32.xlu1 %v5080_v37, %s7203_s0  ;;  %v2884_v37 = vmax.f32 %v6152_v14, 1e-16  ;;  %v4841_v14 = vpop.eup %4840 }
 0x7e2   : > { %v4843_v11 = vpop.eup %4842 }
 0x7e3   : > { %4846 = vrsqrt.f32 %v2884_v37 }
 0x7e5   : > { %3143 = vrot.lane.b32.xlu1 %v5081_v10, %s7203_s0 }
 0x7e7   : > { %3137 = vrot.lane.b32.xlu0 %v5082_v46, %s7203_s0  ;;  %v2886_v46 = vmax.f32 %v2572_v62, 1e-16 }
 0x7e9   : > { %3147 = vrot.lane.b32.xlu1 %v5083_v59, %s7203_s0 }
 0x7eb   : > { %3141 = vrot.lane.b32.xlu0 %v5084_v31, %s7203_s0 }
 0x7ed   : > { %3151 = vrot.lane.b32.xlu1 %v5085_v61, %s7203_s0 }
 0x7ef   : > { %3145 = vrot.lane.b32.xlu0 %v5086_v35, %s7203_s0  ;;  %v2881_v35 = vmax.f32 %v6154_v30, 1e-16 }
 0x7f1   : > { %3155 = vrot.lane.b32.xlu1 %v5087_v45, %s7203_s0 }
 0x7f3   : > { %3149 = vrot.lane.b32.xlu0 %v5088_v15, %s7203_s0 }
 0x7f7   : > { %3153 = vrot.lane.b32.xlu0 %v5089_v24, %s7203_s0  ;;  %v2888_v24 = vmax.f32 %v6166_v54, 1e-16 }
 0x7fb   : > { %3157 = vrot.lane.b32.xlu0 %v5090_v52, %s7203_s0 }
 0x801   : > { %v2660_v7 = vpop.xlane.xlu1 %2659 }
 0x802   : > { %v6222_v10 = vpop.xlane.xlu0 %2705  ;;  %v2930_v31 = vmax.f32 %v2660_v7, 1e-16  ;;  %v6237_v7 = vpop.eup %4844 }
 0x803   : > { %v6240_v37 = vpop.eup %4846 }
 0x805   : > { %v2708_v59 = vpop.xlane.xlu1 %2707 }
 0x806   : > { %v2612_v61 = vpop.xlane.xlu0 %2611 }
 0x807   : > { %4848 = vrsqrt.f32 %v2612_v61  ;;  %vm2746_vm10 = vcmp.eq.f32.partialorder %v2612_v61, inf  ;;  %v2749_v22 = vand.u32 2147483648, %v2612_v61  ;;  %vm2748_vm11 = vcmp.eq.f32.partialorder %v2612_v61, 0.0 }
 0x808   : > { %4850 = vrsqrt.f32 %v2572_v62 }
 0x809   : > { %4852 = vrsqrt.f32 %v2886_v46  ;;  %v2658_v45 = vpop.xlane.xlu1 %2657 }
 0x80a   : > { %4854 = vrsqrt.f32 %v2930_v31  ;;  %v6227_v15 = vpop.xlane.xlu0 %2709  ;;  %v2929_v29 = vmax.f32 %v2658_v45, 1e-16 }
 0x80b   : > { %4856 = vrsqrt.f32 %v6154_v30 }
 0x80c   : > { %4858 = vrsqrt.f32 %v6166_v54  ;;  %v2883_v54 = vmax.f32 %v6164_v49, 1e-16 }
 0x80d   : > { %4860 = vrsqrt.f32 %v2881_v35  ;;  %v6232_v52 = vpop.xlane.xlu1 %2609 }
 0x80e   : > { %4862 = vrsqrt.f32 %v6232_v52  ;;  %v6235_v62 = vpop.xlane.xlu0 %2615  ;;  %vm2739_vm12 = vcmp.eq.f32.partialorder %v6232_v52, inf  ;;  %vm2741_vm13 = vcmp.eq.f32.partialorder %v6232_v52, 0.0 }
 0x80f   : > { %4864 = vrsqrt.f32 %v6235_v62  ;;  %vm2760_vm14 = vcmp.eq.f32.partialorder %v6235_v62, inf  ;;  %vm2762_vm15 = vcmp.eq.f32.partialorder %v6235_v62, 0.0  ;;  %v2763_v23 = vand.u32 2147483648, %v6235_v62 }
 0x810   : > { %4866 = vrsqrt.f32 %v2929_v29 }
 0x811   : > { %v4849_v30 = vpop.eup %4848  ;;  %4868 = vrsqrt.f32 %v2888_v24  ;;  %v2664_v46 = vpop.xlane.xlu1 %2663  ;;  %v6255_v24 = vld [vmem:[%s7099_s18] ss:$0 sm:$0xff] }
 0x812   : > { %v6242_v31 = vpop.eup %4850  ;;  %4870 = vrsqrt.f32 %v6164_v49  ;;  %v2745_v35 = vmul.f32 %v4849_v30, %v2612_v61  ;;  %v2932_v45 = vmax.f32 %v2664_v46, 1e-16  ;;  %v6246_v9 = vpop.xlane.xlu0 %2613  ;;  %v2914_v30 = vmul.f32 %v4843_v11, %v2708_v59  ;;  %v6261_v46 = vld [vmem:[%s7099_s18 + $0x1] ss:$0 sm:$0xff] }
 0x813   : > { %v6248_v34 = vpop.eup %4852  ;;  %4872 = vrsqrt.f32 %v6246_v9  ;;  %vm2753_vm0 = vcmp.eq.f32.partialorder %v6246_v9, inf  ;;  %vm2755_vm1 = vcmp.eq.f32.partialorder %v6246_v9, 0.0 }
 0x814   : > { %v4855_v29 = vpop.eup %4854  ;;  %v2747_v42 = vsel %vm2746_vm10, %v2612_v61, %v2745_v35  ;;  %4874 = vrsqrt.f32 %v2932_v45  ;;  %v2982_v35 = vmul.f32 %v6255_v24, %v5698_v47 }
 0x815   : > { %v4857_v49 = vpop.eup %4856  ;;  %4876 = vrsqrt.f32 %v6170_v44  ;;  %v2750_v8 = vsel %vm2748_vm11, %v2749_v22, %v2747_v42  ;;  %v2712_v25 = vpop.xlane.xlu1 %2711  ;;  %v2983_v44 = vmul.f32 %v6255_v24, %v5703_v51  ;;  %v6273_v59 = vmul.f32 %v4855_v29, %v2914_v30  ;;  %v6282_v22 = vld [vmem:[%s7099_s18 + $0x2] ss:$0 sm:$0xff] }
 0x816   : > { %v6263_v53 = vpop.eup %4858  ;;  %4878 = vrsqrt.f32 %v2883_v54  ;;  %v6265_v13 = vmul.f32 %v4841_v14, %v2750_v8  ;;  %v6267_v41 = vpop.xlane.xlu0 %2713  ;;  %v2985_v42 = vmul.f32 %v6255_v24, %v5710_v1  ;;  %v2742_v1 = vand.u32 2147483648, %v6232_v52 }
 0x817   : > { %v4861_v61 = vpop.eup %4860  ;;  %4880 = vrsqrt.f32 %v2890_v56  ;;  %7205 = vst [vmem:[#allocation37_spill] sm:$0xff] %v6273_v59 }
 0x818   : > { %7204 = vst [vmem:[#allocation36_spill] sm:$0xff] %v6265_v13  ;;  %v4863_v11 = vpop.eup %4862  ;;  %4882 = vrsqrt.f32 %v6168_v26  ;;  %v2913_v8 = vmul.f32 %v4861_v61, %v6222_v10  ;;  %v3004_v47 = vmul.f32 %v6261_v46, %v6265_v13 }
 0x819   : > { %v4865_v51 = vpop.eup %4864  ;;  %v2738_v56 = vmul.f32 %v4863_v11, %v6232_v52  ;;  %v2662_v14 = vpop.xlane.xlu1 %2661  ;;  %v3041_v11 = vmul.f32 %v6282_v22, %v6273_v59 }
 0x81a   : > { %v4867_v54 = vpop.eup %4866  ;;  %v3020_v10 = vadd.f32 %v3004_v47, %v2983_v44  ;;  %v2759_v45 = vmul.f32 %v4865_v51, %v6235_v62  ;;  %v2931_v29 = vmax.f32 %v2662_v14, 1e-16  ;;  %v6292_v30 = vpop.xlane.xlu0 %2619  ;;  %v2916_v51 = vmul.f32 %v6240_v37, %v2712_v25 }
 0x81b   : > { %v6294_v61 = vpop.eup %4868  ;;  %v2740_v13 = vsel %vm2739_vm12, %v6232_v52, %v2738_v56  ;;  %v6303_v4 = vmul.f32 %v4867_v54, %v2913_v8  ;;  %v2885_v56 = vmax.f32 %v6168_v26, 1e-16  ;;  %v2756_v26 = vand.u32 2147483648, %v6246_v9 }
 0x81c   : > { %v4871_v60 = vpop.eup %4870  ;;  %v2743_v44 = vsel %vm2741_vm13, %v2742_v1, %v2740_v13  ;;  %v2761_v47 = vsel %vm2760_vm14, %v6235_v62, %v2759_v45  ;;  %4884 = vrsqrt.f32 %v2931_v29  ;;  %v3057_v12 = vadd.f32 %v3041_v11, %v3020_v10  ;;  %v6313_v13 = vld [vmem:[%s7100_s19] ss:$0 sm:$0xff] }
 0x81d   : > { %v4873_v14 = vpop.eup %4872  ;;  %v6305_v57 = vmul.f32 %v4857_v49, %v2743_v44  ;;  %v2764_v59 = vsel %vm2762_vm15, %v2763_v23, %v2761_v47  ;;  %v6307_v21 = vpop.xlane.xlu1 %2667  ;;  %v3040_v45 = vmul.f32 %v6282_v22, %v6303_v4  ;;  %vm2774_vm4 = vcmp.eq.f32.partialorder %v6292_v30, inf }
 0x81e   : > { %v4875_v52 = vpop.eup %4874  ;;  %v2752_v25 = vmul.f32 %v4873_v14, %v6246_v9  ;;  %v6318_v62 = vmul.f32 %v6237_v7, %v2764_v59  ;;  %v6320_v37 = vpop.xlane.xlu0 %2617  ;;  %v3080_v10 = vadd.f32 %v6313_v13, %v3057_v12  ;;  %vm2776_vm5 = vcmp.eq.f32.partialorder %v6292_v30, 0.0 }
 0x81f   : > { %v6322_v23 = vpop.eup %4876  ;;  %v3003_v49 = vmul.f32 %v6261_v46, %v6305_v57  ;;  %v6327_v8 = vmul.f32 %v4875_v52, %v2916_v51  ;;  %4886 = vrsqrt.f32 %v6320_v37  ;;  %v2892_v51 = vmax.f32 %v6174_v27, 1e-16 }
 0x820   : > { %v4879_v1 = vpop.eup %4878  ;;  %v2754_v54 = vsel %vm2753_vm0, %v6246_v9, %v2752_v25  ;;  %v3006_v7 = vmul.f32 %v6261_v46, %v6318_v62  ;;  %4888 = vrsqrt.f32 %v6292_v30  ;;  %vm2767_vm2 = vcmp.eq.f32.partialorder %v6320_v37, inf }
 0x821   : > { %v6335_v59 = vpop.eup %4880  ;;  %v3019_v29 = vadd.f32 %v3003_v49, %v2982_v35  ;;  %v2757_v11 = vsel %vm2755_vm1, %v2756_v26, %v2754_v54  ;;  %v6340_v44 = vpop.xlane.xlu1 %2715  ;;  %v3043_v52 = vmul.f32 %v6282_v22, %v6327_v8  ;;  %4890 = vrsqrt.f32 %v6174_v27 }
 0x822   : > { %v4883_v47 = vpop.eup %4882  ;;  %v6343_v9 = vmul.f32 %v4871_v60, %v2757_v11  ;;  %v3022_v14 = vadd.f32 %v3006_v7, %v2985_v42  ;;  %v6347_v25 = vpop.xlane.xlu0 %2669  ;;  %4892 = vrsqrt.f32 %v2885_v56  ;;  %v2915_v35 = vmul.f32 %v4879_v1, %v6227_v15 }
 0x823   : > { %v3056_v12 = vadd.f32 %v3040_v45, %v3019_v29  ;;  %4894 = vtanh.f32 %v3080_v10  ;;  %v2984_v27 = vmul.f32 %v6255_v24, %v5708_v63  ;;  %v2887_v15 = vmax.f32 %v6172_v50, 1e-16 }
 0x824   : > { %v3005_v49 = vmul.f32 %v6261_v46, %v6343_v9  ;;  %4896 = vrsqrt.f32 %v2892_v51  ;;  %v3059_v42 = vadd.f32 %v3043_v52, %v3022_v14  ;;  %v2934_v29 = vmax.f32 %v6307_v21, 1e-16 }
 0x825   : > { %v2666_v26 = vpop.xlane.xlu1 %2665  ;;  %v3079_v60 = vadd.f32 %v6313_v13, %v3056_v12  ;;  %v2894_v21 = vmax.f32 %v6180_v20, 1e-16  ;;  %vm2769_vm3 = vcmp.eq.f32.partialorder %v6320_v37, 0.0 }
 0x826   : > { %v4885_v54 = vpop.eup %4884  ;;  %v2933_v7 = vmax.f32 %v2666_v26, 1e-16  ;;  %v6354_v11 = vpop.xlane.xlu0 %2717  ;;  %v3021_v1 = vadd.f32 %v3005_v49, %v2984_v27  ;;  %v3082_v63 = vadd.f32 %v6313_v13, %v3059_v42 }
 0x827   : > { %v6358_v45 = vmul.f32 %v4885_v54, %v2915_v35  ;;  %4898 = vtanh.f32 %v3079_v60  ;;  %v2770_v35 = vand.u32 2147483648, %v6320_v37 }
 0x828   : > { %4900 = vrsqrt.f32 %v6172_v50 }
 0x829   : > { %7206 = vst [vmem:[#allocation38_spill] sm:$0xff] %v6358_v45  ;;  %v4887_v56 = vpop.eup %4886  ;;  %v3042_v10 = vmul.f32 %v6282_v22, %v6358_v45  ;;  %4902 = vrsqrt.f32 %v2933_v7  ;;  %v6365_v51 = vpop.xlane.xlu1 %2671 }
 0x82a   : > { %v4889_v14 = vpop.eup %4888  ;;  %4904 = vrsqrt.f32 %v6180_v20  ;;  %v2766_v52 = vmul.f32 %v4887_v56, %v6320_v37  ;;  %v6370_v12 = vpop.xlane.xlu0 %2623 }
 0x82b   : > { %v3058_v50 = vadd.f32 %v3042_v10, %v3021_v1  ;;  %4906 = vrsqrt.f32 %v6370_v12  ;;  %v6378_v26 = vpop.eup %4890  ;;  %v2773_v54 = vmul.f32 %v4889_v14, %v6292_v30  ;;  %v2986_v10 = vmul.f32 %v6255_v24, %v5718_v17 }
 0x82c   : > { %4908 = vrsqrt.f32 %v2887_v15  ;;  %v2768_v49 = vsel %vm2767_vm2, %v6320_v37, %v2766_v52  ;;  %v4893_v27 = vpop.eup %4892  ;;  %vm2788_vm6 = vcmp.eq.f32.partialorder %v6370_v12, inf  ;;  %vm2790_vm8 = vcmp.eq.f32.partialorder %v6370_v12, 0.0 }
 0x82d   : > { %v3081_v60 = vadd.f32 %v6313_v13, %v3058_v50  ;;  %4910 = vrsqrt.f32 %v2934_v29  ;;  %v2771_v42 = vsel %vm2769_vm3, %v2770_v35, %v2768_v49  ;;  %v6382_v7 = vpop.xlane.xlu1 %2719  ;;  %v4895_v20 = vpop.eup %4894  ;;  %v2889_v29 = vmax.f32 %v6176_v32, 1e-16 }
 0x82e   : > { %4912 = vtanh.f32 %v3082_v63  ;;  %v6384_v56 = vmul.f32 %v4883_v47, %v2771_v42  ;;  %v6386_v15 = vpop.xlane.xlu0 %2621  ;;  %v6389_v37 = vpop.eup %4896  ;;  %v2775_v14 = vsel %vm2774_vm4, %v6292_v30, %v2773_v54  ;;  %v2917_v52 = vmul.f32 %v4893_v27, %v6267_v41 }
 0x82f   : > { %4914 = vrsqrt.f32 %v6386_v15  ;;  %v2777_v50 = vand.u32 2147483648, %v6292_v30  ;;  %v3176_v49 = vmul.f32 %v4895_v20, %v6200_v5  ;;  %v2896_v5 = vmax.f32 %v6190_v58, 1e-16 }
 0x830   : > { %7207 = vst [vmem:[#allocation39_spill] sm:$0xff] %v6384_v56  ;;  %4916 = vrsqrt.f32 %v2894_v21  ;;  %v3007_v35 = vmul.f32 %v6261_v46, %v6384_v56  ;;  %v2936_v56 = vmax.f32 %v6365_v51, 1e-16  ;;  %vm2781_vm7 = vcmp.eq.f32.partialorder %v6386_v15, inf }
 0x831   : > { %v4899_v1 = vpop.eup %4898  ;;  %v2676_v47 = vpop.xlane.xlu1 %2675  ;;  %4918 = vtanh.f32 %v3081_v60  ;;  %v2935_v60 = vmax.f32 %v6347_v25, 1e-16  ;;  %v2778_v41 = vsel %vm2776_vm5, %v2777_v50, %v2775_v14  ;;  %v3192_v14 = vmul.f32 2.0, %v3176_v49 }
 0x832   : > { %v6396_v63 = vpop.eup %4900  ;;  %v6402_v21 = vpop.xlane.xlu0 %2723  ;;  %4920 = vrsqrt.f32 %v6176_v32  ;;  %v3175_v54 = vmul.f32 %v4899_v1, %v6212_v55  ;;  %v3023_v25 = vadd.f32 %v3007_v35, %v2986_v10  ;;  %v6422_v50 = vmul.f32 %v6242_v31, %v2778_v41 }
 0x833   : > { %v4903_v17 = vpop.eup %4902  ;;  %4922 = vrsqrt.f32 %v6190_v58  ;;  %v2938_v10 = vmax.f32 %v2676_v47, 1e-16  ;;  %v2918_v49 = vmul.f32 %v6248_v34, %v6340_v44  ;;  %vm2783_vm10 = vcmp.eq.f32.partialorder %v6386_v15, 0.0 }
 0x834   : > { %v6409_v42 = vpop.eup %4904  ;;  %v6412_v27 = vmul.f32 %v4903_v17, %v2917_v52  ;;  %4924 = vrsqrt.f32 %v2889_v29  ;;  %v3191_v30 = vmul.f32 2.0, %v3175_v54 }
 0x835   : > { %v4907_v45 = vpop.eup %4906  ;;  %v6416_v32 = vpop.xlane.xlu1 %2625 }
 0x836   : > { %v4909_v20 = vpop.eup %4908  ;;  %v3044_v55 = vmul.f32 %v6282_v22, %v6412_v27  ;;  %4926 = vrsqrt.f32 %v6416_v32  ;;  %v2674_v1 = vpop.xlane.xlu0 %2673  ;;  %4469 = vmatprep.mubr.msk.f32.mxu0 %vm1390_vm9, %v3191_v30  ;;  %v2787_v29 = vmul.f32 %v4907_v45, %v6370_v12  ;;  %vm2795_vm11 = vcmp.eq.f32.partialorder %v6416_v32, inf }
 0x837   : > { %v4911_v52 = vpop.eup %4910  ;;  %4928 = vrsqrt.f32 %v2935_v60  ;;  %4470 = vmatmul.mubr.msk.f32.vlgmr.msra.gmra.mrb[44].mxu0 %vm1390_vm9, %v3192_v14  ;;  %v2937_v54 = vmax.f32 %v2674_v1, 1e-16  ;;  %v2987_v1 = vmul.f32 %v6255_v24, %v5720_v18  ;;  %v2791_v14 = vand.u32 2147483648, %v6370_v12 }
 0x838   : > { %v4913_v58 = vpop.eup %4912  ;;  %v3060_v51 = vadd.f32 %v3044_v55, %v3023_v25  ;;  %4930 = vrsqrt.f32 %v2936_v56  ;;  %v6438_v41 = vmul.f32 %v4911_v52, %v2918_v49  ;;  %v2789_v44 = vsel %vm2788_vm6, %v6370_v12, %v2787_v29 }
 0x839   : > { %v4915_v35 = vpop.eup %4914  ;;  %4932 = vrsqrt.f32 %v2896_v5  ;;  %v6429_v17 = vpop.xlane.xlu1 %2679  ;;  %v3008_v5 = vmul.f32 %v6261_v46, %v6422_v50  ;;  %v3178_v34 = vmul.f32 %v4913_v58, %v6218_v48  ;;  %v2784_v52 = vand.u32 2147483648, %v6386_v15 }
 0x83a   : > { %v6431_v31 = vpop.eup %4916  ;;  %v3083_v60 = vadd.f32 %v6313_v13, %v3060_v51  ;;  %v2780_v56 = vmul.f32 %v4915_v35, %v6386_v15  ;;  %v6436_v45 = vpop.xlane.xlu0 %2721  ;;  %4934 = vrsqrt.f32 %v2938_v10  ;;  %v2792_v29 = vsel %vm2790_vm8, %v2791_v14, %v2789_v44 }
 0x83b   : > { %v4919_v47 = vpop.eup %4918  ;;  %v3194_v10 = vmul.f32 2.0, %v3178_v34  ;;  %v3045_v12 = vmul.f32 %v6282_v22, %v6438_v41  ;;  %vm2797_vm12 = vcmp.eq.f32.partialorder %v6416_v32, 0.0 }
 0x83c   : > { %v2782_v30 = vsel %vm2781_vm7, %v6386_v15, %v2780_v56  ;;  %v3177_v25 = vmul.f32 %v4919_v47, %v6208_v0  ;;  %v4921_v55 = vpop.eup %4920  ;;  %4936 = vtanh.f32 %v3083_v60  ;;  %v2891_v60 = vmax.f32 %v6184_v28, 1e-16 }
 0x83d   : > { %v6451_v51 = vpop.xlane.xlu1 %2727  ;;  %v6453_v35 = vpop.eup %4922  ;;  %4938 = vrsqrt.f32 %v2937_v54  ;;  %v2785_v18 = vsel %vm2783_vm10, %v2784_v52, %v2782_v30  ;;  %v3024_v56 = vadd.f32 %v3008_v5, %v2987_v1  ;;  %v2893_v54 = vmax.f32 %v6194_v2, 1e-16 }
 0x83e   : > { %v3193_v48 = vmul.f32 2.0, %v3177_v25  ;;  %v6457_v0 = vpop.xlane.xlu0 %2627  ;;  %v4925_v58 = vpop.eup %4924  ;;  %v2919_v47 = vmul.f32 %v4909_v20, %v6354_v11  ;;  %v6473_v5 = vmul.f32 %v6263_v53, %v2792_v29  ;;  %v6476_v30 = vmul.f32 %v6396_v63, %v2785_v18 }
 0x83f   : > { %4940 = vrsqrt.f32 %v6457_v0  ;;  %v2798_v25 = vand.u32 2147483648, %v6416_v32  ;;  %v2920_v1 = vmul.f32 %v6294_v61, %v6382_v7  ;;  %v3061_v53 = vadd.f32 %v3045_v12, %v3024_v56 }
 0x840   : > { %v4927_v49 = vpop.eup %4926  ;;  %4942 = vrsqrt.f32 %v6184_v28  ;;  %4472 = vmatprep.mubr.msk.f32.mxu0 %vm1390_vm9, %v3193_v48  ;;  %v2988_v29 = vmul.f32 %v6255_v24, %v5728_v38  ;;  %v2989_v7 = vmul.f32 %v6255_v24, %v5731_v39  ;;  %v3009_v38 = vmul.f32 %v6261_v46, %v6476_v30 }
 0x841   : > { %v4929_v15 = vpop.eup %4928  ;;  %v2794_v44 = vmul.f32 %v4927_v49, %v6416_v32  ;;  %4473 = vmatmul.mubr.msk.f32.gmra.mrb[46].mxu0 %vm1390_vm9, %v3194_v10  ;;  %v6470_v34 = vpop.xlane.xlu1 %2629  ;;  %v2940_v10 = vmax.f32 %v6429_v17, 1e-16  ;;  %v2990_v17 = vmul.f32 %v6255_v24, %v5739_v3  ;;  %v2991_v12 = vmul.f32 %v6255_v24, %v5742_v6 }
 0x842   : > { %v4931_v28 = vpop.eup %4930  ;;  %4944 = vrsqrt.f32 %v6470_v34  ;;  %v2678_v11 = vpop.xlane.xlu0 %2677  ;;  %v6486_v48 = vmul.f32 %v4929_v15, %v2919_v47  ;;  %v3084_v47 = vadd.f32 %v6313_v13, %v3061_v53  ;;  %v2922_v6 = vmul.f32 %v6335_v59, %v6402_v21 }
 0x843   : > { %v6480_v20 = vpop.eup %4932  ;;  %v2796_v14 = vsel %vm2795_vm11, %v6416_v32, %v2794_v44  ;;  %v2939_v52 = vmax.f32 %v2678_v11, 1e-16  ;;  %4946 = vrsqrt.f32 %v2891_v60  ;;  %v6490_v18 = vmul.f32 %v4931_v28, %v2920_v1 }
 0x844   : > { %v2799_v63 = vsel %vm2797_vm12, %v2798_v25, %v2796_v14  ;;  %v4935_v61 = vpop.eup %4934  ;;  %v3010_v32 = vmul.f32 %v6261_v46, %v6473_v5  ;;  %v3046_v44 = vmul.f32 %v6282_v22, %v6486_v48  ;;  %vm2802_vm13 = vcmp.eq.f32.partialorder %v6457_v0, inf }
 0x845   : > { %4948 = vrsqrt.f32 %v2939_v52  ;;  %v6493_v49 = vpop.xlane.xlu1 %2683  ;;  %v6506_v15 = vmul.f32 %v4921_v55, %v2799_v63  ;;  %v3047_v3 = vmul.f32 %v6282_v22, %v6490_v18  ;;  %v2921_v55 = vmul.f32 %v4925_v58, %v6436_v45 }
 0x846   : > { %4950 = vrsqrt.f32 %v6194_v2  ;;  %v2726_v60 = vpop.xlane.xlu0 %2725  ;;  %v4937_v56 = vpop.eup %4936  ;;  %v2895_v2 = vmax.f32 %v6204_v40, 1e-16  ;;  %v3026_v1 = vadd.f32 %v3010_v32, %v2989_v7  ;;  %v2805_v59 = vand.u32 2147483648, %v6457_v0 }
 0x847   : > { %4952 = vrsqrt.f32 %v2893_v54  ;;  %v4939_v39 = vpop.eup %4938  ;;  %v3179_v28 = vmul.f32 %v4937_v56, %v6216_v16  ;;  %v3025_v16 = vadd.f32 %v3009_v38, %v2988_v29  ;;  %v3011_v63 = vmul.f32 %v6261_v46, %v6506_v15 }
 0x848   : > { %4954 = vrsqrt.f32 %v2940_v10  ;;  %v6528_v45 = vmul.f32 %v4935_v61, %v2922_v6  ;;  %v6530_v58 = vmul.f32 %v4939_v39, %v2921_v55  ;;  %vm2804_vm14 = vcmp.eq.f32.partialorder %v6457_v0, 0.0 }
 0x849   : > { %v4941_v25 = vpop.eup %4940  ;;  %v6518_v54 = vpop.xlane.xlu1 %2731  ;;  %v3195_v52 = vmul.f32 2.0, %v3179_v28  ;;  %vm2809_vm15 = vcmp.eq.f32.partialorder %v6470_v34, inf  ;;  %vm2811_vm0 = vcmp.eq.f32.partialorder %v6470_v34, 0.0  ;;  %v2812_v56 = vand.u32 2147483648, %v6470_v34 }
 0x84a   : > { %v4943_v11 = vpop.eup %4942  ;;  %v2801_v14 = vmul.f32 %v4941_v25, %v6457_v0  ;;  %v6521_v53 = vpop.xlane.xlu0 %2631  ;;  %v3062_v39 = vadd.f32 %v3046_v44, %v3025_v16  ;;  %v3027_v25 = vadd.f32 %v3011_v63, %v2990_v17  ;;  %v2942_v44 = vmax.f32 %v6493_v49, 1e-16 }
 0x84b   : > { %4956 = vrsqrt.f32 %v6521_v53  ;;  %4475 = vmatprep.mubr.msk.f32.mxu0 %vm1390_vm9, %v3195_v52  ;;  %v2992_v49 = vmul.f32 %v6255_v24, %v5750_v33  ;;  %vm2816_vm1 = vcmp.eq.f32.partialorder %v6521_v53, inf  ;;  %vm2818_vm2 = vcmp.eq.f32.partialorder %v6521_v53, 0.0 }
 0x84c   : > { %v4945_v21 = vpop.eup %4944  ;;  %v2803_v10 = vsel %vm2802_vm13, %v6457_v0, %v2801_v14  ;;  %v3085_v63 = vadd.f32 %v6313_v13, %v3062_v39  ;;  %vm3412_vm12 = vcmask 15360   ;;  %vm3734_vm13 = vcmask 31744  }
 0x84d   : > { %v2806_v29 = vsel %vm2804_vm14, %v2805_v59, %v2803_v10  ;;  %v2808_v7 = vmul.f32 %v4945_v21, %v6470_v34  ;;  %v6538_v32 = vpop.xlane.xlu1 %2633  ;;  %v4947_v38 = vpop.eup %4946  ;;  %v3063_v59 = vadd.f32 %v3047_v3, %v3026_v1  ;;  %v3048_v21 = vmul.f32 %v6282_v22, %v6530_v58 }
 0x84e   : > { %v6541_v61 = vmul.f32 %v6322_v23, %v2806_v29  ;;  %4958 = vrsqrt.f32 %v6538_v32  ;;  %v2682_v0 = vpop.xlane.xlu0 %2681  ;;  %v2923_v55 = vmul.f32 %v4947_v38, %v2726_v60  ;;  %v3049_v3 = vmul.f32 %v6282_v22, %v6528_v45 }
 0x84f   : > { %v4949_v28 = vpop.eup %4948  ;;  %v2810_v6 = vsel %vm2809_vm15, %v6470_v34, %v2808_v7  ;;  %v2941_v14 = vmax.f32 %v2682_v0, 1e-16  ;;  %vm2823_vm3 = vcmp.eq.f32.partialorder %v6538_v32, inf  ;;  %vm2825_vm4 = vcmp.eq.f32.partialorder %v6538_v32, 0.0 }
 0x850   : > { %v6546_v52 = vpop.eup %4950  ;;  %v3012_v23 = vmul.f32 %v6261_v46, %v6541_v61  ;;  %v2813_v10 = vsel %vm2811_vm0, %v2812_v56, %v2810_v6  ;;  %v6557_v16 = vmul.f32 %v4949_v28, %v2923_v55  ;;  %vm3751_vm14 = vcmask 39936  }
 0x851   : > { %v4953_v29 = vpop.eup %4952  ;;  %v6555_v17 = vmul.f32 %v4943_v11, %v2813_v10  ;;  %4960 = vrsqrt.f32 %v2941_v14  ;;  %v6559_v60 = vpop.xlane.xlu1 %2687  ;;  %v3064_v11 = vadd.f32 %v3048_v21, %v3027_v25  ;;  %v2819_v25 = vand.u32 2147483648, %v6521_v53 }
 0x852   : > { %4962 = vrsqrt.f32 %v6204_v40  ;;  %v2730_v1 = vpop.xlane.xlu0 %2729  ;;  %v3028_v34 = vadd.f32 %v3012_v23, %v2991_v12  ;;  %v4955_v7 = vpop.eup %4954  ;;  %v3086_v40 = vadd.f32 %v6313_v13, %v3063_v59  ;;  %v3050_v39 = vmul.f32 %v6282_v22, %v6557_v16 }
 0x853   : > { %4964 = vrsqrt.f32 %v2895_v2  ;;  %v3013_v38 = vmul.f32 %v6261_v46, %v6555_v17  ;;  %v3087_v2 = vadd.f32 %v6313_v13, %v3064_v11  ;;  %v2924_v14 = vmul.f32 %v6389_v37, %v6451_v51 }
 0x854   : > { %4966 = vtanh.f32 %v3084_v47  ;;  %v3065_v56 = vadd.f32 %v3049_v3, %v3028_v34  ;;  %v2826_v37 = vand.u32 2147483648, %v6538_v32  ;;  %v2925_v11 = vmul.f32 %v4953_v29, %v2730_v1 }
 0x855   : > { %v4957_v0 = vpop.eup %4956  ;;  %4968 = vrsqrt.f32 %v2942_v44  ;;  %v3029_v28 = vadd.f32 %v3013_v38, %v2992_v49  ;;  %v6572_v12 = vpop.xlane.xlu1 %2735  ;;  %v2993_v29 = vmul.f32 %v6255_v24, %v5753_v43  ;;  %v2926_v43 = vmul.f32 %v6431_v31, %v6518_v54 }
 0x856   : > { %v2815_v6 = vmul.f32 %v4957_v0, %v6521_v53  ;;  %v6576_v33 = vpop.xlane.xlu0 %2635  ;;  %4970 = vtanh.f32 %v3085_v63  ;;  %v3088_v21 = vadd.f32 %v6313_v13, %v3065_v56  ;;  %v6588_v63 = vmul.f32 %v4955_v7, %v2924_v14 }
 0x857   : > { %v3066_v47 = vadd.f32 %v3050_v39, %v3029_v28  ;;  %4972 = vrsqrt.f32 %v6576_v33  ;;  %vm2830_vm5 = vcmp.eq.f32.partialorder %v6576_v33, inf  ;;  %v2833_v31 = vand.u32 2147483648, %v6576_v33 }
 0x858   : > { %v4959_v55 = vpop.eup %4958  ;;  %v2817_v59 = vsel %vm2816_vm1, %v6521_v53, %v2815_v6  ;;  %4974 = vtanh.f32 %v3086_v40  ;;  %v2944_v40 = vmax.f32 %v6559_v60, 1e-16  ;;  %vm2832_vm6 = vcmp.eq.f32.partialorder %v6576_v33, 0.0 }
 0x859   : > { %v3089_v23 = vadd.f32 %v6313_v13, %v3066_v47  ;;  %v2820_v10 = vsel %vm2818_vm2, %v2819_v25, %v2817_v59  ;;  %v2822_v44 = vmul.f32 %v4959_v55, %v6538_v32  ;;  %v2686_v3 = vpop.xlane.xlu1 %2685  ;;  %4976 = vtanh.f32 %v3087_v2 }
 0x85a   : > { %v6591_v34 = vmul.f32 %v6378_v26, %v2820_v10  ;;  %v6595_v51 = vpop.xlane.xlu0 %2733  ;;  %v2943_v56 = vmax.f32 %v2686_v3, 1e-16  ;;  %4978 = vtanh.f32 %v3088_v21  ;;  %v2994_v47 = vmul.f32 %v6255_v24, %v5762_v36 }
 0x85b   : > { %v4961_v53 = vpop.eup %4960  ;;  %v2824_v49 = vsel %vm2823_vm3, %v6538_v32, %v2822_v44  ;;  %4980 = vtanh.f32 %v3089_v23  ;;  %v3051_v25 = vmul.f32 %v6282_v22, %v6588_v63  ;;  %vm3768_vm15 = vcmask 56320  }
 0x85c   : > { %v6599_v38 = vpop.eup %4962  ;;  %v3014_v7 = vmul.f32 %v6261_v46, %v6591_v34  ;;  %v2827_v26 = vsel %vm2825_vm4, %v2826_v37, %v2824_v49  ;;  %v6607_v39 = vmul.f32 %v4961_v53, %v2925_v11 }
 0x85d   : > { %v4965_v0 = vpop.eup %4964  ;;  %v6605_v28 = vmul.f32 %v6546_v52, %v2827_v26  ;;  %v6609_v6 = vpop.xlane.xlu1 %2637 }
 0x85e   : > { %v4967_v32 = vpop.eup %4966  ;;  %4982 = vrsqrt.f32 %v6609_v6  ;;  %v6614_v1 = vpop.xlane.xlu0 %2639  ;;  %v3030_v55 = vadd.f32 %v3014_v7, %v2993_v29  ;;  %v3052_v36 = vmul.f32 %v6282_v22, %v6607_v39  ;;  %vm2837_vm7 = vcmp.eq.f32.partialorder %v6609_v6, inf }
 0x85f   : > { %v4969_v2 = vpop.eup %4968  ;;  %v3015_v52 = vmul.f32 %v6261_v46, %v6605_v28  ;;  %4984 = vrsqrt.f32 %v6614_v1  ;;  %vm2839_vm8 = vcmp.eq.f32.partialorder %v6609_v6, 0.0  ;;  %vm2844_vm10 = vcmp.eq.f32.partialorder %v6614_v1, inf }
 0x860   : > { %v4971_v60 = vpop.eup %4970  ;;  %4986 = vrsqrt.f32 %v2943_v56  ;;  %v6627_v23 = vmul.f32 %v4969_v2, %v2926_v43  ;;  %v3067_v37 = vadd.f32 %v3051_v25, %v3030_v55  ;;  %vm2846_vm11 = vcmp.eq.f32.partialorder %v6614_v1, 0.0 }
 0x861   : > { %v4973_v14 = vpop.eup %4972  ;;  %4988 = vrsqrt.f32 %v2944_v40  ;;  %v3031_v59 = vadd.f32 %v3015_v52, %v2994_v47  ;;  %v3140_v21 = vpop.permute.xlu1 %3139 }
 0x862   : > { %v2829_v10 = vmul.f32 %v4973_v14, %v6576_v33  ;;  %v3181_v44 = vmul.f32 %v4971_v60, %v3140_v21  ;;  %v3138_v3 = vpop.permute.xlu0 %3137  ;;  %v4975_v53 = vpop.eup %4974  ;;  %v3090_v7 = vadd.f32 %v6313_v13, %v3067_v37  ;;  %v3053_v55 = vmul.f32 %v6282_v22, %v6627_v23 }
 0x863   : > { %v3068_v49 = vadd.f32 %v3052_v36, %v3031_v59  ;;  %v3180_v54 = vmul.f32 %v4967_v32, %v3138_v3  ;;  %v4977_v26 = vpop.eup %4976  ;;  %v2927_v21 = vmul.f32 %v4965_v0, %v6595_v51 }
 0x864   : > { %v2831_v11 = vsel %vm2830_vm5, %v6576_v33, %v2829_v10  ;;  %v4979_v47 = vpop.eup %4978  ;;  %v3197_v60 = vmul.f32 2.0, %v3181_v44  ;;  %4990 = vtanh.f32 %v3090_v7  ;;  %v2995_v33 = vmul.f32 %v6255_v24, %v5765_v19 }
 0x865   : > { %v3091_v56 = vadd.f32 %v6313_v13, %v3068_v49  ;;  %v2834_v40 = vsel %vm2832_vm6, %v2833_v31, %v2831_v11  ;;  %v3196_v29 = vmul.f32 2.0, %v3180_v54  ;;  %v3144_v2 = vpop.permute.xlu1 %3143  ;;  %v4981_v32 = vpop.eup %4980  ;;  %v2840_v44 = vand.u32 2147483648, %v6609_v6 }
 0x866   : > { %v6637_v52 = vmul.f32 %v6409_v42, %v2834_v40  ;;  %v3183_v25 = vmul.f32 %v4977_v26, %v3144_v2  ;;  %v3142_v43 = vpop.permute.xlu0 %3141  ;;  %v2928_v42 = vmul.f32 %v6480_v20, %v6572_v12  ;;  %v2847_v11 = vand.u32 2147483648, %v6614_v1 }
 0x867   : > { %4992 = vtanh.f32 %v3091_v56  ;;  %v3182_v14 = vmul.f32 %v4975_v53, %v3142_v43  ;;  %4476 = vmatmul.mubr.msk.f32.gmra.mrb[48].mxu0 %vm1390_vm9, %v3196_v29 }
 0x868   : > { %v4983_v59 = vpop.eup %4982  ;;  %v3016_v36 = vmul.f32 %v6261_v46, %v6637_v52  ;;  %4478 = vmatprep.mubr.msk.f32.mxu0 %vm1390_vm9, %v3197_v60  ;;  %v3199_v12 = vmul.f32 2.0, %v3183_v25 }
 0x869   : > { %v4985_v19 = vpop.eup %4984  ;;  %v2836_v10 = vmul.f32 %v4983_v59, %v6609_v6  ;;  %v3198_v3 = vmul.f32 2.0, %v3182_v14  ;;  %v3148_v37 = vpop.permute.xlu1 %3147 }
 0x86a   : > { %v4987_v53 = vpop.eup %4986  ;;  %v2843_v20 = vmul.f32 %v4985_v19, %v6614_v1  ;;  %v3185_v49 = vmul.f32 %v4981_v32, %v3148_v37  ;;  %v3146_v31 = vpop.permute.xlu0 %3145  ;;  %v3032_v51 = vadd.f32 %v3016_v36, %v2995_v33  ;;  %v7209_v36 = vld [vmem:[#allocation35_spill] sm:$0xff] }
 0x86b   : > { %v4989_v0 = vpop.eup %4988  ;;  %v2838_v54 = vsel %vm2837_vm7, %v6609_v6, %v2836_v10  ;;  %v3184_v7 = vmul.f32 %v4979_v47, %v3146_v31  ;;  %4479 = vmatmul.mubr.msk.f32.gmra.mrb[50].mxu0 %vm1390_vm9, %v3198_v3  ;;  %v6664_v29 = vmul.f32 %v4987_v53, %v2927_v21 }
 0x86c   : > { %v2841_v26 = vsel %vm2839_vm8, %v2840_v44, %v2838_v54  ;;  %v2845_v56 = vsel %vm2844_vm10, %v6614_v1, %v2843_v20  ;;  %4481 = vmatprep.mubr.msk.f32.mxu0 %vm1390_vm9, %v3199_v12  ;;  %v3069_v40 = vadd.f32 %v3053_v55, %v3032_v51  ;;  %v6669_v47 = vmul.f32 %v4989_v0, %v2928_v42  ;;  %v7208_v1 = vld [vmem:[#allocation34_spill] sm:$0xff] }
 0x86d   : > { %v6667_v2 = vmul.f32 %v6599_v38, %v2841_v26  ;;  %v2848_v60 = vsel %vm2846_vm11, %v2847_v11, %v2845_v56  ;;  %v3200_v25 = vmul.f32 2.0, %v3184_v7  ;;  %v3201_v6 = vmul.f32 2.0, %v3185_v49  ;;  %v3152_v38 = vpop.permute.xlu1 %3151 }
 0x86e   : > { %v6672_v43 = vmul.f32 %v6453_v35, %v2848_v60  ;;  %v3150_v32 = vpop.permute.xlu0 %3149  ;;  %v3092_v33 = vadd.f32 %v6313_v13, %v3069_v40  ;;  %v2996_v14 = vmul.f32 %v6255_v24, %v7208_v1  ;;  %v4991_v59 = vpop.eup %4990  ;;  %v2997_v42 = vmul.f32 %v6255_v24, %v7209_v36 }
 0x86f   : > { %v3017_v55 = vmul.f32 %v6261_v46, %v6667_v2  ;;  %4482 = vmatmul.mubr.msk.f32.gmra.mrb[52].mxu0 %vm1390_vm9, %v3200_v25  ;;  %v3054_v19 = vmul.f32 %v6282_v22, %v6664_v29  ;;  %v3186_v10 = vmul.f32 %v4991_v59, %v3150_v32  ;;  %v3055_v3 = vmul.f32 %v6282_v22, %v6669_v47 }
 0x870   : > { %v3018_v35 = vmul.f32 %v6261_v46, %v6672_v43  ;;  %4484 = vmatprep.mubr.msk.f32.mxu0 %vm1390_vm9, %v3201_v6  ;;  %4994 = vtanh.f32 %v3092_v33 }
 0x871   : > { %v4993_v21 = vpop.eup %4992  ;;  %v3033_v44 = vadd.f32 %v3017_v55, %v2996_v14  ;;  %v3202_v20 = vmul.f32 2.0, %v3186_v10  ;;  %v3156_v11 = vpop.permute.xlu1 %3155 }
 0x872   : > { %v3187_v37 = vmul.f32 %v4993_v21, %v3152_v38  ;;  %v3034_v53 = vadd.f32 %v3018_v35, %v2997_v42  ;;  %v3154_v51 = vpop.permute.xlu0 %3153 }
 0x873   : > { %v3070_v12 = vadd.f32 %v3054_v19, %v3033_v44  ;;  %4485 = vmatmul.mubr.msk.f32.gmra.mrb[54].mxu0 %vm1390_vm9, %v3202_v20 }
 0x874   : > { %v3203_v24 = vmul.f32 2.0, %v3187_v37  ;;  %v3071_v49 = vadd.f32 %v3055_v3, %v3034_v53 }
 0x875   : > { %v3093_v46 = vadd.f32 %v6313_v13, %v3070_v12 }
 0x876   : > { %4487 = vmatprep.mubr.msk.f32.mxu0 %vm1390_vm9, %v3203_v24  ;;  %v3094_v31 = vadd.f32 %v6313_v13, %v3071_v49  ;;  %v3158_v7 = vpop.permute.xlu0 %3157  ;;  %v4014_v13 = vld [vmem:[%s7102_s21] ss:$0 sm:$0xff] }
 0x877   : > { %4996 = vtanh.f32 %v3093_v46 }
 0x878   : > { %4998 = vtanh.f32 %v3094_v31 }
 0x87a   : > { %v4995_v0 = vpop.eup %4994 }
 0x87b   : > { %v3188_v54 = vmul.f32 %v4995_v0, %v3154_v51 }
 0x87d   : > { %v3204_v22 = vmul.f32 2.0, %v3188_v54 }
 0x87f   : > { %4488 = vmatmul.mubr.msk.f32.gmra.mrb[56].mxu0 %vm1390_vm9, %v3204_v22 }
 0x881   : > { %v4997_v26 = vpop.eup %4996 }
 0x882   : > { %v4999_v56 = vpop.eup %4998  ;;  %v3189_v40 = vmul.f32 %v4997_v26, %v3156_v11 }
 0x883   : > { %v3190_v60 = vmul.f32 %v4999_v56, %v3158_v7 }
 0x884   : > { %v3205_v25 = vmul.f32 2.0, %v3189_v40 }
 0x885   : > { %v3206_v6 = vmul.f32 2.0, %v3190_v60 }
 0x886   : > { %4490 = vmatprep.mubr.msk.f32.mxu0 %vm1390_vm9, %v3205_v25 }
 0x887   : > { %4491 = vmatmul.mubr.msk.f32.gmra.mrb[58].mxu0 %vm1390_vm9, %v3206_v6  ;;  %vm3717_vm9 = vcmask 23552  }
 0x90a   : > { %v4471_v32 = vpop.f32.mrb[44].mxu0 }
 0x90b   : > { %v6699_v33 = vadd.f32 %v4471_v32, %v4014_v13  ;;  %v3333_v1 = vpop.f32.mrb[45].mxu0 }
 0x90c   : > { %v6701_v14 = vadd.f32 %v4014_v13, %v3333_v1 }
 0x90d   : > { %v3416_v55 = vsel %vm3412_vm12, %v6699_v33, -inf }
 0x90e   : > { %3417 = vmax.xlane.f32.xlu0 %v3416_v55  ;;  %v3413_v38 = vsel %vm3412_vm12, %v6701_v14, -inf }
 0x90f   : > { %3414 = vmax.xlane.f32.xlu1 %v3413_v38 }
 0x914   : > { %v4474_v59 = vpop.f32.mrb[46].mxu0 }
 0x915   : > { %v6707_v36 = vadd.f32 %v4474_v59, %v4014_v13  ;;  %v3343_v42 = vpop.f32.mrb[47].mxu0 }
 0x916   : > { %v6709_v35 = vadd.f32 %v4014_v13, %v3343_v42 }
 0x917   : > { %v3422_v21 = vsel %vm3412_vm12, %v6707_v36, -inf }
 0x918   : > { %3423 = vmax.xlane.f32.xlu1 %v3422_v21  ;;  %v3419_v19 = vsel %vm3412_vm12, %v6709_v35, -inf }
 0x919   : > { %3420 = vmax.xlane.f32.xlu0 %v3419_v19 }
 0x93a   : > { %v4477_v10 = vpop.f32.mrb[48].mxu0 }
 0x93b   : > { %v6715_v44 = vadd.f32 %v4477_v10, %v4014_v13  ;;  %v3353_v3 = vpop.f32.mrb[49].mxu0 }
 0x93c   : > { %v6717_v37 = vadd.f32 %v4014_v13, %v3353_v3 }
 0x93d   : > { %v3428_v53 = vsel %vm3412_vm12, %v6715_v44, -inf }
 0x93e   : > { %3429 = vmax.xlane.f32.xlu1 %v3428_v53  ;;  %v4480_v20 = vpop.f32.mrb[50].mxu0  ;;  %v3425_v12 = vsel %vm3412_vm12, %v6717_v37, -inf }
 0x93f   : > { %v6723_v24 = vadd.f32 %v4480_v20, %v4014_v13  ;;  %3426 = vmax.xlane.f32.xlu0 %v3425_v12  ;;  %v3363_v49 = vpop.f32.mrb[51].mxu0 }
 0x940   : > { %v6725_v46 = vadd.f32 %v4014_v13, %v3363_v49  ;;  %v7210_v49 = vld [vmem:[#allocation19_spill] sm:$0xff] }
 0x941   : > { %v3434_v31 = vsel %vm3412_vm12, %v6723_v24, -inf }
 0x942   : > { %3435 = vmax.xlane.f32.xlu1 %v3434_v31  ;;  %v4483_v51 = vpop.f32.mrb[52].mxu0  ;;  %v3431_v0 = vsel %vm3412_vm12, %v6725_v46, -inf  ;;  %v7211_v31 = vld [vmem:[#allocation20_spill] sm:$0xff] }
 0x943   : > { %v6731_v54 = vadd.f32 %v4483_v51, %v4014_v13  ;;  %3432 = vmax.xlane.f32.xlu0 %v3431_v0  ;;  %v3373_v22 = vpop.f32.mrb[53].mxu0  ;;  %v7212_v51 = vld [vmem:[#allocation18_spill] sm:$0xff] }
 0x944   : > { %v6733_v11 = vadd.f32 %v4014_v13, %v3373_v22 }
 0x945   : > { %v3440_v7 = vsel %vm3412_vm12, %v6731_v54, -inf }
 0x946   : > { %3441 = vmax.xlane.f32.xlu1 %v3440_v7  ;;  %v3437_v26 = vsel %vm3412_vm12, %v6733_v11, -inf  ;;  %v4486_v56 = vpop.f32.mrb[54].mxu0 }
 0x947   : > { %3438 = vmax.xlane.f32.xlu0 %v3437_v26  ;;  %v6739_v40 = vadd.f32 %v4486_v56, %v4014_v13  ;;  %v3383_v60 = vpop.f32.mrb[55].mxu0 }
 0x948   : > { %v6741_v25 = vadd.f32 %v4014_v13, %v3383_v60 }
 0x949   : > { %v3446_v6 = vsel %vm3412_vm12, %v6739_v40, -inf }
 0x94a   : > { %3447 = vmax.xlane.f32.xlu1 %v3446_v6  ;;  %v3443_v32 = vsel %vm3412_vm12, %v6741_v25, -inf }
 0x94b   : > { %3444 = vmax.xlane.f32.xlu0 %v3443_v32 }
 0x952   : > { %v4489_v1 = vpop.f32.mrb[56].mxu0 }
 0x953   : > { %v6747_v55 = vadd.f32 %v4489_v1, %v4014_v13  ;;  %v3393_v38 = vpop.f32.mrb[57].mxu0 }
 0x954   : > { %v6749_v59 = vadd.f32 %v4014_v13, %v3393_v38 }
 0x955   : > { %v3452_v42 = vsel %vm3412_vm12, %v6747_v55, -inf }
 0x956   : > { %3453 = vmax.xlane.f32.xlu1 %v3452_v42  ;;  %v3449_v21 = vsel %vm3412_vm12, %v6749_v59, -inf }
 0x957   : > { %3450 = vmax.xlane.f32.xlu0 %v3449_v21 }
 0x95a   : > { %v4492_v19 = vpop.f32.mrb[58].mxu0 }
 0x95b   : > { %v6755_v10 = vadd.f32 %v4492_v19, %v4014_v13  ;;  %v3403_v3 = vpop.f32.mrb[59].mxu0 }
 0x95c   : > { %v6757_v53 = vadd.f32 %v4014_v13, %v3403_v3 }
 0x95d   : > { %v3458_v20 = vsel %vm3412_vm12, %v6755_v10, -inf }
 0x95e   : > { %3459 = vmax.xlane.f32.xlu1 %v3458_v20  ;;  %v3455_v12 = vsel %vm3412_vm12, %v6757_v53, -inf }
 0x95f   : > { %3456 = vmax.xlane.f32.xlu0 %v3455_v12 }
 0x96f   : > { %3591 = vrot.lane.b32.xlu1 %v7210_v49, %s5102_s30 }
 0x973   : > { %3593 = vrot.lane.b32.xlu1 %v7211_v31, %s5102_s30 }
 0x975   : > { %3589 = vrot.lane.b32.xlu0 %v7212_v51, %s5102_s30 }
 0x99b   : > { %v3418_v13 = vpop.xlane.xlu0 %3417 }
 0x99c   : > { %v3462_v0 = vsub.f32 %v6699_v33, %v3418_v13  ;;  %v3415_v22 = vpop.xlane.xlu1 %3414 }
 0x99d   : > { %v3461_v7 = vsub.f32 %v6701_v14, %v3415_v22 }
 0x99e   : > { %v3479_v26 = vmul.f32 1.442695, %v3462_v0 }
 0x99f   : > { %v3477_v56 = vmul.f32 1.442695, %v3461_v7 }
 0x9a0   : > { %5000 = vpow2.f32 %v3479_v26 }
 0x9a1   : > { %5002 = vpow2.f32 %v3477_v56 }
 0x9a5   : > { %v3424_v60 = vpop.xlane.xlu1 %3423 }
 0x9a6   : > { %v3464_v6 = vsub.f32 %v6707_v36, %v3424_v60  ;;  %v3421_v32 = vpop.xlane.xlu0 %3420 }
 0x9a7   : > { %v3463_v1 = vsub.f32 %v6709_v35, %v3421_v32 }
 0x9a8   : > { %v3483_v38 = vmul.f32 1.442695, %v3464_v6 }
 0x9a9   : > { %v3481_v42 = vmul.f32 1.442695, %v3463_v1 }
 0x9aa   : > { %5004 = vpow2.f32 %v3483_v38  ;;  %v6773_v21 = vpop.eup %5000 }
 0x9ab   : > { %5006 = vpow2.f32 %v3481_v42  ;;  %v6775_v33 = vpop.eup %5002  ;;  %v3512_v14 = vsel %vm3412_vm12, %v6773_v21, 0.0 }
 0x9ac   : > { %3513 = vadd.xlane.f32.xlu1 %v3512_v14  ;;  %v3509_v19 = vsel %vm3412_vm12, %v6775_v33, 0.0 }
 0x9ad   : > { %3510 = vadd.xlane.f32.xlu0 %v3509_v19 }
 0x9b4   : > { %v6781_v36 = vpop.eup %5004 }
 0x9b5   : > { %v6783_v3 = vpop.eup %5006  ;;  %v3518_v35 = vsel %vm3412_vm12, %v6781_v36, 0.0 }
 0x9b6   : > { %3519 = vadd.xlane.f32.xlu1 %v3518_v35  ;;  %v3515_v20 = vsel %vm3412_vm12, %v6783_v3, 0.0 }
 0x9b7   : > { %3516 = vadd.xlane.f32.xlu0 %v3515_v20 }
 0x9cb   : > { %v3430_v12 = vpop.xlane.xlu1 %3429 }
 0x9cc   : > { %v3466_v49 = vsub.f32 %v6715_v44, %v3430_v12  ;;  %v3427_v31 = vpop.xlane.xlu0 %3426 }
 0x9cd   : > { %v3465_v51 = vsub.f32 %v6717_v37, %v3427_v31 }
 0x9ce   : > { %v3487_v13 = vmul.f32 1.442695, %v3466_v49 }
 0x9cf   : > { %v3485_v0 = vmul.f32 1.442695, %v3465_v51  ;;  %v3436_v22 = vpop.xlane.xlu1 %3435 }
 0x9d0   : > { %5008 = vpow2.f32 %v3487_v13  ;;  %v3468_v7 = vsub.f32 %v6723_v24, %v3436_v22  ;;  %v3433_v26 = vpop.xlane.xlu0 %3432 }
 0x9d1   : > { %5010 = vpow2.f32 %v3485_v0  ;;  %v3467_v56 = vsub.f32 %v6725_v46, %v3433_v26 }
 0x9d2   : > { %v3491_v60 = vmul.f32 1.442695, %v3468_v7 }
 0x9d3   : > { %v3489_v6 = vmul.f32 1.442695, %v3467_v56  ;;  %v3442_v32 = vpop.xlane.xlu1 %3441 }
 0x9d4   : > { %5012 = vpow2.f32 %v3491_v60  ;;  %v3470_v1 = vsub.f32 %v6731_v54, %v3442_v32  ;;  %v3439_v44 = vpop.xlane.xlu0 %3438 }
 0x9d5   : > { %5014 = vpow2.f32 %v3489_v6  ;;  %v3469_v37 = vsub.f32 %v6733_v11, %v3439_v44 }
 0x9d6   : > { %v3495_v38 = vmul.f32 1.442695, %v3470_v1 }
 0x9d7   : > { %v3493_v42 = vmul.f32 1.442695, %v3469_v37  ;;  %v3448_v14 = vpop.xlane.xlu1 %3447 }
 0x9d8   : > { %5016 = vpow2.f32 %v3495_v38  ;;  %v3472_v19 = vsub.f32 %v6739_v40, %v3448_v14  ;;  %v3445_v46 = vpop.xlane.xlu0 %3444 }
 0x9d9   : > { %5018 = vpow2.f32 %v3493_v42  ;;  %v3471_v20 = vsub.f32 %v6741_v25, %v3445_v46 }
 0x9da   : > { %v6795_v24 = vpop.eup %5008  ;;  %v3499_v12 = vmul.f32 1.442695, %v3472_v19 }
 0x9db   : > { %v6798_v35 = vpop.eup %5010  ;;  %v3524_v54 = vsel %vm3412_vm12, %v6795_v24, 0.0  ;;  %v3497_v49 = vmul.f32 1.442695, %v3471_v20 }
 0x9dc   : > { %3525 = vadd.xlane.f32.xlu1 %v3524_v54  ;;  %v3521_v11 = vsel %vm3412_vm12, %v6798_v35, 0.0  ;;  %5020 = vpow2.f32 %v3499_v12 }
 0x9dd   : > { %3522 = vadd.xlane.f32.xlu0 %v3521_v11  ;;  %5022 = vpow2.f32 %v3497_v49 }
 0x9de   : > { %v6805_v31 = vpop.eup %5012 }
 0x9df   : > { %v6807_v51 = vpop.eup %5014  ;;  %v3530_v40 = vsel %vm3412_vm12, %v6805_v31, 0.0 }
 0x9e0   : > { %3531 = vadd.xlane.f32.xlu1 %v3530_v40  ;;  %v3527_v25 = vsel %vm3412_vm12, %v6807_v51, 0.0 }
 0x9e1   : > { %3528 = vadd.xlane.f32.xlu0 %v3527_v25 }
 0x9e2   : > { %v6813_v13 = vpop.eup %5016 }
 0x9e3   : > { %v6815_v0 = vpop.eup %5018  ;;  %v3454_v22 = vpop.xlane.xlu1 %3453  ;;  %v3536_v7 = vsel %vm3412_vm12, %v6813_v13, 0.0 }
 0x9e4   : > { %v3474_v26 = vsub.f32 %v6747_v55, %v3454_v22  ;;  %3537 = vadd.xlane.f32.xlu1 %v3536_v7  ;;  %v3451_v56 = vpop.xlane.xlu0 %3450  ;;  %v3533_v60 = vsel %vm3412_vm12, %v6815_v0, 0.0  ;;  %v7213_v22 = vld [vmem:[#allocation22_spill] sm:$0xff]  ;;  %v7214_v7 = vld [vmem:[#allocation24_spill] sm:$0xff] }
 0x9e5   : > { %v3473_v6 = vsub.f32 %v6749_v59, %v3451_v56  ;;  %3534 = vadd.xlane.f32.xlu0 %v3533_v60  ;;  %v7216_v56 = vld [vmem:[#allocation26_spill] sm:$0xff]  ;;  %v7217_v60 = vld [vmem:[#allocation23_spill] sm:$0xff] }
 0x9e6   : > { %v3503_v32 = vmul.f32 1.442695, %v3474_v26  ;;  %v6823_v44 = vpop.eup %5020  ;;  %v7215_v26 = vld [vmem:[#allocation21_spill] sm:$0xff] }
 0x9e7   : > { %v3501_v1 = vmul.f32 1.442695, %v3473_v6  ;;  %v6825_v37 = vpop.eup %5022  ;;  %v3542_v38 = vsel %vm3412_vm12, %v6823_v44, 0.0  ;;  %v7218_v6 = vld [vmem:[#allocation28_spill] sm:$0xff] }
 0x9e8   : > { %5024 = vpow2.f32 %v3503_v32  ;;  %3543 = vadd.xlane.f32.xlu1 %v3542_v38  ;;  %v3539_v55 = vsel %vm3412_vm12, %v6825_v37, 0.0  ;;  %v7219_v32 = vld [vmem:[#allocation25_spill] sm:$0xff]  ;;  %v7221_v38 = vld [vmem:[#allocation27_spill] sm:$0xff] }
 0x9e9   : > { %5026 = vpow2.f32 %v3501_v1  ;;  %3540 = vadd.xlane.f32.xlu0 %v3539_v55  ;;  %v7220_v1 = vld [vmem:[#allocation30_spill] sm:$0xff]  ;;  %v7222_v55 = vld [vmem:[#allocation32_spill] sm:$0xff] }
 0x9eb   : > { %v3460_v42 = vpop.xlane.xlu1 %3459 }
 0x9ec   : > { %v3476_v59 = vsub.f32 %v6755_v10, %v3460_v42  ;;  %v3457_v14 = vpop.xlane.xlu0 %3456  ;;  %v7223_v42 = vld [vmem:[#allocation29_spill] sm:$0xff] }
 0x9ed   : > { %v3475_v19 = vsub.f32 %v6757_v53, %v3457_v14  ;;  %v7225_v14 = vld [vmem:[#allocation33_spill] sm:$0xff] }
 0x9ee   : > { %v3507_v46 = vmul.f32 1.442695, %v3476_v59  ;;  %v7224_v59 = vld [vmem:[#allocation31_spill] sm:$0xff] }
 0x9ef   : > { %v3505_v20 = vmul.f32 1.442695, %v3475_v19  ;;  %v6875_v19 = vpop.permute.xlu1 %3591 }
 0x9f0   : > { %5028 = vpow2.f32 %v3507_v46 }
 0x9f1   : > { %5030 = vpow2.f32 %v3505_v20  ;;  %v6879_v20 = vpop.permute.xlu0 %3589 }
 0x9f2   : > { %v6833_v54 = vpop.eup %5024 }
 0x9f3   : > { %v6835_v12 = vpop.eup %5026  ;;  %v3548_v11 = vsel %vm3412_vm12, %v6833_v54, 0.0  ;;  %v6877_v46 = vpop.permute.xlu1 %3593 }
 0x9f4   : > { %3549 = vadd.xlane.f32.xlu1 %v3548_v11  ;;  %v3545_v49 = vsel %vm3412_vm12, %v6835_v12, 0.0 }
 0x9f5   : > { %3546 = vadd.xlane.f32.xlu0 %v3545_v49 }
 0x9fa   : > { %v6841_v10 = vpop.eup %5028 }
 0x9fb   : > { %v6843_v40 = vpop.eup %5030  ;;  %v3554_v53 = vsel %vm3412_vm12, %v6841_v10, 0.0 }
 0x9fc   : > { %3555 = vadd.xlane.f32.xlu1 %v3554_v53  ;;  %v3551_v25 = vsel %vm3412_vm12, %v6843_v40, 0.0 }
 0x9fd   : > { %3552 = vadd.xlane.f32.xlu0 %v3551_v25 }
 0xa0d   : > { %3597 = vrot.lane.b32.xlu1 %v7213_v22, %s5102_s30 }
 0xa11   : > { %3601 = vrot.lane.b32.xlu1 %v7214_v7, %s5102_s30 }
 0xa13   : > { %3595 = vrot.lane.b32.xlu0 %v7215_v26, %s5102_s30 }
 0xa15   : > { %3605 = vrot.lane.b32.xlu1 %v7216_v56, %s5102_s30 }
 0xa17   : > { %3599 = vrot.lane.b32.xlu0 %v7217_v60, %s5102_s30 }
 0xa19   : > { %3609 = vrot.lane.b32.xlu1 %v7218_v6, %s5102_s30 }
 0xa1b   : > { %3603 = vrot.lane.b32.xlu0 %v7219_v32, %s5102_s30 }
 0xa1d   : > { %3613 = vrot.lane.b32.xlu1 %v7220_v1, %s5102_s30 }
 0xa1f   : > { %3607 = vrot.lane.b32.xlu0 %v7221_v38, %s5102_s30 }
 0xa21   : > { %3617 = vrot.lane.b32.xlu1 %v7222_v55, %s5102_s30 }
 0xa23   : > { %3611 = vrot.lane.b32.xlu0 %v7223_v42, %s5102_s30 }
 0xa27   : > { %3615 = vrot.lane.b32.xlu0 %v7224_v59, %s5102_s30 }
 0xa2b   : > { %3619 = vrot.lane.b32.xlu0 %v7225_v14, %s5102_s30 }
 0xa39   : > { %v3514_v11 = vpop.xlane.xlu1 %3513 }
 0xa3a   : > { %5032 = vrcp.f32 %v3514_v11  ;;  %v3511_v49 = vpop.xlane.xlu0 %3510 }
 0xa3b   : > { %5034 = vrcp.f32 %v3511_v49 }
 0xa43   : > { %v3520_v53 = vpop.xlane.xlu1 %3519 }
 0xa44   : > { %5036 = vrcp.f32 %v3520_v53  ;;  %v3517_v25 = vpop.xlane.xlu0 %3516  ;;  %v5033_v22 = vpop.eup %5032 }
 0xa45   : > { %5038 = vrcp.f32 %v3517_v25  ;;  %v5035_v7 = vpop.eup %5034  ;;  %v3574_v26 = vmul.f32 %v5033_v22, %v6773_v21 }
 0xa46   : > { %v3573_v56 = vmul.f32 %v5035_v7, %v6775_v33 }
 0xa47   : > { %3655 = vrot.lane.b32.xlu0 %v3574_v26, %s5103_s26 }
 0xa48   : > { %3653 = vrot.lane.b32.xlu1 %v3573_v56, %s5103_s26 }
 0xa4e   : > { %v5037_v60 = vpop.eup %5036 }
 0xa4f   : > { %v5039_v6 = vpop.eup %5038  ;;  %v3576_v32 = vmul.f32 %v5037_v60, %v6781_v36 }
 0xa50   : > { %v3575_v1 = vmul.f32 %v5039_v6, %v6783_v3 }
 0xa51   : > { %3659 = vrot.lane.b32.xlu0 %v3576_v32, %s5103_s26 }
 0xa52   : > { %3657 = vrot.lane.b32.xlu1 %v3575_v1, %s5103_s26 }
 0xa69   : > { %v3526_v38 = vpop.xlane.xlu1 %3525 }
 0xa6a   : > { %5040 = vrcp.f32 %v3526_v38  ;;  %v3523_v21 = vpop.xlane.xlu0 %3522 }
 0xa6b   : > { %5042 = vrcp.f32 %v3523_v21 }
 0xa6d   : > { %v3532_v33 = vpop.xlane.xlu1 %3531 }
 0xa6e   : > { %5044 = vrcp.f32 %v3532_v33  ;;  %v3529_v55 = vpop.xlane.xlu0 %3528 }
 0xa6f   : > { %5046 = vrcp.f32 %v3529_v55 }
 0xa71   : > { %v3538_v42 = vpop.xlane.xlu1 %3537 }
 0xa72   : > { %5048 = vrcp.f32 %v3538_v42  ;;  %v3535_v59 = vpop.xlane.xlu0 %3534 }
 0xa73   : > { %5050 = vrcp.f32 %v3535_v59 }
 0xa74   : > { %v5041_v14 = vpop.eup %5040 }
 0xa75   : > { %v5043_v36 = vpop.eup %5042  ;;  %v3578_v3 = vmul.f32 %v5041_v14, %v6795_v24  ;;  %v3544_v49 = vpop.xlane.xlu1 %3543 }
 0xa76   : > { %v3577_v11 = vmul.f32 %v5043_v36, %v6798_v35  ;;  %5052 = vrcp.f32 %v3544_v49  ;;  %v3541_v25 = vpop.xlane.xlu0 %3540 }
 0xa77   : > { %3663 = vrot.lane.b32.xlu0 %v3578_v3, %s5103_s26  ;;  %5054 = vrcp.f32 %v3541_v25 }
 0xa78   : > { %v5045_v53 = vpop.eup %5044  ;;  %3661 = vrot.lane.b32.xlu1 %v3577_v11, %s5103_s26 }
 0xa79   : > { %v5047_v22 = vpop.eup %5046  ;;  %v3580_v7 = vmul.f32 %v5045_v53, %v6805_v31 }
 0xa7a   : > { %v3579_v26 = vmul.f32 %v5047_v22, %v6807_v51 }
 0xa7b   : > { %3667 = vrot.lane.b32.xlu0 %v3580_v7, %s5103_s26 }
 0xa7c   : > { %v5049_v56 = vpop.eup %5048  ;;  %3665 = vrot.lane.b32.xlu1 %v3579_v26, %s5103_s26 }
 0xa7d   : > { %v5051_v24 = vpop.eup %5050  ;;  %v3582_v35 = vmul.f32 %v5049_v56, %v6813_v13  ;;  %v7227_v56 = vld [vmem:[#allocation3_spill] sm:$0xff] }
 0xa7e   : > { %v3581_v60 = vmul.f32 %v5051_v24, %v6815_v0  ;;  %v3701_v24 = vsel %vm3412_vm12, %v7227_v56, %v6879_v20 }
 0xa7f   : > { %3671 = vrot.lane.b32.xlu0 %v3582_v35, %s5103_s26 }
 0xa80   : > { %3669 = vrot.lane.b32.xlu1 %v3581_v60, %s5103_s26  ;;  %v5053_v32 = vpop.eup %5052  ;;  %v7228_v60 = vld [vmem:[#allocation36_spill] sm:$0xff] }
 0xa81   : > { %v3550_v6 = vpop.xlane.xlu1 %3549  ;;  %v5055_v1 = vpop.eup %5054  ;;  %v3584_v51 = vmul.f32 %v5053_v32, %v6823_v44 }
 0xa82   : > { %5056 = vrcp.f32 %v3550_v6  ;;  %v3547_v31 = vpop.xlane.xlu0 %3546  ;;  %v3583_v38 = vmul.f32 %v5055_v1, %v6825_v37 }
 0xa83   : > { %5058 = vrcp.f32 %v3547_v31  ;;  %3675 = vrot.lane.b32.xlu0 %v3584_v51, %s5103_s26  ;;  %v3718_v31 = vsel %vm3717_vm9, %v3701_v24, %v6305_v57 }
 0xa84   : > { %3673 = vrot.lane.b32.xlu1 %v3583_v38, %s5103_s26  ;;  %v3735_v38 = vsel %vm3734_vm13, %v3718_v31, %v6303_v4 }
 0xa89   : > { %v3556_v13 = vpop.xlane.xlu1 %3555 }
 0xa8a   : > { %5060 = vrcp.f32 %v3556_v13  ;;  %v3553_v0 = vpop.xlane.xlu0 %3552 }
 0xa8b   : > { %5062 = vrcp.f32 %v3553_v0 }
 0xa8c   : > { %v5057_v21 = vpop.eup %5056 }
 0xa8d   : > { %v5059_v33 = vpop.eup %5058  ;;  %v3586_v55 = vmul.f32 %v5057_v21, %v6833_v54  ;;  %v3598_v11 = vpop.permute.xlu1 %3597 }
 0xa8e   : > { %v3585_v42 = vmul.f32 %v5059_v33, %v6835_v12  ;;  %v3596_v44 = vpop.permute.xlu0 %3595  ;;  %v7230_v33 = vld [vmem:[#allocation4_spill] sm:$0xff] }
 0xa8f   : > { %3679 = vrot.lane.b32.xlu0 %v3586_v55, %s5103_s26  ;;  %v3704_v57 = vsel %vm3412_vm12, %v7230_v33, %v3596_v44 }
 0xa90   : > { %3677 = vrot.lane.b32.xlu1 %v3585_v42, %s5103_s26  ;;  %v7231_v42 = vld [vmem:[#allocation5_spill] sm:$0xff]  ;;  %v3721_v4 = vsel %vm3717_vm9, %v3704_v57, %v6318_v62 }
 0xa91   : > { %v3602_v49 = vpop.permute.xlu1 %3601 }
 0xa92   : > { %v3600_v3 = vpop.permute.xlu0 %3599 }
 0xa94   : > { %v5061_v37 = vpop.eup %5060 }
 0xa95   : > { %v5063_v59 = vpop.eup %5062  ;;  %v3588_v14 = vmul.f32 %v5061_v37, %v6841_v10  ;;  %v3606_v53 = vpop.permute.xlu1 %3605  ;;  %v7226_v10 = vld [vmem:[#allocation2_spill] sm:$0xff]  ;;  %v3703_v37 = vsel %vm3412_vm12, %v7231_v42, %v6877_v46  ;;  %v7239_v42 = vld [vmem:[#allocation11_spill] sm:$0xff] }
 0xa96   : > { %v3587_v36 = vmul.f32 %v5063_v59, %v6843_v40  ;;  %v3604_v54 = vpop.permute.xlu0 %3603  ;;  %v3702_v40 = vsel %vm3412_vm12, %v7226_v10, %v6875_v19  ;;  %v7229_v19 = vld [vmem:[#allocation37_spill] sm:$0xff]  ;;  %v3720_v59 = vsel %vm3717_vm9, %v3703_v37, %v6343_v9  ;;  %v7232_v10 = vld [vmem:[#allocation38_spill] sm:$0xff] }
 0xa97   : > { %3683 = vrot.lane.b32.xlu0 %v3588_v14, %s5103_s26  ;;  %v3719_v6 = vsel %vm3717_vm9, %v3702_v40, %v7228_v60  ;;  %v3738_v14 = vsel %vm3734_vm13, %v3721_v4, %v6327_v8  ;;  %v3737_v40 = vsel %vm3734_vm13, %v3720_v59, %v7232_v10  ;;  %v7233_v60 = vld [vmem:[#allocation6_spill] sm:$0xff] }
 0xa98   : > { %3681 = vrot.lane.b32.xlu1 %v3587_v36, %s5103_s26  ;;  %v3736_v1 = vsel %vm3734_vm13, %v3719_v6, %v7229_v19  ;;  %v3706_v9 = vsel %vm3412_vm12, %v7233_v60, %v3600_v3  ;;  %v7234_v6 = vld [vmem:[#allocation7_spill] sm:$0xff] }
 0xa99   : > { %v6915_v22 = vpop.permute.xlu1 %3609  ;;  %v3705_v8 = vsel %vm3412_vm12, %v7234_v6, %v3598_v11  ;;  %v3723_v31 = vsel %vm3717_vm9, %v3706_v9, %v6422_v50  ;;  %v7235_v19 = vld [vmem:[#allocation39_spill] sm:$0xff] }
 0xa9a   : > { %v3608_v12 = vpop.permute.xlu0 %3607  ;;  %v3740_v3 = vsel %vm3734_vm13, %v3723_v31, %v6438_v41 }
 0xa9d   : > { %v6919_v26 = vpop.permute.xlu1 %3613 }
 0xa9e   : > { %v6913_v25 = vpop.permute.xlu0 %3611 }
 0xaa1   : > { %v6931_v32 = vpop.permute.xlu1 %3617 }
 0xaa2   : > { %v6917_v7 = vpop.permute.xlu0 %3615 }
 0xaa6   : > { %v6927_v35 = vpop.permute.xlu0 %3619 }
 0xab9   : > { %v3656_v51 = vpop.permute.xlu0 %3655 }
 0xaba   : > { %v3753_v20 = vsel %vm3751_vm14, %v3736_v1, %v3656_v51  ;;  %v3654_v13 = vpop.permute.xlu1 %3653  ;;  %v3722_v1 = vsel %vm3717_vm9, %v3705_v8, %v7235_v19  ;;  %v7236_v51 = vld [vmem:[#allocation8_spill] sm:$0xff] }
 0xabb   : > { %v3770_v0 = vsel %vm3768_vm15, %v3753_v20, 0.0  ;;  %v3752_v21 = vsel %vm3751_vm14, %v3735_v38, %v3654_v13  ;;  %v3708_v20 = vsel %vm3412_vm12, %v7236_v51, %v3604_v54  ;;  %v7237_v38 = vld [vmem:[#allocation9_spill] sm:$0xff]  ;;  %v3739_v50 = vsel %vm3734_vm13, %v3722_v1, %v6412_v27  ;;  %v7238_v54 = vld [vmem:[#allocation10_spill] sm:$0xff] }
 0xabc   : > { %3788 = vst [vmem:[%s6005_s1 + $0x18] sm:$0xff] %v3770_v0  ;;  %v3769_v55 = vsel %vm3768_vm15, %v3752_v21, 0.0  ;;  %v3707_v13 = vsel %vm3412_vm12, %v7237_v38, %v3602_v49  ;;  %v3725_v11 = vsel %vm3717_vm9, %v3708_v20, %v6473_v5  ;;  %v3709_v5 = vsel %vm3412_vm12, %v7239_v42, %v3606_v53 }
 0xabd   : > { %3786 = vst [vmem:[%s6005_s1 + $0x8] sm:$0xff] %v3769_v55  ;;  %v3724_v57 = vsel %vm3717_vm9, %v3707_v13, %v6476_v30  ;;  %v3710_v55 = vsel %vm3412_vm12, %v7238_v54, %v3608_v12  ;;  %v3742_v27 = vsel %vm3734_vm13, %v3725_v11, %v6490_v18  ;;  %v3726_v53 = vsel %vm3717_vm9, %v3709_v5, %v6506_v15  ;;  %v7241_v15 = vld [vmem:[#allocation13_spill] sm:$0xff] }
 0xabe   : > { %v3727_v12 = vsel %vm3717_vm9, %v3710_v55, %v6541_v61  ;;  %v3741_v59 = vsel %vm3734_vm13, %v3724_v57, %v6486_v48  ;;  %v7240_v61 = vld [vmem:[#allocation12_spill] sm:$0xff] }
 0xabf   : > { %v3712_v10 = vsel %vm3412_vm12, %v7240_v61, %v6913_v25  ;;  %v3744_v48 = vsel %vm3734_vm13, %v3727_v12, %v6528_v45 }
 0xac0   : > { %v3729_v45 = vsel %vm3717_vm9, %v3712_v10, %v6591_v34 }
 0xac3   : > { %v3660_v36 = vpop.permute.xlu0 %3659 }
 0xac4   : > { %v3755_v44 = vsel %vm3751_vm14, %v3738_v14, %v3660_v36  ;;  %v3658_v56 = vpop.permute.xlu1 %3657 }
 0xac5   : > { %v3772_v24 = vsel %vm3768_vm15, %v3755_v44, 0.0  ;;  %v3754_v46 = vsel %vm3751_vm14, %v3737_v40, %v3658_v56  ;;  %v3711_v56 = vsel %vm3412_vm12, %v7241_v15, %v6915_v22 }
 0xac6   : > { %3792 = vst [vmem:[%s6005_s1 + $0x38] sm:$0xff] %v3772_v24  ;;  %v3771_v62 = vsel %vm3768_vm15, %v3754_v46, 0.0  ;;  %v3743_v46 = vsel %vm3734_vm13, %v3726_v53, %v6530_v58  ;;  %v3728_v22 = vsel %vm3717_vm9, %v3711_v56, %v6555_v17  ;;  %v3746_v58 = vsel %vm3734_vm13, %v3729_v45, %v6588_v63  ;;  %v7242_v17 = vld [vmem:[#allocation14_spill] sm:$0xff]  ;;  %v7243_v63 = vld [vmem:[#allocation15_spill] sm:$0xff] }
 0xac7   : > { %3790 = vst [vmem:[%s6005_s1 + $0x28] sm:$0xff] %v3771_v62  ;;  %v3745_v31 = vsel %vm3734_vm13, %v3728_v22, %v6557_v16  ;;  %v3714_v20 = vsel %vm3412_vm12, %v7242_v17, %v6917_v7  ;;  %v3713_v38 = vsel %vm3412_vm12, %v7243_v63, %v6919_v26 }
 0xac8   : > { %v3731_v16 = vsel %vm3717_vm9, %v3714_v20, %v6637_v52  ;;  %v3730_v13 = vsel %vm3717_vm9, %v3713_v38, %v6605_v28  ;;  %v7245_v28 = vld [vmem:[#allocation17_spill] sm:$0xff] }
 0xac9   : > { %v3747_v7 = vsel %vm3734_vm13, %v3730_v13, %v6607_v39 }
 0xae9   : > { %v3664_v0 = vpop.permute.xlu0 %3663 }
 0xaea   : > { %v3757_v21 = vsel %vm3751_vm14, %v3740_v3, %v3664_v0  ;;  %v3662_v33 = vpop.permute.xlu1 %3661  ;;  %v3748_v3 = vsel %vm3734_vm13, %v3731_v16, %v6627_v23  ;;  %v3715_v23 = vsel %vm3412_vm12, %v7245_v28, %v6931_v32 }
 0xaeb   : > { %v3774_v49 = vsel %vm3768_vm15, %v3757_v21, 0.0  ;;  %v3756_v41 = vsel %vm3751_vm14, %v3739_v50, %v3662_v33  ;;  %v7244_v50 = vld [vmem:[#allocation16_spill] sm:$0xff] }
 0xaec   : > { %3796 = vst [vmem:[%s6005_s1 + $0x58] sm:$0xff] %v3774_v49  ;;  %v3773_v37 = vsel %vm3768_vm15, %v3756_v41, 0.0  ;;  %v3716_v26 = vsel %vm3412_vm12, %v7244_v50, %v6927_v35  ;;  %v3732_v35 = vsel %vm3717_vm9, %v3715_v23, %v6667_v2 }
 0xaed   : > { %3794 = vst [vmem:[%s6005_s1 + $0x48] sm:$0xff] %v3773_v37  ;;  %v3668_v30 = vpop.permute.xlu0 %3667  ;;  %v3733_v39 = vsel %vm3717_vm9, %v3716_v26, %v6672_v43  ;;  %v3749_v41 = vsel %vm3734_vm13, %v3732_v35, %v6664_v29 }
 0xaee   : > { %v3759_v4 = vsel %vm3751_vm14, %v3742_v27, %v3668_v30  ;;  %v3666_v14 = vpop.permute.xlu1 %3665  ;;  %v3750_v54 = vsel %vm3734_vm13, %v3733_v39, %v6669_v47 }
 0xaef   : > { %v3776_v36 = vsel %vm3768_vm15, %v3759_v4, 0.0  ;;  %v3758_v44 = vsel %vm3751_vm14, %v3741_v59, %v3666_v14 }
 0xaf0   : > { %3800 = vst [vmem:[%s6005_s1 + $0x78] sm:$0xff] %v3776_v36  ;;  %v3775_v18 = vsel %vm3768_vm15, %v3758_v44, 0.0 }
 0xaf1   : > { %3798 = vst [vmem:[%s6005_s1 + $0x68] sm:$0xff] %v3775_v18  ;;  %v3672_v40 = vpop.permute.xlu0 %3671 }
 0xaf2   : > { %v3761_v24 = vsel %vm3751_vm14, %v3744_v48, %v3672_v40  ;;  %v3670_v62 = vpop.permute.xlu1 %3669 }
 0xaf3   : > { %v3778_v60 = vsel %vm3768_vm15, %v3761_v24, 0.0  ;;  %v3760_v25 = vsel %vm3751_vm14, %v3743_v46, %v3670_v62 }
 0xaf4   : > { %3804 = vst [vmem:[%s6005_s1 + $0x98] sm:$0xff] %v3778_v60  ;;  %v3777_v9 = vsel %vm3768_vm15, %v3760_v25, 0.0 }
 0xaf5   : > { %3802 = vst [vmem:[%s6005_s1 + $0x88] sm:$0xff] %v3777_v9  ;;  %v3676_v6 = vpop.permute.xlu0 %3675 }
 0xaf6   : > { %v3763_v8 = vsel %vm3751_vm14, %v3746_v58, %v3676_v6  ;;  %v3674_v19 = vpop.permute.xlu1 %3673 }
 0xaf7   : > { %v3780_v1 = vsel %vm3768_vm15, %v3763_v8, 0.0  ;;  %v3762_v34 = vsel %vm3751_vm14, %v3745_v31, %v3674_v19 }
 0xaf8   : > { %3808 = vst [vmem:[%s6005_s1 + $0xb8] sm:$0xff] %v3780_v1  ;;  %v3779_v51 = vsel %vm3768_vm15, %v3762_v34, 0.0 }
 0xaf9   : > { %3806 = vst [vmem:[%s6005_s1 + $0xa8] sm:$0xff] %v3779_v51 }
 0xb01   : > { %v3680_v0 = vpop.permute.xlu0 %3679 }
 0xb02   : > { %v3765_v11 = vsel %vm3751_vm14, %v3748_v3, %v3680_v0  ;;  %v3678_v21 = vpop.permute.xlu1 %3677 }
 0xb03   : > { %v3782_v52 = vsel %vm3768_vm15, %v3765_v11, 0.0  ;;  %v3764_v33 = vsel %vm3751_vm14, %v3747_v7, %v3678_v21 }
 0xb04   : > { %3812 = vst [vmem:[%s6005_s1 + $0xd8] sm:$0xff] %v3782_v52  ;;  %v3781_v57 = vsel %vm3768_vm15, %v3764_v33, 0.0 }
 0xb05   : > { %3810 = vst [vmem:[%s6005_s1 + $0xc8] sm:$0xff] %v3781_v57 }
 0xb09   : > { %v3684_v55 = vpop.permute.xlu0 %3683 }
 0xb0a   : > { %v3767_v49 = vsel %vm3751_vm14, %v3750_v54, %v3684_v55  ;;  %v3682_v32 = vpop.permute.xlu1 %3681 }
 0xb0b   : > { %v3784_v42 = vsel %vm3768_vm15, %v3767_v49, 0.0  ;;  %v3766_v5 = vsel %vm3751_vm14, %v3749_v41, %v3682_v32 }
 0xb0c   : > { %3816 = vst [vmem:[%s6005_s1 + $0xf8] sm:$0xff] %v3784_v42  ;;  %v3783_v43 = vsel %vm3768_vm15, %v3766_v5, 0.0 }
 0xb0d   : > { %3814 = vst [vmem:[%s6005_s1 + $0xe8] sm:$0xff] %v3783_v43 }
 0xb0e PF: > { %s32_s3 = sadd.s32 1, %s5097_s3  }
 0xb0f   : > { %p29_p4 = scmp.ge.s32.totalorder %s32_s3, 4  }
 0xb11   :  { %31 = sbr.rel (!%p29_p4) target bundleno = 8 (0x8), region = 141 }

</bundles_post_ra>
